<compile_context>
chip_gen: v5e
topology: v5e:2x2
jax: 0.10.0
libtpu: 0.0.40
codegen_flags: <defaults>
</compile_context>

<pallas_src>
import functools
import inspect
import math

import jax
import jax.numpy as jnp
from jax import lax
from jax.experimental import pallas as pl
from jax.experimental.pallas import tpu as pltpu


try:
    _HAS_PIPELINE_MODE = hasattr(pl, "Buffered") and (
        "pipeline_mode" in inspect.signature(pl.BlockSpec).parameters
    )
except (TypeError, ValueError):  # pragma: no cover
    _HAS_PIPELINE_MODE = False


def transformer_block_kernel(
    x_ref,
    ln1w_ref, ln1b_ref,
    wq_ref, bq_ref,
    wkv_ref, bkv_ref,
    wo_ref, bo_ref,
    ln2w_ref, ln2b_ref,
    w1_ref, b1_ref, w2_ref, b2_ref,
    o_ref,
    k_s, v_s, m_s, l_s, acc_s,
    *, num_heads: int, q_tile: int, k_tile: int, kv_chunk: int,
):
    eps = 1e-5                       # PyTorch nn.LayerNorm default
    f32 = jnp.float32
    bf16 = jnp.bfloat16

    T, C = x_ref.shape               # full sequence for this batch element
    H = num_heads
    D = C // H
    tq = q_tile
    tk = k_tile
    qi = pl.program_id(1)
    scale = 1.0 / math.sqrt(D)

    def layer_norm(v, w_ref, b_ref):
        mu = jnp.mean(v, axis=-1, keepdims=True)
        xc = v - mu
        var = jnp.mean(xc * xc, axis=-1, keepdims=True)      # biased (PyTorch)
        return xc * lax.rsqrt(var + eps) * w_ref[0] + b_ref[0]

    # ---- prologue: once per batch element (first q-tile) -------------------------
    # K/V for the whole sequence, computed in fixed row chunks (live intermediate
    # is O(kv_chunk * 2C), not O(T * 3C)) and cached head-major in bf16 scratch.
    # Q is NOT cached; it is recomputed per q-tile (FLOP-neutral, frees VMEM).
    # NOTE: relies on the q axis being "arbitrary" (in-order) within each batch
    # element so qi == 0 runs before later q-tiles of the same batch.
    @pl.when(qi == 0)
    def _():
        wkv = wkv_ref[...]                                   # (C, 2C) bf16, resident
        bkv = bkv_ref[0]                                     # (2C,) f32
        r0 = 0
        while r0 < T:                                        # static chunk loop
            rows = min(kv_chunk, T - r0)
            h1 = layer_norm(x_ref[r0:r0 + rows, :], ln1w_ref, ln1b_ref)
            kv = jnp.dot(h1.astype(bf16), wkv,
                         preferred_element_type=f32) + bkv   # (rows, 2C) f32
            for h in range(H):
                k_s[h, r0:r0 + rows, :] = kv[:, h * D:(h + 1) * D].astype(bf16)
                v_s[h, r0:r0 + rows, :] = kv[:, C + h * D:C + (h + 1) * D].astype(bf16)
            r0 += rows

    # ---- per q-tile ----------------------------------------------------------------
    start = pl.multiple_of(qi * tq, tq)
    x_rows = x_ref[pl.ds(start, tq), :]                      # (tq, C) f32

    # Q for this tile only (no Q scratch), pre-scaled by 1/sqrt(D).
    h1q = layer_norm(x_rows, ln1w_ref, ln1b_ref)
    qf = (jnp.dot(h1q.astype(bf16), wq_ref[...],
                  preferred_element_type=f32) + bq_ref[0]) * scale       # (tq, C)
    qh = jnp.stack([qf[:, h * D:(h + 1) * D] for h in range(H)],
                   axis=0).astype(bf16)                      # (H, tq, D)

    # Online-softmax state for this q-tile.
    m_s[...] = jnp.full(m_s.shape, -1e30, dtype=f32)
    l_s[...] = jnp.zeros(l_s.shape, dtype=f32)
    acc_s[...] = jnp.zeros(acc_s.shape, dtype=f32)

    row_ids = start + lax.broadcasted_iota(jnp.int32, (tq, tk), 0)
    col_iota = lax.broadcasted_iota(jnp.int32, (tq, tk), 1)

    # Causal block skipping: only key blocks intersecting rows [start, start+tq).
    nkb = pl.cdiv((qi + 1) * tq, tk)

    def kv_block(kj, carry):
        kstart = pl.multiple_of(kj * tk, tk)
        k_blk = k_s[:, pl.ds(kstart, tk), :]                 # (H, tk, D) bf16
        v_blk = v_s[:, pl.ds(kstart, tk), :]                 # (H, tk, D) bf16

        s = jnp.einsum("hqd,hkd->hqk", qh, k_blk,
                       preferred_element_type=f32)           # (H, tq, tk) f32
        # Finite -1e30 bias is safe: every query row sees its diagonal in key
        # block 0, so the running max is always a real (finite) score.
        bias = jnp.where(kstart + col_iota <= row_ids, f32(0.0), f32(-1e30))
        s = s + bias[None, :, :]

        m_prev = m_s[...]
        m_new = jnp.maximum(m_prev, jnp.max(s, axis=-1, keepdims=True))
        alpha = jnp.exp(m_prev - m_new)
        p = jnp.exp(s - m_new)
        l_s[...] = alpha * l_s[...] + jnp.sum(p, axis=-1, keepdims=True)
        acc_s[...] = alpha * acc_s[...] + jnp.einsum(
            "hqk,hkd->hqd", p.astype(bf16), v_blk, preferred_element_type=f32)
        m_s[...] = m_new
        return carry

    lax.fori_loop(0, nkb, kv_block, 0)

    # Deferred normalization on the (H, tq, D) accumulator; head merge folded into
    # the output projection (Wo pre-reshaped to (H, D, C); static unroll over heads
    # since Mosaic does not lower multi-contracting-dim dot_general).
    inv_l = pl.reciprocal(l_s[...], approx=True)             # EUP reciprocal
    proj = jnp.zeros((tq, C), f32)
    for h in range(H):
        a_h = (acc_s[h] * inv_l[h]).astype(bf16)             # (tq, D)
        proj = proj + jnp.dot(a_h, wo_ref[h], preferred_element_type=f32)
    x1 = x_rows + proj + bo_ref[0]                           # attention residual

    # MLP: LN2 -> Linear -> ReLU -> Linear, + residual.
    h2 = layer_norm(x1, ln2w_ref, ln2b_ref)
    ff = jnp.dot(h2.astype(bf16), w1_ref[...], preferred_element_type=f32) + b1_ref[0]
    ff = jnp.maximum(ff, 0.0)
    y = jnp.dot(ff.astype(bf16), w2_ref[...], preferred_element_type=f32) + b2_ref[0]

    o_ref[...] = x1 + y


def transformer_block(x, params, *, num_heads, q_tile=None, k_tile=None, kv_chunk=None):
    """x: (B, T, C) f32. Linear weights in params are (in, out) (PyTorch W.T)."""
    B, T, C = x.shape
    Cf = 4 * C
    H = num_heads
    assert C % H == 0, "embed dim must be divisible by num_heads"
    D = C // H

    dev_kind = jax.devices()[0].device_kind.lower()
    if q_tile is None:
        # v5 parts have a 128-wide MXU -> tq=128 saturates it; v6e/v7x want 256.
        q_tile = min(T, 128 if "v5" in dev_kind else 256)
    tq = q_tile
    if k_tile is None:
        k_tile = min(T, 512)
    tk = k_tile
    if kv_chunk is None:
        kv_chunk = min(T, 512)
    kv_chunk = min(kv_chunk, T)

    assert T % tq == 0 and tq % 8 == 0, "q_tile must divide T and be a multiple of 8"
    assert T % tk == 0 and tk % 8 == 0, "k_tile must divide T and be a multiple of 8"
    assert tk == T or tk % 16 == 0, \
        "k_tile must be a multiple of 16 (bf16 K/V scratch sublane tiling) unless k_tile == T"

    (ln1w, ln1b, wq, bq, wk, bk, wv, bv, wo, bo,
     ln2w, ln2b, w1, b1, w2, b2) = params

    bf16 = jnp.bfloat16
    # bf16 weights halve resident VMEM / DMA traffic (intentional precision choice);
    # biases and LN params stay f32.
    wq_b = wq.astype(bf16)
    wkv = jnp.concatenate([wk, wv], axis=1).astype(bf16)     # fused K/V projection (C, 2C)
    bkv = jnp.concatenate([bk, bv]).reshape(1, -1)
    wo_h = wo.reshape(H, D, C).astype(bf16)                  # head-major output projection
    w1_b = w1.astype(bf16)
    w2_b = w2.astype(bf16)
    vec = lambda a: a.reshape(1, -1)

    kernel = functools.partial(transformer_block_kernel, num_heads=H,
                               q_tile=tq, k_tile=tk, kv_chunk=kv_chunk)

    # Generation-aware VMEM ceiling: ~75% of physical per-TC VMEM
    # (~48 MiB on v7x, ~96 MiB on v5e/v6e).
    try:
        vmem_cap = int(pltpu.get_tpu_info().vmem_capacity_bytes)
    except Exception:
        vmem_cap = 64 * 2 ** 20          # conservative fallback (v7x per-TC size)
    ceiling = (vmem_cap * 3) // 4

    lane = 128
    rl = lambda n: ((n + lane - 1) // lane) * lane
    Dp, Cp, C2p, Cfp = rl(D), rl(C), rl(2 * C), rl(Cf)

    def build(single_buffer):
        if single_buffer:
            def const_spec(shape):
                nd = len(shape)
                return pl.BlockSpec(shape, lambda b, q: (0,) * nd,
                                    pipeline_mode=pl.Buffered(1))
            x_spec = pl.BlockSpec((None, T, C), lambda b, q: (b, 0, 0),
                                  pipeline_mode=pl.Buffered(1))
        else:
            def const_spec(shape):
                nd = len(shape)
                return pl.BlockSpec(shape, lambda b, q: (0,) * nd)
            x_spec = pl.BlockSpec((None, T, C), lambda b, q: (b, 0, 0))

        in_specs = [
            x_spec,                                           # x: full sequence per batch
            const_spec((1, C)), const_spec((1, C)),           # ln1 w, b
            const_spec((C, C)), const_spec((1, C)),           # Wq, bq
            const_spec((C, 2 * C)), const_spec((1, 2 * C)),   # Wkv, bkv
            const_spec((H, D, C)), const_spec((1, C)),        # Wo (head-major), bo
            const_spec((1, C)), const_spec((1, C)),           # ln2 w, b
            const_spec((C, Cf)), const_spec((1, Cf)),         # W1, b1
            const_spec((Cf, C)), const_spec((1, C)),          # W2, b2
        ]

        wbuf = 1 if single_buffer else 2
        weights = 2 * (C * Cp + C * C2p + H * D * Cp + C * Cfp + Cf * Cp) * wbuf
        biases = 4 * (6 * Cp + C2p + Cfp) * wbuf
        xbytes = 4 * T * Cp * (1 if single_buffer else 2)
        outbytes = 4 * tq * Cp * 2
        kv_scr = 2 * 2 * H * T * Dp                           # bf16 K + V caches
        state = 4 * H * tq * (2 * lane + Dp)                  # m, l, acc scratch
        live = 4 * (2 * H * tq * rl(tk)                       # scores + exp block
                    + kv_chunk * (Cp + C2p)                   # prologue chunk
                    + 4 * tq * Cp + tq * Cfp)                 # q/x/x1/h2 rows + ff
        need = int(1.5 * (weights + biases + xbytes + outbytes + kv_scr + state + live))
        vmem_limit = int(min(ceiling, max(16 * 2 ** 20, need)))

        return pl.pallas_call(
            kernel,
            out_shape=jax.ShapeDtypeStruct((B, T, C), jnp.float32),
            grid_spec=pltpu.PrefetchScalarGridSpec(
                num_scalar_prefetch=0,
                grid=(B, T // tq),
                in_specs=in_specs,
                out_specs=pl.BlockSpec((None, tq, C), lambda b, q: (b, q, 0)),
                scratch_shapes=[
                    pltpu.VMEM((H, T, D), bf16),              # K cache
                    pltpu.VMEM((H, T, D), bf16),              # V cache
                    pltpu.VMEM((H, tq, 1), jnp.float32),      # running max
                    pltpu.VMEM((H, tq, 1), jnp.float32),      # running denominator
                    pltpu.VMEM((H, tq, D), jnp.float32),      # PV accumulator
                ],
            ),
            compiler_params=pltpu.CompilerParams(
                # batch across TensorCores (v7x megacore); q-tiles "arbitrary" so the
                # qi==0 K/V prologue always precedes later q-tiles of a batch element.
                # NOTE: on v7x keep B >= 2 per chip or one core idles.
                dimension_semantics=("parallel", "arbitrary"),
                vmem_limit_bytes=vmem_limit,
            ),
        )

    args = (
        x,
        vec(ln1w), vec(ln1b),
        wq_b, vec(bq),
        wkv, bkv,
        wo_h, vec(bo),
        vec(ln2w), vec(ln2b),
        w1_b, vec(b1),
        w2_b, vec(b2),
    )

    if _HAS_PIPELINE_MODE:
        try:
            return build(True)(*args)
        except Exception:
            # pl.Buffered(1) not supported by this jax/libtpu combo ->
            # fall back to default double buffering.
            pass
    return build(False)(*args)


def init_params(key, C):
    """Deterministic synthetic parameters matching the PyTorch module's shapes.
    Linear weights are stored as (in, out) (i.e. PyTorch weight transposed)."""
    Cf = 4 * C
    ks = jax.random.split(key, 12)
    s = 0.05
    ln1w = jnp.ones((C,), jnp.float32)
    ln1b = jnp.zeros((C,), jnp.float32)
    ln2w = jnp.ones((C,), jnp.float32)
    ln2b = jnp.zeros((C,), jnp.float32)
    wq = s * jax.random.normal(ks[0], (C, C), jnp.float32)
    bq = s * jax.random.normal(ks[1], (C,), jnp.float32)
    wk = s * jax.random.normal(ks[2], (C, C), jnp.float32)
    bk = s * jax.random.normal(ks[3], (C,), jnp.float32)
    wv = s * jax.random.normal(ks[4], (C, C), jnp.float32)
    bv = s * jax.random.normal(ks[5], (C,), jnp.float32)
    wo = s * jax.random.normal(ks[6], (C, C), jnp.float32)
    bo = s * jax.random.normal(ks[7], (C,), jnp.float32)
    w1 = s * jax.random.normal(ks[8], (C, Cf), jnp.float32)
    b1 = s * jax.random.normal(ks[9], (Cf,), jnp.float32)
    w2 = s * jax.random.normal(ks[10], (Cf, C), jnp.float32)
    b2 = s * jax.random.normal(ks[11], (C,), jnp.float32)
    return (ln1w, ln1b, wq, bq, wk, bk, wv, bv, wo, bo,
            ln2w, ln2b, w1, b1, w2, b2)


def reference_block(x, params, num_heads):
    """Pure-JAX f32 reference mirroring the PyTorch forward."""
    (ln1w, ln1b, wq, bq, wk, bk, wv, bv, wo, bo,
     ln2w, ln2b, w1, b1, w2, b2) = params
    B, T, C = x.shape
    H = num_heads
    D = C // H
    eps = 1e-5

    def ln(v, w, b):
        mu = v.mean(-1, keepdims=True)
        var = ((v - mu) ** 2).mean(-1, keepdims=True)
        return (v - mu) / jnp.sqrt(var + eps) * w + b

    h = ln(x, ln1w, ln1b)
    Q = (h @ wq + bq).reshape(B, T, H, D).transpose(0, 2, 1, 3)
    K = (h @ wk + bk).reshape(B, T, H, D).transpose(0, 2, 1, 3)
    V = (h @ wv + bv).reshape(B, T, H, D).transpose(0, 2, 1, 3)
    s = jnp.einsum("bhtd,bhsd->bhts", Q, K) / math.sqrt(D)
    mask = jnp.tril(jnp.ones((T, T), bool))
    s = jnp.where(mask, s, -jnp.inf)
    p = jax.nn.softmax(s, axis=-1)
    a = jnp.einsum("bhts,bhsd->bhtd", p, V).transpose(0, 2, 1, 3).reshape(B, T, C)
    x = x + (a @ wo + bo)
    h = ln(x, ln2w, ln2b)
    f = jnp.maximum(h @ w1 + b1, 0.0) @ w2 + b2
    return x + f


if __name__ == "__main__":
    B, T, C = 2, 32, 32          # context_window == T; tril mask covers full sequence
    num_heads = 4

    key = jax.random.PRNGKey(0)
    kx, kp = jax.random.split(key)
    x = jax.random.normal(kx, (B, T, C), jnp.float32)
    params = init_params(kp, C)

    # Small tiles so the test exercises: multiple q-tiles, multiple key blocks
    # (online softmax + causal block skipping) and a chunked K/V prologue.
    out = transformer_block(x, params, num_heads=num_heads,
                            q_tile=8, k_tile=16, kv_chunk=16)
    out = jax.block_until_ready(out)

    ref = reference_block(x, params, num_heads)
    assert out.shape == (B, T, C)
    max_diff = jnp.max(jnp.abs(out - ref))
    # bf16 MXU matmuls + approx reciprocal -> relaxed tolerance vs the f32 reference.
    assert jnp.allclose(out, ref, atol=3e-2, rtol=3e-2), f"max diff {max_diff}"

    print("KERNEL_OK")
</pallas_src>

<mosaic_0001>
module attributes {stable_mosaic.version = 11 : i64} {
  func.func @transformer_block_kernel(%arg0: i32, %arg1: i32, %arg2: memref<1x32x32xf32, #tpu.memory_space<vmem>>, %arg3: memref<1x32xf32, #tpu.memory_space<vmem>>, %arg4: memref<1x32xf32, #tpu.memory_space<vmem>>, %arg5: memref<32x32xbf16, #tpu.memory_space<vmem>>, %arg6: memref<1x32xf32, #tpu.memory_space<vmem>>, %arg7: memref<32x64xbf16, #tpu.memory_space<vmem>>, %arg8: memref<1x64xf32, #tpu.memory_space<vmem>>, %arg9: memref<4x8x32xbf16, #tpu.memory_space<vmem>>, %arg10: memref<1x32xf32, #tpu.memory_space<vmem>>, %arg11: memref<1x32xf32, #tpu.memory_space<vmem>>, %arg12: memref<1x32xf32, #tpu.memory_space<vmem>>, %arg13: memref<32x128xbf16, #tpu.memory_space<vmem>>, %arg14: memref<1x128xf32, #tpu.memory_space<vmem>>, %arg15: memref<128x32xbf16, #tpu.memory_space<vmem>>, %arg16: memref<1x32xf32, #tpu.memory_space<vmem>>, %arg17: memref<1x8x32xf32, #tpu.memory_space<vmem>>, %arg18: memref<4x32x8xbf16, #tpu.memory_space<vmem>>, %arg19: memref<4x32x8xbf16, #tpu.memory_space<vmem>>, %arg20: memref<4x8x1xf32, #tpu.memory_space<vmem>>, %arg21: memref<4x8x1xf32, #tpu.memory_space<vmem>>, %arg22: memref<4x8x8xf32, #tpu.memory_space<vmem>>) attributes {dimension_semantics = [#tpu.dimension_semantics<parallel>, #tpu.dimension_semantics<arbitrary>], iteration_bounds = array<i64: 2, 4>, scalar_prefetch = 0 : i64, scratch_operands = 5 : i64, tpu.core_type = #tpu.core_type<tc>, window_params = [{pipeline_mode = #tpu.pipeline_mode<synchronous>, transform_indices = @transform_0, window_bounds = array<i64: 1, 32, 32>}, {pipeline_mode = #tpu.pipeline_mode<synchronous>, transform_indices = @transform_1, window_bounds = array<i64: 1, 32>}, {pipeline_mode = #tpu.pipeline_mode<synchronous>, transform_indices = @transform_2, window_bounds = array<i64: 1, 32>}, {pipeline_mode = #tpu.pipeline_mode<synchronous>, transform_indices = @transform_3, window_bounds = array<i64: 32, 32>}, {pipeline_mode = #tpu.pipeline_mode<synchronous>, transform_indices = @transform_4, window_bounds = array<i64: 1, 32>}, {pipeline_mode = #tpu.pipeline_mode<synchronous>, transform_indices = @transform_5, window_bounds = array<i64: 32, 64>}, {pipeline_mode = #tpu.pipeline_mode<synchronous>, transform_indices = @transform_6, window_bounds = array<i64: 1, 64>}, {pipeline_mode = #tpu.pipeline_mode<synchronous>, transform_indices = @transform_7, window_bounds = array<i64: 4, 8, 32>}, {pipeline_mode = #tpu.pipeline_mode<synchronous>, transform_indices = @transform_8, window_bounds = array<i64: 1, 32>}, {pipeline_mode = #tpu.pipeline_mode<synchronous>, transform_indices = @transform_9, window_bounds = array<i64: 1, 32>}, {pipeline_mode = #tpu.pipeline_mode<synchronous>, transform_indices = @transform_10, window_bounds = array<i64: 1, 32>}, {pipeline_mode = #tpu.pipeline_mode<synchronous>, transform_indices = @transform_11, window_bounds = array<i64: 32, 128>}, {pipeline_mode = #tpu.pipeline_mode<synchronous>, transform_indices = @transform_12, window_bounds = array<i64: 1, 128>}, {pipeline_mode = #tpu.pipeline_mode<synchronous>, transform_indices = @transform_13, window_bounds = array<i64: 128, 32>}, {pipeline_mode = #tpu.pipeline_mode<synchronous>, transform_indices = @transform_14, window_bounds = array<i64: 1, 32>}, {transform_indices = @transform_15, window_bounds = array<i64: 1, 8, 32>}]} {
    %c0_i32 = arith.constant 0 : i32
    %0 = arith.cmpi eq, %arg1, %c0_i32 : i32
    %1 = arith.extui %0 : i1 to i32
    %c0_i32_0 = arith.constant 0 : i32
    %2 = arith.cmpi ne, %1, %c0_i32_0 : i32
    scf.if %2 {
      %c0_86 = arith.constant 0 : index
      %c0_87 = arith.constant 0 : index
      %171 = vector.load %arg7[%c0_86, %c0_87] : memref<32x64xbf16, #tpu.memory_space<vmem>>, vector<32x64xbf16>
      %c0_88 = arith.constant 0 : index
      %c0_89 = arith.constant 0 : index
      %172 = vector.load %arg8[%c0_88, %c0_89] : memref<1x64xf32, #tpu.memory_space<vmem>>, vector<1x64xf32>
      %173 = vector.shape_cast %172 : vector<1x64xf32> to vector<64xf32>
      %c0_90 = arith.constant 0 : index
      %c0_91 = arith.constant 0 : index
      %c0_92 = arith.constant 0 : index
      %174 = vector.load %arg2[%c0_90, %c0_91, %c0_92] : memref<1x32x32xf32, #tpu.memory_space<vmem>>, vector<1x16x32xf32>
      %175 = vector.shape_cast %174 : vector<1x16x32xf32> to vector<16x32xf32>
      %cst_93 = arith.constant dense<0.000000e+00> : vector<16xf32>
      %176 = vector.multi_reduction <add>, %175, %cst_93 [1] : vector<16x32xf32> to vector<16xf32>
      %177 = vector.shape_cast %176 : vector<16xf32> to vector<16x1xf32>
      %cst_94 = arith.constant 3.200000e+01 : f32
      %178 = vector.broadcast %cst_94 : f32 to vector<16x1xf32>
      %179 = arith.divf %177, %178 : vector<16x1xf32>
      %180 = vector.broadcast %179 : vector<16x1xf32> to vector<16x32xf32>
      %181 = arith.subf %175, %180 : vector<16x32xf32>
      %182 = arith.mulf %181, %181 : vector<16x32xf32>
      %cst_95 = arith.constant dense<0.000000e+00> : vector<16xf32>
      %183 = vector.multi_reduction <add>, %182, %cst_95 [1] : vector<16x32xf32> to vector<16xf32>
      %184 = vector.shape_cast %183 : vector<16xf32> to vector<16x1xf32>
      %cst_96 = arith.constant 3.200000e+01 : f32
      %185 = vector.broadcast %cst_96 : f32 to vector<16x1xf32>
      %186 = arith.divf %184, %185 : vector<16x1xf32>
      %cst_97 = arith.constant 9.99999974E-6 : f32
      %187 = vector.broadcast %cst_97 : f32 to vector<16x1xf32>
      %188 = arith.addf %186, %187 : vector<16x1xf32>
      %189 = math.rsqrt %188 : vector<16x1xf32>
      %190 = vector.broadcast %189 : vector<16x1xf32> to vector<16x32xf32>
      %191 = arith.mulf %181, %190 : vector<16x32xf32>
      %c0_98 = arith.constant 0 : index
      %c0_99 = arith.constant 0 : index
      %192 = vector.load %arg3[%c0_98, %c0_99] : memref<1x32xf32, #tpu.memory_space<vmem>>, vector<1x32xf32>
      %193 = vector.shape_cast %192 : vector<1x32xf32> to vector<32xf32>
      %194 = vector.shape_cast %193 : vector<32xf32> to vector<1x32xf32>
      %195 = vector.broadcast %194 : vector<1x32xf32> to vector<16x32xf32>
      %196 = arith.mulf %191, %195 : vector<16x32xf32>
      %c0_100 = arith.constant 0 : index
      %c0_101 = arith.constant 0 : index
      %197 = vector.load %arg4[%c0_100, %c0_101] : memref<1x32xf32, #tpu.memory_space<vmem>>, vector<1x32xf32>
      %198 = vector.shape_cast %197 : vector<1x32xf32> to vector<32xf32>
      %199 = vector.shape_cast %198 : vector<32xf32> to vector<1x32xf32>
      %200 = vector.broadcast %199 : vector<1x32xf32> to vector<16x32xf32>
      %201 = arith.addf %196, %200 : vector<16x32xf32>
      %202 = arith.truncf %201 : vector<16x32xf32> to vector<16x32xbf16>
      %cst_102 = arith.constant dense<0.000000e+00> : vector<16x64xf32>
      %203 = tpu.matmul %202, %171, %cst_102 {dimension_numbers = #tpu.dot_dimension_numbers<[1], [0], [0], [1], [0, 0, 1, 1], [], []>} : vector<16x32xbf16>, vector<32x64xbf16>, vector<16x64xf32> -> vector<16x64xf32>
      %204 = vector.shape_cast %173 : vector<64xf32> to vector<1x64xf32>
      %205 = vector.broadcast %204 : vector<1x64xf32> to vector<16x64xf32>
      %206 = arith.addf %203, %205 : vector<16x64xf32>
      %207 = vector.extract_strided_slice %206 {offsets = [0, 0], sizes = [16, 8], strides = [1, 1]} : vector<16x64xf32> to vector<16x8xf32>
      %208 = arith.truncf %207 : vector<16x8xf32> to vector<16x8xbf16>
      %c0_103 = arith.constant 0 : index
      %c0_104 = arith.constant 0 : index
      %c0_105 = arith.constant 0 : index
      %209 = vector.load %arg18[%c0_103, %c0_104, %c0_105] : memref<4x32x8xbf16, #tpu.memory_space<vmem>>, vector<1x16x8xbf16>
      %210 = vector.shape_cast %209 : vector<1x16x8xbf16> to vector<16x8xbf16>
      %211 = vector.shape_cast %208 : vector<16x8xbf16> to vector<1x16x8xbf16>
      tpu.vector_store %arg18[%c0_103, %c0_104, %c0_105], %211 {strides = array<i32>} : memref<4x32x8xbf16, #tpu.memory_space<vmem>>, vector<1x16x8xbf16>,
      %212 = vector.extract_strided_slice %206 {offsets = [0, 32], sizes = [16, 8], strides = [1, 1]} : vector<16x64xf32> to vector<16x8xf32>
      %213 = arith.truncf %212 : vector<16x8xf32> to vector<16x8xbf16>
      %c0_106 = arith.constant 0 : index
      %c0_107 = arith.constant 0 : index
      %c0_108 = arith.constant 0 : index
      %214 = vector.load %arg19[%c0_106, %c0_107, %c0_108] : memref<4x32x8xbf16, #tpu.memory_space<vmem>>, vector<1x16x8xbf16>
      %215 = vector.shape_cast %214 : vector<1x16x8xbf16> to vector<16x8xbf16>
      %216 = vector.shape_cast %213 : vector<16x8xbf16> to vector<1x16x8xbf16>
      tpu.vector_store %arg19[%c0_106, %c0_107, %c0_108], %216 {strides = array<i32>} : memref<4x32x8xbf16, #tpu.memory_space<vmem>>, vector<1x16x8xbf16>,
      %217 = vector.extract_strided_slice %206 {offsets = [0, 8], sizes = [16, 8], strides = [1, 1]} : vector<16x64xf32> to vector<16x8xf32>
      %218 = arith.truncf %217 : vector<16x8xf32> to vector<16x8xbf16>
      %c1_109 = arith.constant 1 : index
      %c0_110 = arith.constant 0 : index
      %c0_111 = arith.constant 0 : index
      %219 = vector.load %arg18[%c1_109, %c0_110, %c0_111] : memref<4x32x8xbf16, #tpu.memory_space<vmem>>, vector<1x16x8xbf16>
      %220 = vector.shape_cast %219 : vector<1x16x8xbf16> to vector<16x8xbf16>
      %221 = vector.shape_cast %218 : vector<16x8xbf16> to vector<1x16x8xbf16>
      tpu.vector_store %arg18[%c1_109, %c0_110, %c0_111], %221 {strides = array<i32>} : memref<4x32x8xbf16, #tpu.memory_space<vmem>>, vector<1x16x8xbf16>,
      %222 = vector.extract_strided_slice %206 {offsets = [0, 40], sizes = [16, 8], strides = [1, 1]} : vector<16x64xf32> to vector<16x8xf32>
      %223 = arith.truncf %222 : vector<16x8xf32> to vector<16x8xbf16>
      %c1_112 = arith.constant 1 : index
      %c0_113 = arith.constant 0 : index
      %c0_114 = arith.constant 0 : index
      %224 = vector.load %arg19[%c1_112, %c0_113, %c0_114] : memref<4x32x8xbf16, #tpu.memory_space<vmem>>, vector<1x16x8xbf16>
      %225 = vector.shape_cast %224 : vector<1x16x8xbf16> to vector<16x8xbf16>
      %226 = vector.shape_cast %223 : vector<16x8xbf16> to vector<1x16x8xbf16>
      tpu.vector_store %arg19[%c1_112, %c0_113, %c0_114], %226 {strides = array<i32>} : memref<4x32x8xbf16, #tpu.memory_space<vmem>>, vector<1x16x8xbf16>,
      %227 = vector.extract_strided_slice %206 {offsets = [0, 16], sizes = [16, 8], strides = [1, 1]} : vector<16x64xf32> to vector<16x8xf32>
      %228 = arith.truncf %227 : vector<16x8xf32> to vector<16x8xbf16>
      %c2_115 = arith.constant 2 : index
      %c0_116 = arith.constant 0 : index
      %c0_117 = arith.constant 0 : index
      %229 = vector.load %arg18[%c2_115, %c0_116, %c0_117] : memref<4x32x8xbf16, #tpu.memory_space<vmem>>, vector<1x16x8xbf16>
      %230 = vector.shape_cast %229 : vector<1x16x8xbf16> to vector<16x8xbf16>
      %231 = vector.shape_cast %228 : vector<16x8xbf16> to vector<1x16x8xbf16>
      tpu.vector_store %arg18[%c2_115, %c0_116, %c0_117], %231 {strides = array<i32>} : memref<4x32x8xbf16, #tpu.memory_space<vmem>>, vector<1x16x8xbf16>,
      %232 = vector.extract_strided_slice %206 {offsets = [0, 48], sizes = [16, 8], strides = [1, 1]} : vector<16x64xf32> to vector<16x8xf32>
      %233 = arith.truncf %232 : vector<16x8xf32> to vector<16x8xbf16>
      %c2_118 = arith.constant 2 : index
      %c0_119 = arith.constant 0 : index
      %c0_120 = arith.constant 0 : index
      %234 = vector.load %arg19[%c2_118, %c0_119, %c0_120] : memref<4x32x8xbf16, #tpu.memory_space<vmem>>, vector<1x16x8xbf16>
      %235 = vector.shape_cast %234 : vector<1x16x8xbf16> to vector<16x8xbf16>
      %236 = vector.shape_cast %233 : vector<16x8xbf16> to vector<1x16x8xbf16>
      tpu.vector_store %arg19[%c2_118, %c0_119, %c0_120], %236 {strides = array<i32>} : memref<4x32x8xbf16, #tpu.memory_space<vmem>>, vector<1x16x8xbf16>,
      %237 = vector.extract_strided_slice %206 {offsets = [0, 24], sizes = [16, 8], strides = [1, 1]} : vector<16x64xf32> to vector<16x8xf32>
      %238 = arith.truncf %237 : vector<16x8xf32> to vector<16x8xbf16>
      %c3_121 = arith.constant 3 : index
      %c0_122 = arith.constant 0 : index
      %c0_123 = arith.constant 0 : index
      %239 = vector.load %arg18[%c3_121, %c0_122, %c0_123] : memref<4x32x8xbf16, #tpu.memory_space<vmem>>, vector<1x16x8xbf16>
      %240 = vector.shape_cast %239 : vector<1x16x8xbf16> to vector<16x8xbf16>
      %241 = vector.shape_cast %238 : vector<16x8xbf16> to vector<1x16x8xbf16>
      tpu.vector_store %arg18[%c3_121, %c0_122, %c0_123], %241 {strides = array<i32>} : memref<4x32x8xbf16, #tpu.memory_space<vmem>>, vector<1x16x8xbf16>,
      %242 = vector.extract_strided_slice %206 {offsets = [0, 56], sizes = [16, 8], strides = [1, 1]} : vector<16x64xf32> to vector<16x8xf32>
      %243 = arith.truncf %242 : vector<16x8xf32> to vector<16x8xbf16>
      %c3_124 = arith.constant 3 : index
      %c0_125 = arith.constant 0 : index
      %c0_126 = arith.constant 0 : index
      %244 = vector.load %arg19[%c3_124, %c0_125, %c0_126] : memref<4x32x8xbf16, #tpu.memory_space<vmem>>, vector<1x16x8xbf16>
      %245 = vector.shape_cast %244 : vector<1x16x8xbf16> to vector<16x8xbf16>
      %246 = vector.shape_cast %243 : vector<16x8xbf16> to vector<1x16x8xbf16>
      tpu.vector_store %arg19[%c3_124, %c0_125, %c0_126], %246 {strides = array<i32>} : memref<4x32x8xbf16, #tpu.memory_space<vmem>>, vector<1x16x8xbf16>,
      %c0_127 = arith.constant 0 : index
      %c16 = arith.constant 16 : index
      %c0_128 = arith.constant 0 : index
      %247 = vector.load %arg2[%c0_127, %c16, %c0_128] : memref<1x32x32xf32, #tpu.memory_space<vmem>>, vector<1x16x32xf32>
      %248 = vector.shape_cast %247 : vector<1x16x32xf32> to vector<16x32xf32>
      %cst_129 = arith.constant dense<0.000000e+00> : vector<16xf32>
      %249 = vector.multi_reduction <add>, %248, %cst_129 [1] : vector<16x32xf32> to vector<16xf32>
      %250 = vector.shape_cast %249 : vector<16xf32> to vector<16x1xf32>
      %cst_130 = arith.constant 3.200000e+01 : f32
      %251 = vector.broadcast %cst_130 : f32 to vector<16x1xf32>
      %252 = arith.divf %250, %251 : vector<16x1xf32>
      %253 = vector.broadcast %252 : vector<16x1xf32> to vector<16x32xf32>
      %254 = arith.subf %248, %253 : vector<16x32xf32>
      %255 = arith.mulf %254, %254 : vector<16x32xf32>
      %cst_131 = arith.constant dense<0.000000e+00> : vector<16xf32>
      %256 = vector.multi_reduction <add>, %255, %cst_131 [1] : vector<16x32xf32> to vector<16xf32>
      %257 = vector.shape_cast %256 : vector<16xf32> to vector<16x1xf32>
      %cst_132 = arith.constant 3.200000e+01 : f32
      %258 = vector.broadcast %cst_132 : f32 to vector<16x1xf32>
      %259 = arith.divf %257, %258 : vector<16x1xf32>
      %cst_133 = arith.constant 9.99999974E-6 : f32
      %260 = vector.broadcast %cst_133 : f32 to vector<16x1xf32>
      %261 = arith.addf %259, %260 : vector<16x1xf32>
      %262 = math.rsqrt %261 : vector<16x1xf32>
      %263 = vector.broadcast %262 : vector<16x1xf32> to vector<16x32xf32>
      %264 = arith.mulf %254, %263 : vector<16x32xf32>
      %c0_134 = arith.constant 0 : index
      %c0_135 = arith.constant 0 : index
      %265 = vector.load %arg3[%c0_134, %c0_135] : memref<1x32xf32, #tpu.memory_space<vmem>>, vector<1x32xf32>
      %266 = vector.shape_cast %265 : vector<1x32xf32> to vector<32xf32>
      %267 = vector.shape_cast %266 : vector<32xf32> to vector<1x32xf32>
      %268 = vector.broadcast %267 : vector<1x32xf32> to vector<16x32xf32>
      %269 = arith.mulf %264, %268 : vector<16x32xf32>
      %c0_136 = arith.constant 0 : index
      %c0_137 = arith.constant 0 : index
      %270 = vector.load %arg4[%c0_136, %c0_137] : memref<1x32xf32, #tpu.memory_space<vmem>>, vector<1x32xf32>
      %271 = vector.shape_cast %270 : vector<1x32xf32> to vector<32xf32>
      %272 = vector.shape_cast %271 : vector<32xf32> to vector<1x32xf32>
      %273 = vector.broadcast %272 : vector<1x32xf32> to vector<16x32xf32>
      %274 = arith.addf %269, %273 : vector<16x32xf32>
      %275 = arith.truncf %274 : vector<16x32xf32> to vector<16x32xbf16>
      %cst_138 = arith.constant dense<0.000000e+00> : vector<16x64xf32>
      %276 = tpu.matmul %275, %171, %cst_138 {dimension_numbers = #tpu.dot_dimension_numbers<[1], [0], [0], [1], [0, 0, 1, 1], [], []>} : vector<16x32xbf16>, vector<32x64xbf16>, vector<16x64xf32> -> vector<16x64xf32>
      %277 = vector.shape_cast %173 : vector<64xf32> to vector<1x64xf32>
      %278 = vector.broadcast %277 : vector<1x64xf32> to vector<16x64xf32>
      %279 = arith.addf %276, %278 : vector<16x64xf32>
      %280 = vector.extract_strided_slice %279 {offsets = [0, 0], sizes = [16, 8], strides = [1, 1]} : vector<16x64xf32> to vector<16x8xf32>
      %281 = arith.truncf %280 : vector<16x8xf32> to vector<16x8xbf16>
      %c0_139 = arith.constant 0 : index
      %c16_140 = arith.constant 16 : index
      %c0_141 = arith.constant 0 : index
      %282 = vector.load %arg18[%c0_139, %c16_140, %c0_141] : memref<4x32x8xbf16, #tpu.memory_space<vmem>>, vector<1x16x8xbf16>
      %283 = vector.shape_cast %282 : vector<1x16x8xbf16> to vector<16x8xbf16>
      %284 = vector.shape_cast %281 : vector<16x8xbf16> to vector<1x16x8xbf16>
      tpu.vector_store %arg18[%c0_139, %c16_140, %c0_141], %284 {strides = array<i32>} : memref<4x32x8xbf16, #tpu.memory_space<vmem>>, vector<1x16x8xbf16>,
      %285 = vector.extract_strided_slice %279 {offsets = [0, 32], sizes = [16, 8], strides = [1, 1]} : vector<16x64xf32> to vector<16x8xf32>
      %286 = arith.truncf %285 : vector<16x8xf32> to vector<16x8xbf16>
      %c0_142 = arith.constant 0 : index
      %c16_143 = arith.constant 16 : index
      %c0_144 = arith.constant 0 : index
      %287 = vector.load %arg19[%c0_142, %c16_143, %c0_144] : memref<4x32x8xbf16, #tpu.memory_space<vmem>>, vector<1x16x8xbf16>
      %288 = vector.shape_cast %287 : vector<1x16x8xbf16> to vector<16x8xbf16>
      %289 = vector.shape_cast %286 : vector<16x8xbf16> to vector<1x16x8xbf16>
      tpu.vector_store %arg19[%c0_142, %c16_143, %c0_144], %289 {strides = array<i32>} : memref<4x32x8xbf16, #tpu.memory_space<vmem>>, vector<1x16x8xbf16>,
      %290 = vector.extract_strided_slice %279 {offsets = [0, 8], sizes = [16, 8], strides = [1, 1]} : vector<16x64xf32> to vector<16x8xf32>
      %291 = arith.truncf %290 : vector<16x8xf32> to vector<16x8xbf16>
      %c1_145 = arith.constant 1 : index
      %c16_146 = arith.constant 16 : index
      %c0_147 = arith.constant 0 : index
      %292 = vector.load %arg18[%c1_145, %c16_146, %c0_147] : memref<4x32x8xbf16, #tpu.memory_space<vmem>>, vector<1x16x8xbf16>
      %293 = vector.shape_cast %292 : vector<1x16x8xbf16> to vector<16x8xbf16>
      %294 = vector.shape_cast %291 : vector<16x8xbf16> to vector<1x16x8xbf16>
      tpu.vector_store %arg18[%c1_145, %c16_146, %c0_147], %294 {strides = array<i32>} : memref<4x32x8xbf16, #tpu.memory_space<vmem>>, vector<1x16x8xbf16>,
      %295 = vector.extract_strided_slice %279 {offsets = [0, 40], sizes = [16, 8], strides = [1, 1]} : vector<16x64xf32> to vector<16x8xf32>
      %296 = arith.truncf %295 : vector<16x8xf32> to vector<16x8xbf16>
      %c1_148 = arith.constant 1 : index
      %c16_149 = arith.constant 16 : index
      %c0_150 = arith.constant 0 : index
      %297 = vector.load %arg19[%c1_148, %c16_149, %c0_150] : memref<4x32x8xbf16, #tpu.memory_space<vmem>>, vector<1x16x8xbf16>
      %298 = vector.shape_cast %297 : vector<1x16x8xbf16> to vector<16x8xbf16>
      %299 = vector.shape_cast %296 : vector<16x8xbf16> to vector<1x16x8xbf16>
      tpu.vector_store %arg19[%c1_148, %c16_149, %c0_150], %299 {strides = array<i32>} : memref<4x32x8xbf16, #tpu.memory_space<vmem>>, vector<1x16x8xbf16>,
      %300 = vector.extract_strided_slice %279 {offsets = [0, 16], sizes = [16, 8], strides = [1, 1]} : vector<16x64xf32> to vector<16x8xf32>
      %301 = arith.truncf %300 : vector<16x8xf32> to vector<16x8xbf16>
      %c2_151 = arith.constant 2 : index
      %c16_152 = arith.constant 16 : index
      %c0_153 = arith.constant 0 : index
      %302 = vector.load %arg18[%c2_151, %c16_152, %c0_153] : memref<4x32x8xbf16, #tpu.memory_space<vmem>>, vector<1x16x8xbf16>
      %303 = vector.shape_cast %302 : vector<1x16x8xbf16> to vector<16x8xbf16>
      %304 = vector.shape_cast %301 : vector<16x8xbf16> to vector<1x16x8xbf16>
      tpu.vector_store %arg18[%c2_151, %c16_152, %c0_153], %304 {strides = array<i32>} : memref<4x32x8xbf16, #tpu.memory_space<vmem>>, vector<1x16x8xbf16>,
      %305 = vector.extract_strided_slice %279 {offsets = [0, 48], sizes = [16, 8], strides = [1, 1]} : vector<16x64xf32> to vector<16x8xf32>
      %306 = arith.truncf %305 : vector<16x8xf32> to vector<16x8xbf16>
      %c2_154 = arith.constant 2 : index
      %c16_155 = arith.constant 16 : index
      %c0_156 = arith.constant 0 : index
      %307 = vector.load %arg19[%c2_154, %c16_155, %c0_156] : memref<4x32x8xbf16, #tpu.memory_space<vmem>>, vector<1x16x8xbf16>
      %308 = vector.shape_cast %307 : vector<1x16x8xbf16> to vector<16x8xbf16>
      %309 = vector.shape_cast %306 : vector<16x8xbf16> to vector<1x16x8xbf16>
      tpu.vector_store %arg19[%c2_154, %c16_155, %c0_156], %309 {strides = array<i32>} : memref<4x32x8xbf16, #tpu.memory_space<vmem>>, vector<1x16x8xbf16>,
      %310 = vector.extract_strided_slice %279 {offsets = [0, 24], sizes = [16, 8], strides = [1, 1]} : vector<16x64xf32> to vector<16x8xf32>
      %311 = arith.truncf %310 : vector<16x8xf32> to vector<16x8xbf16>
      %c3_157 = arith.constant 3 : index
      %c16_158 = arith.constant 16 : index
      %c0_159 = arith.constant 0 : index
      %312 = vector.load %arg18[%c3_157, %c16_158, %c0_159] : memref<4x32x8xbf16, #tpu.memory_space<vmem>>, vector<1x16x8xbf16>
      %313 = vector.shape_cast %312 : vector<1x16x8xbf16> to vector<16x8xbf16>
      %314 = vector.shape_cast %311 : vector<16x8xbf16> to vector<1x16x8xbf16>
      tpu.vector_store %arg18[%c3_157, %c16_158, %c0_159], %314 {strides = array<i32>} : memref<4x32x8xbf16, #tpu.memory_space<vmem>>, vector<1x16x8xbf16>,
      %315 = vector.extract_strided_slice %279 {offsets = [0, 56], sizes = [16, 8], strides = [1, 1]} : vector<16x64xf32> to vector<16x8xf32>
      %316 = arith.truncf %315 : vector<16x8xf32> to vector<16x8xbf16>
      %c3_160 = arith.constant 3 : index
      %c16_161 = arith.constant 16 : index
      %c0_162 = arith.constant 0 : index
      %317 = vector.load %arg19[%c3_160, %c16_161, %c0_162] : memref<4x32x8xbf16, #tpu.memory_space<vmem>>, vector<1x16x8xbf16>
      %318 = vector.shape_cast %317 : vector<1x16x8xbf16> to vector<16x8xbf16>
      %319 = vector.shape_cast %316 : vector<16x8xbf16> to vector<1x16x8xbf16>
      tpu.vector_store %arg19[%c3_160, %c16_161, %c0_162], %319 {strides = array<i32>} : memref<4x32x8xbf16, #tpu.memory_space<vmem>>, vector<1x16x8xbf16>,
    } else {
    }
    %c8_i32 = arith.constant 8 : i32
    %3 = arith.muli %arg1, %c8_i32 : i32
    %4 = tpu.assume_multiple %3, 8 : i32
    %c0 = arith.constant 0 : index
    %5 = arith.index_cast %4 : i32 to index
    %c0_1 = arith.constant 0 : index
    %6 = vector.load %arg2[%c0, %5, %c0_1] : memref<1x32x32xf32, #tpu.memory_space<vmem>>, vector<1x8x32xf32>
    %7 = vector.shape_cast %6 : vector<1x8x32xf32> to vector<8x32xf32>
    %cst = arith.constant dense<0.000000e+00> : vector<8xf32>
    %8 = vector.multi_reduction <add>, %7, %cst [1] : vector<8x32xf32> to vector<8xf32>
    %9 = vector.shape_cast %8 : vector<8xf32> to vector<8x1xf32>
    %cst_2 = arith.constant 3.200000e+01 : f32
    %10 = vector.broadcast %cst_2 : f32 to vector<8x1xf32>
    %11 = arith.divf %9, %10 : vector<8x1xf32>
    %12 = vector.broadcast %11 : vector<8x1xf32> to vector<8x32xf32>
    %13 = arith.subf %7, %12 : vector<8x32xf32>
    %14 = arith.mulf %13, %13 : vector<8x32xf32>
    %cst_3 = arith.constant dense<0.000000e+00> : vector<8xf32>
    %15 = vector.multi_reduction <add>, %14, %cst_3 [1] : vector<8x32xf32> to vector<8xf32>
    %16 = vector.shape_cast %15 : vector<8xf32> to vector<8x1xf32>
    %cst_4 = arith.constant 3.200000e+01 : f32
    %17 = vector.broadcast %cst_4 : f32 to vector<8x1xf32>
    %18 = arith.divf %16, %17 : vector<8x1xf32>
    %cst_5 = arith.constant 9.99999974E-6 : f32
    %19 = vector.broadcast %cst_5 : f32 to vector<8x1xf32>
    %20 = arith.addf %18, %19 : vector<8x1xf32>
    %21 = math.rsqrt %20 : vector<8x1xf32>
    %22 = vector.broadcast %21 : vector<8x1xf32> to vector<8x32xf32>
    %23 = arith.mulf %13, %22 : vector<8x32xf32>
    %c0_6 = arith.constant 0 : index
    %c0_7 = arith.constant 0 : index
    %24 = vector.load %arg3[%c0_6, %c0_7] : memref<1x32xf32, #tpu.memory_space<vmem>>, vector<1x32xf32>
    %25 = vector.shape_cast %24 : vector<1x32xf32> to vector<32xf32>
    %26 = vector.shape_cast %25 : vector<32xf32> to vector<1x32xf32>
    %27 = vector.broadcast %26 : vector<1x32xf32> to vector<8x32xf32>
    %28 = arith.mulf %23, %27 : vector<8x32xf32>
    %c0_8 = arith.constant 0 : index
    %c0_9 = arith.constant 0 : index
    %29 = vector.load %arg4[%c0_8, %c0_9] : memref<1x32xf32, #tpu.memory_space<vmem>>, vector<1x32xf32>
    %30 = vector.shape_cast %29 : vector<1x32xf32> to vector<32xf32>
    %31 = vector.shape_cast %30 : vector<32xf32> to vector<1x32xf32>
    %32 = vector.broadcast %31 : vector<1x32xf32> to vector<8x32xf32>
    %33 = arith.addf %28, %32 : vector<8x32xf32>
    %34 = arith.truncf %33 : vector<8x32xf32> to vector<8x32xbf16>
    %c0_10 = arith.constant 0 : index
    %c0_11 = arith.constant 0 : index
    %35 = vector.load %arg5[%c0_10, %c0_11] : memref<32x32xbf16, #tpu.memory_space<vmem>>, vector<32x32xbf16>
    %cst_12 = arith.constant dense<0.000000e+00> : vector<8x32xf32>
    %36 = tpu.matmul %34, %35, %cst_12 {dimension_numbers = #tpu.dot_dimension_numbers<[1], [0], [0], [1], [0, 0, 1, 1], [], []>} : vector<8x32xbf16>, vector<32x32xbf16>, vector<8x32xf32> -> vector<8x32xf32>
    %c0_13 = arith.constant 0 : index
    %c0_14 = arith.constant 0 : index
    %37 = vector.load %arg6[%c0_13, %c0_14] : memref<1x32xf32, #tpu.memory_space<vmem>>, vector<1x32xf32>
    %38 = vector.shape_cast %37 : vector<1x32xf32> to vector<32xf32>
    %39 = vector.shape_cast %38 : vector<32xf32> to vector<1x32xf32>
    %40 = vector.broadcast %39 : vector<1x32xf32> to vector<8x32xf32>
    %41 = arith.addf %36, %40 : vector<8x32xf32>
    %cst_15 = arith.constant 0.353553385 : f32
    %42 = vector.broadcast %cst_15 : f32 to vector<8x32xf32>
    %43 = arith.mulf %41, %42 : vector<8x32xf32>
    %44 = vector.extract_strided_slice %43 {offsets = [0, 0], sizes = [8, 8], strides = [1, 1]} : vector<8x32xf32> to vector<8x8xf32>
    %45 = vector.extract_strided_slice %43 {offsets = [0, 8], sizes = [8, 8], strides = [1, 1]} : vector<8x32xf32> to vector<8x8xf32>
    %46 = vector.extract_strided_slice %43 {offsets = [0, 16], sizes = [8, 8], strides = [1, 1]} : vector<8x32xf32> to vector<8x8xf32>
    %47 = vector.extract_strided_slice %43 {offsets = [0, 24], sizes = [8, 8], strides = [1, 1]} : vector<8x32xf32> to vector<8x8xf32>
    %48 = vector.shape_cast %44 : vector<8x8xf32> to vector<1x8x8xf32>
    %49 = vector.shape_cast %45 : vector<8x8xf32> to vector<1x8x8xf32>
    %50 = vector.shape_cast %46 : vector<8x8xf32> to vector<1x8x8xf32>
    %51 = vector.shape_cast %47 : vector<8x8xf32> to vector<1x8x8xf32>
    %52 = tpu.concatenate %48, %49, %50, %51 in 0 : vector<1x8x8xf32>, vector<1x8x8xf32>, vector<1x8x8xf32>, vector<1x8x8xf32> -> vector<4x8x8xf32>
    %53 = arith.truncf %52 : vector<4x8x8xf32> to vector<4x8x8xbf16>
    %cst_16 = arith.constant -1.000000e+30 : f32
    %54 = vector.broadcast %cst_16 : f32 to vector<4x8x1xf32>
    %c0_17 = arith.constant 0 : index
    %c0_18 = arith.constant 0 : index
    %c0_19 = arith.constant 0 : index
    %55 = vector.load %arg20[%c0_17, %c0_18, %c0_19] : memref<4x8x1xf32, #tpu.memory_space<vmem>>, vector<4x8x1xf32>
    tpu.vector_store %arg20[%c0_17, %c0_18, %c0_19], %54 {strides = array<i32>} : memref<4x8x1xf32, #tpu.memory_space<vmem>>, vector<4x8x1xf32>,
    %cst_20 = arith.constant 0.000000e+00 : f32
    %56 = vector.broadcast %cst_20 : f32 to vector<4x8x1xf32>
    %c0_21 = arith.constant 0 : index
    %c0_22 = arith.constant 0 : index
    %c0_23 = arith.constant 0 : index
    %57 = vector.load %arg21[%c0_21, %c0_22, %c0_23] : memref<4x8x1xf32, #tpu.memory_space<vmem>>, vector<4x8x1xf32>
    tpu.vector_store %arg21[%c0_21, %c0_22, %c0_23], %56 {strides = array<i32>} : memref<4x8x1xf32, #tpu.memory_space<vmem>>, vector<4x8x1xf32>,
    %cst_24 = arith.constant 0.000000e+00 : f32
    %58 = vector.broadcast %cst_24 : f32 to vector<4x8x8xf32>
    %c0_25 = arith.constant 0 : index
    %c0_26 = arith.constant 0 : index
    %c0_27 = arith.constant 0 : index
    %59 = vector.load %arg22[%c0_25, %c0_26, %c0_27] : memref<4x8x8xf32, #tpu.memory_space<vmem>>, vector<4x8x8xf32>
    tpu.vector_store %arg22[%c0_25, %c0_26, %c0_27], %58 {strides = array<i32>} : memref<4x8x8xf32, #tpu.memory_space<vmem>>, vector<4x8x8xf32>,
    %60 = tpu.iota {dimensions = array<i32: 0>} : vector<8x16xi32>
    %61 = vector.broadcast %4 : i32 to vector<8x16xi32>
    %62 = arith.addi %61, %60 : vector<8x16xi32>
    %63 = tpu.iota {dimensions = array<i32: 1>} : vector<8x16xi32>
    %c1_i32 = arith.constant 1 : i32
    %64 = arith.addi %arg1, %c1_i32 : i32
    %c8_i32_28 = arith.constant 8 : i32
    %65 = arith.muli %64, %c8_i32_28 : i32
    %c15_i32 = arith.constant 15 : i32
    %66 = arith.addi %65, %c15_i32 : i32
    %c16_i32 = arith.constant 16 : i32
    %67 = arith.divsi %66, %c16_i32 : i32
    %c0_i32_29 = arith.constant 0 : i32
    %c0_i32_30 = arith.constant 0 : i32
    %68 = arith.subi %67, %c0_i32_30 : i32
    %69 = arith.addi %c0_i32_30, %68 : i32
    %c1_i32_31 = arith.constant 1 : i32
    scf.for %arg23 = %c0_i32_30 to %69 step %c1_i32_31  : i32 {
      %c16_i32_86 = arith.constant 16 : i32
      %171 = arith.muli %arg23, %c16_i32_86 : i32
      %172 = tpu.assume_multiple %171, 16 : i32
      %c0_87 = arith.constant 0 : index
      %173 = arith.index_cast %172 : i32 to index
      %c0_88 = arith.constant 0 : index
      %174 = vector.load %arg18[%c0_87, %173, %c0_88] : memref<4x32x8xbf16, #tpu.memory_space<vmem>>, vector<4x16x8xbf16>
      %c0_89 = arith.constant 0 : index
      %175 = arith.index_cast %172 : i32 to index
      %c0_90 = arith.constant 0 : index
      %176 = vector.load %arg19[%c0_89, %175, %c0_90] : memref<4x32x8xbf16, #tpu.memory_space<vmem>>, vector<4x16x8xbf16>
      "tpu.trace_start"() <{level = 10 : i32, message = "hqd,hkd->hqk"}> : () -> ()
      %cst_91 = arith.constant dense<0.000000e+00> : vector<4x8x16xf32>
      %177 = tpu.matmul %53, %174, %cst_91 {dimension_numbers = #tpu.dot_dimension_numbers<[2], [2], [1], [1], [0, 0, 0, 1, 1, 1], [0], [0]>} : vector<4x8x8xbf16>, vector<4x16x8xbf16>, vector<4x8x16xf32> -> vector<4x8x16xf32>
      "tpu.trace_stop"() : () -> ()
      %178 = vector.broadcast %172 : i32 to vector<8x16xi32>
      %179 = arith.addi %178, %63 : vector<8x16xi32>
      %180 = arith.cmpi sle, %179, %62 : vector<8x16xi32>
      %cst_92 = arith.constant 0.000000e+00 : f32
      %cst_93 = arith.constant -1.000000e+30 : f32
      %181 = vector.broadcast %cst_92 : f32 to vector<8x16xf32>
      %182 = vector.broadcast %cst_93 : f32 to vector<8x16xf32>
      %183 = arith.select %180, %181, %182 : vector<8x16xi1>, vector<8x16xf32>
      %184 = vector.shape_cast %183 : vector<8x16xf32> to vector<1x8x16xf32>
      %185 = vector.broadcast %184 : vector<1x8x16xf32> to vector<4x8x16xf32>
      %186 = arith.addf %177, %185 : vector<4x8x16xf32>
      %c0_94 = arith.constant 0 : index
      %c0_95 = arith.constant 0 : index
      %c0_96 = arith.constant 0 : index
      %187 = vector.load %arg20[%c0_94, %c0_95, %c0_96] : memref<4x8x1xf32, #tpu.memory_space<vmem>>, vector<4x8x1xf32>
      %cst_97 = arith.constant dense<0xFF800000> : vector<4x8xf32>
      %188 = vector.multi_reduction <maximumf>, %186, %cst_97 [2] : vector<4x8x16xf32> to vector<4x8xf32>
      %189 = vector.shape_cast %188 : vector<4x8xf32> to vector<4x8x1xf32>
      %190 = arith.maximumf %187, %189 : vector<4x8x1xf32>
      %191 = arith.subf %187, %190 : vector<4x8x1xf32>
      %192 = math.exp %191 : vector<4x8x1xf32>
      %193 = vector.broadcast %190 : vector<4x8x1xf32> to vector<4x8x16xf32>
      %194 = arith.subf %186, %193 : vector<4x8x16xf32>
      %195 = math.exp %194 : vector<4x8x16xf32>
      %c0_98 = arith.constant 0 : index
      %c0_99 = arith.constant 0 : index
      %c0_100 = arith.constant 0 : index
      %196 = vector.load %arg21[%c0_98, %c0_99, %c0_100] : memref<4x8x1xf32, #tpu.memory_space<vmem>>, vector<4x8x1xf32>
      %197 = arith.mulf %192, %196 : vector<4x8x1xf32>
      %cst_101 = arith.constant dense<0.000000e+00> : vector<4x8xf32>
      %198 = vector.multi_reduction <add>, %195, %cst_101 [2] : vector<4x8x16xf32> to vector<4x8xf32>
      %199 = vector.shape_cast %198 : vector<4x8xf32> to vector<4x8x1xf32>
      %200 = arith.addf %197, %199 : vector<4x8x1xf32>
      %c0_102 = arith.constant 0 : index
      %c0_103 = arith.constant 0 : index
      %c0_104 = arith.constant 0 : index
      %201 = vector.load %arg21[%c0_102, %c0_103, %c0_104] : memref<4x8x1xf32, #tpu.memory_space<vmem>>, vector<4x8x1xf32>
      tpu.vector_store %arg21[%c0_102, %c0_103, %c0_104], %200 {strides = array<i32>} : memref<4x8x1xf32, #tpu.memory_space<vmem>>, vector<4x8x1xf32>,
      %c0_105 = arith.constant 0 : index
      %c0_106 = arith.constant 0 : index
      %c0_107 = arith.constant 0 : index
      %202 = vector.load %arg22[%c0_105, %c0_106, %c0_107] : memref<4x8x8xf32, #tpu.memory_space<vmem>>, vector<4x8x8xf32>
      %203 = vector.broadcast %192 : vector<4x8x1xf32> to vector<4x8x8xf32>
      %204 = arith.mulf %203, %202 : vector<4x8x8xf32>
      %205 = arith.truncf %195 : vector<4x8x16xf32> to vector<4x8x16xbf16>
      "tpu.trace_start"() <{level = 10 : i32, message = "hqk,hkd->hqd"}> : () -> ()
      %cst_108 = arith.constant dense<0.000000e+00> : vector<4x8x8xf32>
      %206 = tpu.matmul %205, %176, %cst_108 {dimension_numbers = #tpu.dot_dimension_numbers<[2], [1], [1], [2], [0, 0, 0, 1, 1, 2], [0], [0]>} : vector<4x8x16xbf16>, vector<4x16x8xbf16>, vector<4x8x8xf32> -> vector<4x8x8xf32>
      "tpu.trace_stop"() : () -> ()
      %207 = arith.addf %204, %206 : vector<4x8x8xf32>
      %c0_109 = arith.constant 0 : index
      %c0_110 = arith.constant 0 : index
      %c0_111 = arith.constant 0 : index
      %208 = vector.load %arg22[%c0_109, %c0_110, %c0_111] : memref<4x8x8xf32, #tpu.memory_space<vmem>>, vector<4x8x8xf32>
      tpu.vector_store %arg22[%c0_109, %c0_110, %c0_111], %207 {strides = array<i32>} : memref<4x8x8xf32, #tpu.memory_space<vmem>>, vector<4x8x8xf32>,
      %c0_112 = arith.constant 0 : index
      %c0_113 = arith.constant 0 : index
      %c0_114 = arith.constant 0 : index
      %209 = vector.load %arg20[%c0_112, %c0_113, %c0_114] : memref<4x8x1xf32, #tpu.memory_space<vmem>>, vector<4x8x1xf32>
      tpu.vector_store %arg20[%c0_112, %c0_113, %c0_114], %190 {strides = array<i32>} : memref<4x8x1xf32, #tpu.memory_space<vmem>>, vector<4x8x1xf32>,
    }
    %c0_32 = arith.constant 0 : index
    %c0_33 = arith.constant 0 : index
    %c0_34 = arith.constant 0 : index
    %70 = vector.load %arg21[%c0_32, %c0_33, %c0_34] : memref<4x8x1xf32, #tpu.memory_space<vmem>>, vector<4x8x1xf32>
    %71 = tpu.reciprocal %70 {approx = true} : vector<4x8x1xf32> -> vector<4x8x1xf32>
    %cst_35 = arith.constant 0.000000e+00 : f32
    %72 = vector.broadcast %cst_35 : f32 to vector<8x32xf32>
    %c0_36 = arith.constant 0 : index
    %c0_37 = arith.constant 0 : index
    %c0_38 = arith.constant 0 : index
    %73 = vector.load %arg22[%c0_36, %c0_37, %c0_38] : memref<4x8x8xf32, #tpu.memory_space<vmem>>, vector<1x8x8xf32>
    %74 = vector.shape_cast %73 : vector<1x8x8xf32> to vector<8x8xf32>
    %75 = vector.extract_strided_slice %71 {offsets = [0, 0, 0], sizes = [1, 8, 1], strides = [1, 1, 1]} : vector<4x8x1xf32> to vector<1x8x1xf32>
    %76 = vector.shape_cast %75 : vector<1x8x1xf32> to vector<8x1xf32>
    %77 = vector.broadcast %76 : vector<8x1xf32> to vector<8x8xf32>
    %78 = arith.mulf %74, %77 : vector<8x8xf32>
    %79 = arith.truncf %78 : vector<8x8xf32> to vector<8x8xbf16>
    %c0_39 = arith.constant 0 : index
    %c0_40 = arith.constant 0 : index
    %c0_41 = arith.constant 0 : index
    %80 = vector.load %arg9[%c0_39, %c0_40, %c0_41] : memref<4x8x32xbf16, #tpu.memory_space<vmem>>, vector<1x8x32xbf16>
    %81 = vector.shape_cast %80 : vector<1x8x32xbf16> to vector<8x32xbf16>
    %cst_42 = arith.constant dense<0.000000e+00> : vector<8x32xf32>
    %82 = tpu.matmul %79, %81, %cst_42 {dimension_numbers = #tpu.dot_dimension_numbers<[1], [0], [0], [1], [0, 0, 1, 1], [], []>} : vector<8x8xbf16>, vector<8x32xbf16>, vector<8x32xf32> -> vector<8x32xf32>
    %83 = arith.addf %72, %82 : vector<8x32xf32>
    %c1 = arith.constant 1 : index
    %c0_43 = arith.constant 0 : index
    %c0_44 = arith.constant 0 : index
    %84 = vector.load %arg22[%c1, %c0_43, %c0_44] : memref<4x8x8xf32, #tpu.memory_space<vmem>>, vector<1x8x8xf32>
    %85 = vector.shape_cast %84 : vector<1x8x8xf32> to vector<8x8xf32>
    %86 = vector.extract_strided_slice %71 {offsets = [1, 0, 0], sizes = [1, 8, 1], strides = [1, 1, 1]} : vector<4x8x1xf32> to vector<1x8x1xf32>
    %87 = vector.shape_cast %86 : vector<1x8x1xf32> to vector<8x1xf32>
    %88 = vector.broadcast %87 : vector<8x1xf32> to vector<8x8xf32>
    %89 = arith.mulf %85, %88 : vector<8x8xf32>
    %90 = arith.truncf %89 : vector<8x8xf32> to vector<8x8xbf16>
    %c1_45 = arith.constant 1 : index
    %c0_46 = arith.constant 0 : index
    %c0_47 = arith.constant 0 : index
    %91 = vector.load %arg9[%c1_45, %c0_46, %c0_47] : memref<4x8x32xbf16, #tpu.memory_space<vmem>>, vector<1x8x32xbf16>
    %92 = vector.shape_cast %91 : vector<1x8x32xbf16> to vector<8x32xbf16>
    %cst_48 = arith.constant dense<0.000000e+00> : vector<8x32xf32>
    %93 = tpu.matmul %90, %92, %cst_48 {dimension_numbers = #tpu.dot_dimension_numbers<[1], [0], [0], [1], [0, 0, 1, 1], [], []>} : vector<8x8xbf16>, vector<8x32xbf16>, vector<8x32xf32> -> vector<8x32xf32>
    %94 = arith.addf %83, %93 : vector<8x32xf32>
    %c2 = arith.constant 2 : index
    %c0_49 = arith.constant 0 : index
    %c0_50 = arith.constant 0 : index
    %95 = vector.load %arg22[%c2, %c0_49, %c0_50] : memref<4x8x8xf32, #tpu.memory_space<vmem>>, vector<1x8x8xf32>
    %96 = vector.shape_cast %95 : vector<1x8x8xf32> to vector<8x8xf32>
    %97 = vector.extract_strided_slice %71 {offsets = [2, 0, 0], sizes = [1, 8, 1], strides = [1, 1, 1]} : vector<4x8x1xf32> to vector<1x8x1xf32>
    %98 = vector.shape_cast %97 : vector<1x8x1xf32> to vector<8x1xf32>
    %99 = vector.broadcast %98 : vector<8x1xf32> to vector<8x8xf32>
    %100 = arith.mulf %96, %99 : vector<8x8xf32>
    %101 = arith.truncf %100 : vector<8x8xf32> to vector<8x8xbf16>
    %c2_51 = arith.constant 2 : index
    %c0_52 = arith.constant 0 : index
    %c0_53 = arith.constant 0 : index
    %102 = vector.load %arg9[%c2_51, %c0_52, %c0_53] : memref<4x8x32xbf16, #tpu.memory_space<vmem>>, vector<1x8x32xbf16>
    %103 = vector.shape_cast %102 : vector<1x8x32xbf16> to vector<8x32xbf16>
    %cst_54 = arith.constant dense<0.000000e+00> : vector<8x32xf32>
    %104 = tpu.matmul %101, %103, %cst_54 {dimension_numbers = #tpu.dot_dimension_numbers<[1], [0], [0], [1], [0, 0, 1, 1], [], []>} : vector<8x8xbf16>, vector<8x32xbf16>, vector<8x32xf32> -> vector<8x32xf32>
    %105 = arith.addf %94, %104 : vector<8x32xf32>
    %c3 = arith.constant 3 : index
    %c0_55 = arith.constant 0 : index
    %c0_56 = arith.constant 0 : index
    %106 = vector.load %arg22[%c3, %c0_55, %c0_56] : memref<4x8x8xf32, #tpu.memory_space<vmem>>, vector<1x8x8xf32>
    %107 = vector.shape_cast %106 : vector<1x8x8xf32> to vector<8x8xf32>
    %108 = vector.extract_strided_slice %71 {offsets = [3, 0, 0], sizes = [1, 8, 1], strides = [1, 1, 1]} : vector<4x8x1xf32> to vector<1x8x1xf32>
    %109 = vector.shape_cast %108 : vector<1x8x1xf32> to vector<8x1xf32>
    %110 = vector.broadcast %109 : vector<8x1xf32> to vector<8x8xf32>
    %111 = arith.mulf %107, %110 : vector<8x8xf32>
    %112 = arith.truncf %111 : vector<8x8xf32> to vector<8x8xbf16>
    %c3_57 = arith.constant 3 : index
    %c0_58 = arith.constant 0 : index
    %c0_59 = arith.constant 0 : index
    %113 = vector.load %arg9[%c3_57, %c0_58, %c0_59] : memref<4x8x32xbf16, #tpu.memory_space<vmem>>, vector<1x8x32xbf16>
    %114 = vector.shape_cast %113 : vector<1x8x32xbf16> to vector<8x32xbf16>
    %cst_60 = arith.constant dense<0.000000e+00> : vector<8x32xf32>
    %115 = tpu.matmul %112, %114, %cst_60 {dimension_numbers = #tpu.dot_dimension_numbers<[1], [0], [0], [1], [0, 0, 1, 1], [], []>} : vector<8x8xbf16>, vector<8x32xbf16>, vector<8x32xf32> -> vector<8x32xf32>
    %116 = arith.addf %105, %115 : vector<8x32xf32>
    %117 = arith.addf %7, %116 : vector<8x32xf32>
    %c0_61 = arith.constant 0 : index
    %c0_62 = arith.constant 0 : index
    %118 = vector.load %arg10[%c0_61, %c0_62] : memref<1x32xf32, #tpu.memory_space<vmem>>, vector<1x32xf32>
    %119 = vector.shape_cast %118 : vector<1x32xf32> to vector<32xf32>
    %120 = vector.shape_cast %119 : vector<32xf32> to vector<1x32xf32>
    %121 = vector.broadcast %120 : vector<1x32xf32> to vector<8x32xf32>
    %122 = arith.addf %117, %121 : vector<8x32xf32>
    %cst_63 = arith.constant dense<0.000000e+00> : vector<8xf32>
    %123 = vector.multi_reduction <add>, %122, %cst_63 [1] : vector<8x32xf32> to vector<8xf32>
    %124 = vector.shape_cast %123 : vector<8xf32> to vector<8x1xf32>
    %cst_64 = arith.constant 3.200000e+01 : f32
    %125 = vector.broadcast %cst_64 : f32 to vector<8x1xf32>
    %126 = arith.divf %124, %125 : vector<8x1xf32>
    %127 = vector.broadcast %126 : vector<8x1xf32> to vector<8x32xf32>
    %128 = arith.subf %122, %127 : vector<8x32xf32>
    %129 = arith.mulf %128, %128 : vector<8x32xf32>
    %cst_65 = arith.constant dense<0.000000e+00> : vector<8xf32>
    %130 = vector.multi_reduction <add>, %129, %cst_65 [1] : vector<8x32xf32> to vector<8xf32>
    %131 = vector.shape_cast %130 : vector<8xf32> to vector<8x1xf32>
    %cst_66 = arith.constant 3.200000e+01 : f32
    %132 = vector.broadcast %cst_66 : f32 to vector<8x1xf32>
    %133 = arith.divf %131, %132 : vector<8x1xf32>
    %cst_67 = arith.constant 9.99999974E-6 : f32
    %134 = vector.broadcast %cst_67 : f32 to vector<8x1xf32>
    %135 = arith.addf %133, %134 : vector<8x1xf32>
    %136 = math.rsqrt %135 : vector<8x1xf32>
    %137 = vector.broadcast %136 : vector<8x1xf32> to vector<8x32xf32>
    %138 = arith.mulf %128, %137 : vector<8x32xf32>
    %c0_68 = arith.constant 0 : index
    %c0_69 = arith.constant 0 : index
    %139 = vector.load %arg11[%c0_68, %c0_69] : memref<1x32xf32, #tpu.memory_space<vmem>>, vector<1x32xf32>
    %140 = vector.shape_cast %139 : vector<1x32xf32> to vector<32xf32>
    %141 = vector.shape_cast %140 : vector<32xf32> to vector<1x32xf32>
    %142 = vector.broadcast %141 : vector<1x32xf32> to vector<8x32xf32>
    %143 = arith.mulf %138, %142 : vector<8x32xf32>
    %c0_70 = arith.constant 0 : index
    %c0_71 = arith.constant 0 : index
    %144 = vector.load %arg12[%c0_70, %c0_71] : memref<1x32xf32, #tpu.memory_space<vmem>>, vector<1x32xf32>
    %145 = vector.shape_cast %144 : vector<1x32xf32> to vector<32xf32>
    %146 = vector.shape_cast %145 : vector<32xf32> to vector<1x32xf32>
    %147 = vector.broadcast %146 : vector<1x32xf32> to vector<8x32xf32>
    %148 = arith.addf %143, %147 : vector<8x32xf32>
    %149 = arith.truncf %148 : vector<8x32xf32> to vector<8x32xbf16>
    %c0_72 = arith.constant 0 : index
    %c0_73 = arith.constant 0 : index
    %150 = vector.load %arg13[%c0_72, %c0_73] : memref<32x128xbf16, #tpu.memory_space<vmem>>, vector<32x128xbf16>
    %cst_74 = arith.constant dense<0.000000e+00> : vector<8x128xf32>
    %151 = tpu.matmul %149, %150, %cst_74 {dimension_numbers = #tpu.dot_dimension_numbers<[1], [0], [0], [1], [0, 0, 1, 1], [], []>} : vector<8x32xbf16>, vector<32x128xbf16>, vector<8x128xf32> -> vector<8x128xf32>
    %c0_75 = arith.constant 0 : index
    %c0_76 = arith.constant 0 : index
    %152 = vector.load %arg14[%c0_75, %c0_76] : memref<1x128xf32, #tpu.memory_space<vmem>>, vector<1x128xf32>
    %153 = vector.shape_cast %152 : vector<1x128xf32> to vector<128xf32>
    %154 = vector.shape_cast %153 : vector<128xf32> to vector<1x128xf32>
    %155 = vector.broadcast %154 : vector<1x128xf32> to vector<8x128xf32>
    %156 = arith.addf %151, %155 : vector<8x128xf32>
    %cst_77 = arith.constant 0.000000e+00 : f32
    %157 = vector.broadcast %cst_77 : f32 to vector<8x128xf32>
    %158 = arith.maximumf %156, %157 : vector<8x128xf32>
    %159 = arith.truncf %158 : vector<8x128xf32> to vector<8x128xbf16>
    %c0_78 = arith.constant 0 : index
    %c0_79 = arith.constant 0 : index
    %160 = vector.load %arg15[%c0_78, %c0_79] : memref<128x32xbf16, #tpu.memory_space<vmem>>, vector<128x32xbf16>
    %cst_80 = arith.constant dense<0.000000e+00> : vector<8x32xf32>
    %161 = tpu.matmul %159, %160, %cst_80 {dimension_numbers = #tpu.dot_dimension_numbers<[1], [0], [0], [1], [0, 0, 1, 1], [], []>} : vector<8x128xbf16>, vector<128x32xbf16>, vector<8x32xf32> -> vector<8x32xf32>
    %c0_81 = arith.constant 0 : index
    %c0_82 = arith.constant 0 : index
    %162 = vector.load %arg16[%c0_81, %c0_82] : memref<1x32xf32, #tpu.memory_space<vmem>>, vector<1x32xf32>
    %163 = vector.shape_cast %162 : vector<1x32xf32> to vector<32xf32>
    %164 = vector.shape_cast %163 : vector<32xf32> to vector<1x32xf32>
    %165 = vector.broadcast %164 : vector<1x32xf32> to vector<8x32xf32>
    %166 = arith.addf %161, %165 : vector<8x32xf32>
    %167 = arith.addf %122, %166 : vector<8x32xf32>
    %c0_83 = arith.constant 0 : index
    %c0_84 = arith.constant 0 : index
    %c0_85 = arith.constant 0 : index
    %168 = vector.load %arg17[%c0_83, %c0_84, %c0_85] : memref<1x8x32xf32, #tpu.memory_space<vmem>>, vector<1x8x32xf32>
    %169 = vector.shape_cast %168 : vector<1x8x32xf32> to vector<8x32xf32>
    %170 = vector.shape_cast %167 : vector<8x32xf32> to vector<1x8x32xf32>
    tpu.vector_store %arg17[%c0_83, %c0_84, %c0_85], %170 {strides = array<i32>} : memref<1x8x32xf32, #tpu.memory_space<vmem>>, vector<1x8x32xf32>,
    return
  }
  func.func @transform_0(%arg0: i32, %arg1: i32) -> (i32, i32, i32) {
    %c0_i32 = arith.constant 0 : i32
    %c0_i32_0 = arith.constant 0 : i32
    %c0_i32_1 = arith.constant 0 : i32
    return %arg0, %c0_i32, %c0_i32_0 : i32, i32, i32
  }
  func.func @transform_1(%arg0: i32, %arg1: i32) -> (i32, i32) {
    %c0_i32 = arith.constant 0 : i32
    %c0_i32_0 = arith.constant 0 : i32
    %c0_i32_1 = arith.constant 0 : i32
    return %c0_i32, %c0_i32_0 : i32, i32
  }
  func.func @transform_2(%arg0: i32, %arg1: i32) -> (i32, i32) {
    %c0_i32 = arith.constant 0 : i32
    %c0_i32_0 = arith.constant 0 : i32
    %c0_i32_1 = arith.constant 0 : i32
    return %c0_i32, %c0_i32_0 : i32, i32
  }
  func.func @transform_3(%arg0: i32, %arg1: i32) -> (i32, i32) {
    %c0_i32 = arith.constant 0 : i32
    %c0_i32_0 = arith.constant 0 : i32
    %c0_i32_1 = arith.constant 0 : i32
    return %c0_i32, %c0_i32_0 : i32, i32
  }
  func.func @transform_4(%arg0: i32, %arg1: i32) -> (i32, i32) {
    %c0_i32 = arith.constant 0 : i32
    %c0_i32_0 = arith.constant 0 : i32
    %c0_i32_1 = arith.constant 0 : i32
    return %c0_i32, %c0_i32_0 : i32, i32
  }
  func.func @transform_5(%arg0: i32, %arg1: i32) -> (i32, i32) {
    %c0_i32 = arith.constant 0 : i32
    %c0_i32_0 = arith.constant 0 : i32
    %c0_i32_1 = arith.constant 0 : i32
    return %c0_i32, %c0_i32_0 : i32, i32
  }
  func.func @transform_6(%arg0: i32, %arg1: i32) -> (i32, i32) {
    %c0_i32 = arith.constant 0 : i32
    %c0_i32_0 = arith.constant 0 : i32
    %c0_i32_1 = arith.constant 0 : i32
    return %c0_i32, %c0_i32_0 : i32, i32
  }
  func.func @transform_7(%arg0: i32, %arg1: i32) -> (i32, i32, i32) {
    %c0_i32 = arith.constant 0 : i32
    %c0_i32_0 = arith.constant 0 : i32
    %c0_i32_1 = arith.constant 0 : i32
    %c0_i32_2 = arith.constant 0 : i32
    return %c0_i32, %c0_i32_0, %c0_i32_1 : i32, i32, i32
  }
  func.func @transform_8(%arg0: i32, %arg1: i32) -> (i32, i32) {
    %c0_i32 = arith.constant 0 : i32
    %c0_i32_0 = arith.constant 0 : i32
    %c0_i32_1 = arith.constant 0 : i32
    return %c0_i32, %c0_i32_0 : i32, i32
  }
  func.func @transform_9(%arg0: i32, %arg1: i32) -> (i32, i32) {
    %c0_i32 = arith.constant 0 : i32
    %c0_i32_0 = arith.constant 0 : i32
    %c0_i32_1 = arith.constant 0 : i32
    return %c0_i32, %c0_i32_0 : i32, i32
  }
  func.func @transform_10(%arg0: i32, %arg1: i32) -> (i32, i32) {
    %c0_i32 = arith.constant 0 : i32
    %c0_i32_0 = arith.constant 0 : i32
    %c0_i32_1 = arith.constant 0 : i32
    return %c0_i32, %c0_i32_0 : i32, i32
  }
  func.func @transform_11(%arg0: i32, %arg1: i32) -> (i32, i32) {
    %c0_i32 = arith.constant 0 : i32
    %c0_i32_0 = arith.constant 0 : i32
    %c0_i32_1 = arith.constant 0 : i32
    return %c0_i32, %c0_i32_0 : i32, i32
  }
  func.func @transform_12(%arg0: i32, %arg1: i32) -> (i32, i32) {
    %c0_i32 = arith.constant 0 : i32
    %c0_i32_0 = arith.constant 0 : i32
    %c0_i32_1 = arith.constant 0 : i32
    return %c0_i32, %c0_i32_0 : i32, i32
  }
  func.func @transform_13(%arg0: i32, %arg1: i32) -> (i32, i32) {
    %c0_i32 = arith.constant 0 : i32
    %c0_i32_0 = arith.constant 0 : i32
    %c0_i32_1 = arith.constant 0 : i32
    return %c0_i32, %c0_i32_0 : i32, i32
  }
  func.func @transform_14(%arg0: i32, %arg1: i32) -> (i32, i32) {
    %c0_i32 = arith.constant 0 : i32
    %c0_i32_0 = arith.constant 0 : i32
    %c0_i32_1 = arith.constant 0 : i32
    return %c0_i32, %c0_i32_0 : i32, i32
  }
  func.func @transform_15(%arg0: i32, %arg1: i32) -> (i32, i32, i32) {
    %c0_i32 = arith.constant 0 : i32
    %c0_i32_0 = arith.constant 0 : i32
    return %arg0, %arg1, %c0_i32 : i32, i32, i32
  }
}

module attributes {stable_mosaic.version = 11 : i64} {
  func.func @transformer_block_kernel(%arg0: i32, %arg1: i32, %arg2: memref<1x32x32xf32, #tpu.memory_space<vmem>>, %arg3: memref<1x32xf32, #tpu.memory_space<vmem>>, %arg4: memref<1x32xf32, #tpu.memory_space<vmem>>, %arg5: memref<32x32xbf16, #tpu.memory_space<vmem>>, %arg6: memref<1x32xf32, #tpu.memory_space<vmem>>, %arg7: memref<32x64xbf16, #tpu.memory_space<vmem>>, %arg8: memref<1x64xf32, #tpu.memory_space<vmem>>, %arg9: memref<4x8x32xbf16, #tpu.memory_space<vmem>>, %arg10: memref<1x32xf32, #tpu.memory_space<vmem>>, %arg11: memref<1x32xf32, #tpu.memory_space<vmem>>, %arg12: memref<1x32xf32, #tpu.memory_space<vmem>>, %arg13: memref<32x128xbf16, #tpu.memory_space<vmem>>, %arg14: memref<1x128xf32, #tpu.memory_space<vmem>>, %arg15: memref<128x32xbf16, #tpu.memory_space<vmem>>, %arg16: memref<1x32xf32, #tpu.memory_space<vmem>>, %arg17: memref<1x8x32xf32, #tpu.memory_space<vmem>>, %arg18: memref<4x32x8xbf16, #tpu.memory_space<vmem>>, %arg19: memref<4x32x8xbf16, #tpu.memory_space<vmem>>, %arg20: memref<4x8x1xf32, #tpu.memory_space<vmem>>, %arg21: memref<4x8x1xf32, #tpu.memory_space<vmem>>, %arg22: memref<4x8x8xf32, #tpu.memory_space<vmem>>) attributes {dimension_semantics = [#tpu.dimension_semantics<parallel>, #tpu.dimension_semantics<arbitrary>], iteration_bounds = array<i64: 2, 4>, scalar_prefetch = 0 : i64, scratch_operands = 5 : i64, tpu.core_type = #tpu.core_type<tc>, window_params = [{transform_indices = @transform_0, window_bounds = array<i64: 1, 32, 32>}, {pipeline_mode = #tpu.pipeline_mode<synchronous>, transform_indices = @transform_1, window_bounds = array<i64: 1, 32>}, {pipeline_mode = #tpu.pipeline_mode<synchronous>, transform_indices = @transform_2, window_bounds = array<i64: 1, 32>}, {pipeline_mode = #tpu.pipeline_mode<synchronous>, transform_indices = @transform_3, window_bounds = array<i64: 32, 32>}, {pipeline_mode = #tpu.pipeline_mode<synchronous>, transform_indices = @transform_4, window_bounds = array<i64: 1, 32>}, {pipeline_mode = #tpu.pipeline_mode<synchronous>, transform_indices = @transform_5, window_bounds = array<i64: 32, 64>}, {pipeline_mode = #tpu.pipeline_mode<synchronous>, transform_indices = @transform_6, window_bounds = array<i64: 1, 64>}, {pipeline_mode = #tpu.pipeline_mode<synchronous>, transform_indices = @transform_7, window_bounds = array<i64: 4, 8, 32>}, {pipeline_mode = #tpu.pipeline_mode<synchronous>, transform_indices = @transform_8, window_bounds = array<i64: 1, 32>}, {pipeline_mode = #tpu.pipeline_mode<synchronous>, transform_indices = @transform_9, window_bounds = array<i64: 1, 32>}, {pipeline_mode = #tpu.pipeline_mode<synchronous>, transform_indices = @transform_10, window_bounds = array<i64: 1, 32>}, {pipeline_mode = #tpu.pipeline_mode<synchronous>, transform_indices = @transform_11, window_bounds = array<i64: 32, 128>}, {pipeline_mode = #tpu.pipeline_mode<synchronous>, transform_indices = @transform_12, window_bounds = array<i64: 1, 128>}, {pipeline_mode = #tpu.pipeline_mode<synchronous>, transform_indices = @transform_13, window_bounds = array<i64: 128, 32>}, {pipeline_mode = #tpu.pipeline_mode<synchronous>, transform_indices = @transform_14, window_bounds = array<i64: 1, 32>}, {transform_indices = @transform_15, window_bounds = array<i64: 1, 8, 32>}]} {
    %c0_i32 = arith.constant 0 : i32
    %0 = arith.cmpi eq, %arg1, %c0_i32 : i32
    %1 = arith.extui %0 : i1 to i32
    %c0_i32_0 = arith.constant 0 : i32
    %2 = arith.cmpi ne, %1, %c0_i32_0 : i32
    scf.if %2 {
      %c0_86 = arith.constant 0 : index
      %c0_87 = arith.constant 0 : index
      %171 = vector.load %arg7[%c0_86, %c0_87] : memref<32x64xbf16, #tpu.memory_space<vmem>>, vector<32x64xbf16>
      %c0_88 = arith.constant 0 : index
      %c0_89 = arith.constant 0 : index
      %172 = vector.load %arg8[%c0_88, %c0_89] : memref<1x64xf32, #tpu.memory_space<vmem>>, vector<1x64xf32>
      %173 = vector.shape_cast %172 : vector<1x64xf32> to vector<64xf32>
      %c0_90 = arith.constant 0 : index
      %c0_91 = arith.constant 0 : index
      %c0_92 = arith.constant 0 : index
      %174 = vector.load %arg2[%c0_90, %c0_91, %c0_92] : memref<1x32x32xf32, #tpu.memory_space<vmem>>, vector<1x16x32xf32>
      %175 = vector.shape_cast %174 : vector<1x16x32xf32> to vector<16x32xf32>
      %cst_93 = arith.constant dense<0.000000e+00> : vector<16xf32>
      %176 = vector.multi_reduction <add>, %175, %cst_93 [1] : vector<16x32xf32> to vector<16xf32>
      %177 = vector.shape_cast %176 : vector<16xf32> to vector<16x1xf32>
      %cst_94 = arith.constant 3.200000e+01 : f32
      %178 = vector.broadcast %cst_94 : f32 to vector<16x1xf32>
      %179 = arith.divf %177, %178 : vector<16x1xf32>
      %180 = vector.broadcast %179 : vector<16x1xf32> to vector<16x32xf32>
      %181 = arith.subf %175, %180 : vector<16x32xf32>
      %182 = arith.mulf %181, %181 : vector<16x32xf32>
      %cst_95 = arith.constant dense<0.000000e+00> : vector<16xf32>
      %183 = vector.multi_reduction <add>, %182, %cst_95 [1] : vector<16x32xf32> to vector<16xf32>
      %184 = vector.shape_cast %183 : vector<16xf32> to vector<16x1xf32>
      %cst_96 = arith.constant 3.200000e+01 : f32
      %185 = vector.broadcast %cst_96 : f32 to vector<16x1xf32>
      %186 = arith.divf %184, %185 : vector<16x1xf32>
      %cst_97 = arith.constant 9.99999974E-6 : f32
      %187 = vector.broadcast %cst_97 : f32 to vector<16x1xf32>
      %188 = arith.addf %186, %187 : vector<16x1xf32>
      %189 = math.rsqrt %188 : vector<16x1xf32>
      %190 = vector.broadcast %189 : vector<16x1xf32> to vector<16x32xf32>
      %191 = arith.mulf %181, %190 : vector<16x32xf32>
      %c0_98 = arith.constant 0 : index
      %c0_99 = arith.constant 0 : index
      %192 = vector.load %arg3[%c0_98, %c0_99] : memref<1x32xf32, #tpu.memory_space<vmem>>, vector<1x32xf32>
      %193 = vector.shape_cast %192 : vector<1x32xf32> to vector<32xf32>
      %194 = vector.shape_cast %193 : vector<32xf32> to vector<1x32xf32>
      %195 = vector.broadcast %194 : vector<1x32xf32> to vector<16x32xf32>
      %196 = arith.mulf %191, %195 : vector<16x32xf32>
      %c0_100 = arith.constant 0 : index
      %c0_101 = arith.constant 0 : index
      %197 = vector.load %arg4[%c0_100, %c0_101] : memref<1x32xf32, #tpu.memory_space<vmem>>, vector<1x32xf32>
      %198 = vector.shape_cast %197 : vector<1x32xf32> to vector<32xf32>
      %199 = vector.shape_cast %198 : vector<32xf32> to vector<1x32xf32>
      %200 = vector.broadcast %199 : vector<1x32xf32> to vector<16x32xf32>
      %201 = arith.addf %196, %200 : vector<16x32xf32>
      %202 = arith.truncf %201 : vector<16x32xf32> to vector<16x32xbf16>
      %cst_102 = arith.constant dense<0.000000e+00> : vector<16x64xf32>
      %203 = tpu.matmul %202, %171, %cst_102 {dimension_numbers = #tpu.dot_dimension_numbers<[1], [0], [0], [1], [0, 0, 1, 1], [], []>} : vector<16x32xbf16>, vector<32x64xbf16>, vector<16x64xf32> -> vector<16x64xf32>
      %204 = vector.shape_cast %173 : vector<64xf32> to vector<1x64xf32>
      %205 = vector.broadcast %204 : vector<1x64xf32> to vector<16x64xf32>
      %206 = arith.addf %203, %205 : vector<16x64xf32>
      %207 = vector.extract_strided_slice %206 {offsets = [0, 0], sizes = [16, 8], strides = [1, 1]} : vector<16x64xf32> to vector<16x8xf32>
      %208 = arith.truncf %207 : vector<16x8xf32> to vector<16x8xbf16>
      %c0_103 = arith.constant 0 : index
      %c0_104 = arith.constant 0 : index
      %c0_105 = arith.constant 0 : index
      %209 = vector.load %arg18[%c0_103, %c0_104, %c0_105] : memref<4x32x8xbf16, #tpu.memory_space<vmem>>, vector<1x16x8xbf16>
      %210 = vector.shape_cast %209 : vector<1x16x8xbf16> to vector<16x8xbf16>
      %211 = vector.shape_cast %208 : vector<16x8xbf16> to vector<1x16x8xbf16>
      tpu.vector_store %arg18[%c0_103, %c0_104, %c0_105], %211 {strides = array<i32>} : memref<4x32x8xbf16, #tpu.memory_space<vmem>>, vector<1x16x8xbf16>,
      %212 = vector.extract_strided_slice %206 {offsets = [0, 32], sizes = [16, 8], strides = [1, 1]} : vector<16x64xf32> to vector<16x8xf32>
      %213 = arith.truncf %212 : vector<16x8xf32> to vector<16x8xbf16>
      %c0_106 = arith.constant 0 : index
      %c0_107 = arith.constant 0 : index
      %c0_108 = arith.constant 0 : index
      %214 = vector.load %arg19[%c0_106, %c0_107, %c0_108] : memref<4x32x8xbf16, #tpu.memory_space<vmem>>, vector<1x16x8xbf16>
      %215 = vector.shape_cast %214 : vector<1x16x8xbf16> to vector<16x8xbf16>
      %216 = vector.shape_cast %213 : vector<16x8xbf16> to vector<1x16x8xbf16>
      tpu.vector_store %arg19[%c0_106, %c0_107, %c0_108], %216 {strides = array<i32>} : memref<4x32x8xbf16, #tpu.memory_space<vmem>>, vector<1x16x8xbf16>,
      %217 = vector.extract_strided_slice %206 {offsets = [0, 8], sizes = [16, 8], strides = [1, 1]} : vector<16x64xf32> to vector<16x8xf32>
      %218 = arith.truncf %217 : vector<16x8xf32> to vector<16x8xbf16>
      %c1_109 = arith.constant 1 : index
      %c0_110 = arith.constant 0 : index
      %c0_111 = arith.constant 0 : index
      %219 = vector.load %arg18[%c1_109, %c0_110, %c0_111] : memref<4x32x8xbf16, #tpu.memory_space<vmem>>, vector<1x16x8xbf16>
      %220 = vector.shape_cast %219 : vector<1x16x8xbf16> to vector<16x8xbf16>
      %221 = vector.shape_cast %218 : vector<16x8xbf16> to vector<1x16x8xbf16>
      tpu.vector_store %arg18[%c1_109, %c0_110, %c0_111], %221 {strides = array<i32>} : memref<4x32x8xbf16, #tpu.memory_space<vmem>>, vector<1x16x8xbf16>,
      %222 = vector.extract_strided_slice %206 {offsets = [0, 40], sizes = [16, 8], strides = [1, 1]} : vector<16x64xf32> to vector<16x8xf32>
      %223 = arith.truncf %222 : vector<16x8xf32> to vector<16x8xbf16>
      %c1_112 = arith.constant 1 : index
      %c0_113 = arith.constant 0 : index
      %c0_114 = arith.constant 0 : index
      %224 = vector.load %arg19[%c1_112, %c0_113, %c0_114] : memref<4x32x8xbf16, #tpu.memory_space<vmem>>, vector<1x16x8xbf16>
      %225 = vector.shape_cast %224 : vector<1x16x8xbf16> to vector<16x8xbf16>
      %226 = vector.shape_cast %223 : vector<16x8xbf16> to vector<1x16x8xbf16>
      tpu.vector_store %arg19[%c1_112, %c0_113, %c0_114], %226 {strides = array<i32>} : memref<4x32x8xbf16, #tpu.memory_space<vmem>>, vector<1x16x8xbf16>,
      %227 = vector.extract_strided_slice %206 {offsets = [0, 16], sizes = [16, 8], strides = [1, 1]} : vector<16x64xf32> to vector<16x8xf32>
      %228 = arith.truncf %227 : vector<16x8xf32> to vector<16x8xbf16>
      %c2_115 = arith.constant 2 : index
      %c0_116 = arith.constant 0 : index
      %c0_117 = arith.constant 0 : index
      %229 = vector.load %arg18[%c2_115, %c0_116, %c0_117] : memref<4x32x8xbf16, #tpu.memory_space<vmem>>, vector<1x16x8xbf16>
      %230 = vector.shape_cast %229 : vector<1x16x8xbf16> to vector<16x8xbf16>
      %231 = vector.shape_cast %228 : vector<16x8xbf16> to vector<1x16x8xbf16>
      tpu.vector_store %arg18[%c2_115, %c0_116, %c0_117], %231 {strides = array<i32>} : memref<4x32x8xbf16, #tpu.memory_space<vmem>>, vector<1x16x8xbf16>,
      %232 = vector.extract_strided_slice %206 {offsets = [0, 48], sizes = [16, 8], strides = [1, 1]} : vector<16x64xf32> to vector<16x8xf32>
      %233 = arith.truncf %232 : vector<16x8xf32> to vector<16x8xbf16>
      %c2_118 = arith.constant 2 : index
      %c0_119 = arith.constant 0 : index
      %c0_120 = arith.constant 0 : index
      %234 = vector.load %arg19[%c2_118, %c0_119, %c0_120] : memref<4x32x8xbf16, #tpu.memory_space<vmem>>, vector<1x16x8xbf16>
      %235 = vector.shape_cast %234 : vector<1x16x8xbf16> to vector<16x8xbf16>
      %236 = vector.shape_cast %233 : vector<16x8xbf16> to vector<1x16x8xbf16>
      tpu.vector_store %arg19[%c2_118, %c0_119, %c0_120], %236 {strides = array<i32>} : memref<4x32x8xbf16, #tpu.memory_space<vmem>>, vector<1x16x8xbf16>,
      %237 = vector.extract_strided_slice %206 {offsets = [0, 24], sizes = [16, 8], strides = [1, 1]} : vector<16x64xf32> to vector<16x8xf32>
      %238 = arith.truncf %237 : vector<16x8xf32> to vector<16x8xbf16>
      %c3_121 = arith.constant 3 : index
      %c0_122 = arith.constant 0 : index
      %c0_123 = arith.constant 0 : index
      %239 = vector.load %arg18[%c3_121, %c0_122, %c0_123] : memref<4x32x8xbf16, #tpu.memory_space<vmem>>, vector<1x16x8xbf16>
      %240 = vector.shape_cast %239 : vector<1x16x8xbf16> to vector<16x8xbf16>
      %241 = vector.shape_cast %238 : vector<16x8xbf16> to vector<1x16x8xbf16>
      tpu.vector_store %arg18[%c3_121, %c0_122, %c0_123], %241 {strides = array<i32>} : memref<4x32x8xbf16, #tpu.memory_space<vmem>>, vector<1x16x8xbf16>,
      %242 = vector.extract_strided_slice %206 {offsets = [0, 56], sizes = [16, 8], strides = [1, 1]} : vector<16x64xf32> to vector<16x8xf32>
      %243 = arith.truncf %242 : vector<16x8xf32> to vector<16x8xbf16>
      %c3_124 = arith.constant 3 : index
      %c0_125 = arith.constant 0 : index
      %c0_126 = arith.constant 0 : index
      %244 = vector.load %arg19[%c3_124, %c0_125, %c0_126] : memref<4x32x8xbf16, #tpu.memory_space<vmem>>, vector<1x16x8xbf16>
      %245 = vector.shape_cast %244 : vector<1x16x8xbf16> to vector<16x8xbf16>
      %246 = vector.shape_cast %243 : vector<16x8xbf16> to vector<1x16x8xbf16>
      tpu.vector_store %arg19[%c3_124, %c0_125, %c0_126], %246 {strides = array<i32>} : memref<4x32x8xbf16, #tpu.memory_space<vmem>>, vector<1x16x8xbf16>,
      %c0_127 = arith.constant 0 : index
      %c16 = arith.constant 16 : index
      %c0_128 = arith.constant 0 : index
      %247 = vector.load %arg2[%c0_127, %c16, %c0_128] : memref<1x32x32xf32, #tpu.memory_space<vmem>>, vector<1x16x32xf32>
      %248 = vector.shape_cast %247 : vector<1x16x32xf32> to vector<16x32xf32>
      %cst_129 = arith.constant dense<0.000000e+00> : vector<16xf32>
      %249 = vector.multi_reduction <add>, %248, %cst_129 [1] : vector<16x32xf32> to vector<16xf32>
      %250 = vector.shape_cast %249 : vector<16xf32> to vector<16x1xf32>
      %cst_130 = arith.constant 3.200000e+01 : f32
      %251 = vector.broadcast %cst_130 : f32 to vector<16x1xf32>
      %252 = arith.divf %250, %251 : vector<16x1xf32>
      %253 = vector.broadcast %252 : vector<16x1xf32> to vector<16x32xf32>
      %254 = arith.subf %248, %253 : vector<16x32xf32>
      %255 = arith.mulf %254, %254 : vector<16x32xf32>
      %cst_131 = arith.constant dense<0.000000e+00> : vector<16xf32>
      %256 = vector.multi_reduction <add>, %255, %cst_131 [1] : vector<16x32xf32> to vector<16xf32>
      %257 = vector.shape_cast %256 : vector<16xf32> to vector<16x1xf32>
      %cst_132 = arith.constant 3.200000e+01 : f32
      %258 = vector.broadcast %cst_132 : f32 to vector<16x1xf32>
      %259 = arith.divf %257, %258 : vector<16x1xf32>
      %cst_133 = arith.constant 9.99999974E-6 : f32
      %260 = vector.broadcast %cst_133 : f32 to vector<16x1xf32>
      %261 = arith.addf %259, %260 : vector<16x1xf32>
      %262 = math.rsqrt %261 : vector<16x1xf32>
      %263 = vector.broadcast %262 : vector<16x1xf32> to vector<16x32xf32>
      %264 = arith.mulf %254, %263 : vector<16x32xf32>
      %c0_134 = arith.constant 0 : index
      %c0_135 = arith.constant 0 : index
      %265 = vector.load %arg3[%c0_134, %c0_135] : memref<1x32xf32, #tpu.memory_space<vmem>>, vector<1x32xf32>
      %266 = vector.shape_cast %265 : vector<1x32xf32> to vector<32xf32>
      %267 = vector.shape_cast %266 : vector<32xf32> to vector<1x32xf32>
      %268 = vector.broadcast %267 : vector<1x32xf32> to vector<16x32xf32>
      %269 = arith.mulf %264, %268 : vector<16x32xf32>
      %c0_136 = arith.constant 0 : index
      %c0_137 = arith.constant 0 : index
      %270 = vector.load %arg4[%c0_136, %c0_137] : memref<1x32xf32, #tpu.memory_space<vmem>>, vector<1x32xf32>
      %271 = vector.shape_cast %270 : vector<1x32xf32> to vector<32xf32>
      %272 = vector.shape_cast %271 : vector<32xf32> to vector<1x32xf32>
      %273 = vector.broadcast %272 : vector<1x32xf32> to vector<16x32xf32>
      %274 = arith.addf %269, %273 : vector<16x32xf32>
      %275 = arith.truncf %274 : vector<16x32xf32> to vector<16x32xbf16>
      %cst_138 = arith.constant dense<0.000000e+00> : vector<16x64xf32>
      %276 = tpu.matmul %275, %171, %cst_138 {dimension_numbers = #tpu.dot_dimension_numbers<[1], [0], [0], [1], [0, 0, 1, 1], [], []>} : vector<16x32xbf16>, vector<32x64xbf16>, vector<16x64xf32> -> vector<16x64xf32>
      %277 = vector.shape_cast %173 : vector<64xf32> to vector<1x64xf32>
      %278 = vector.broadcast %277 : vector<1x64xf32> to vector<16x64xf32>
      %279 = arith.addf %276, %278 : vector<16x64xf32>
      %280 = vector.extract_strided_slice %279 {offsets = [0, 0], sizes = [16, 8], strides = [1, 1]} : vector<16x64xf32> to vector<16x8xf32>
      %281 = arith.truncf %280 : vector<16x8xf32> to vector<16x8xbf16>
      %c0_139 = arith.constant 0 : index
      %c16_140 = arith.constant 16 : index
      %c0_141 = arith.constant 0 : index
      %282 = vector.load %arg18[%c0_139, %c16_140, %c0_141] : memref<4x32x8xbf16, #tpu.memory_space<vmem>>, vector<1x16x8xbf16>
      %283 = vector.shape_cast %282 : vector<1x16x8xbf16> to vector<16x8xbf16>
      %284 = vector.shape_cast %281 : vector<16x8xbf16> to vector<1x16x8xbf16>
      tpu.vector_store %arg18[%c0_139, %c16_140, %c0_141], %284 {strides = array<i32>} : memref<4x32x8xbf16, #tpu.memory_space<vmem>>, vector<1x16x8xbf16>,
      %285 = vector.extract_strided_slice %279 {offsets = [0, 32], sizes = [16, 8], strides = [1, 1]} : vector<16x64xf32> to vector<16x8xf32>
      %286 = arith.truncf %285 : vector<16x8xf32> to vector<16x8xbf16>
      %c0_142 = arith.constant 0 : index
      %c16_143 = arith.constant 16 : index
      %c0_144 = arith.constant 0 : index
      %287 = vector.load %arg19[%c0_142, %c16_143, %c0_144] : memref<4x32x8xbf16, #tpu.memory_space<vmem>>, vector<1x16x8xbf16>
      %288 = vector.shape_cast %287 : vector<1x16x8xbf16> to vector<16x8xbf16>
      %289 = vector.shape_cast %286 : vector<16x8xbf16> to vector<1x16x8xbf16>
      tpu.vector_store %arg19[%c0_142, %c16_143, %c0_144], %289 {strides = array<i32>} : memref<4x32x8xbf16, #tpu.memory_space<vmem>>, vector<1x16x8xbf16>,
      %290 = vector.extract_strided_slice %279 {offsets = [0, 8], sizes = [16, 8], strides = [1, 1]} : vector<16x64xf32> to vector<16x8xf32>
      %291 = arith.truncf %290 : vector<16x8xf32> to vector<16x8xbf16>
      %c1_145 = arith.constant 1 : index
      %c16_146 = arith.constant 16 : index
      %c0_147 = arith.constant 0 : index
      %292 = vector.load %arg18[%c1_145, %c16_146, %c0_147] : memref<4x32x8xbf16, #tpu.memory_space<vmem>>, vector<1x16x8xbf16>
      %293 = vector.shape_cast %292 : vector<1x16x8xbf16> to vector<16x8xbf16>
      %294 = vector.shape_cast %291 : vector<16x8xbf16> to vector<1x16x8xbf16>
      tpu.vector_store %arg18[%c1_145, %c16_146, %c0_147], %294 {strides = array<i32>} : memref<4x32x8xbf16, #tpu.memory_space<vmem>>, vector<1x16x8xbf16>,
      %295 = vector.extract_strided_slice %279 {offsets = [0, 40], sizes = [16, 8], strides = [1, 1]} : vector<16x64xf32> to vector<16x8xf32>
      %296 = arith.truncf %295 : vector<16x8xf32> to vector<16x8xbf16>
      %c1_148 = arith.constant 1 : index
      %c16_149 = arith.constant 16 : index
      %c0_150 = arith.constant 0 : index
      %297 = vector.load %arg19[%c1_148, %c16_149, %c0_150] : memref<4x32x8xbf16, #tpu.memory_space<vmem>>, vector<1x16x8xbf16>
      %298 = vector.shape_cast %297 : vector<1x16x8xbf16> to vector<16x8xbf16>
      %299 = vector.shape_cast %296 : vector<16x8xbf16> to vector<1x16x8xbf16>
      tpu.vector_store %arg19[%c1_148, %c16_149, %c0_150], %299 {strides = array<i32>} : memref<4x32x8xbf16, #tpu.memory_space<vmem>>, vector<1x16x8xbf16>,
      %300 = vector.extract_strided_slice %279 {offsets = [0, 16], sizes = [16, 8], strides = [1, 1]} : vector<16x64xf32> to vector<16x8xf32>
      %301 = arith.truncf %300 : vector<16x8xf32> to vector<16x8xbf16>
      %c2_151 = arith.constant 2 : index
      %c16_152 = arith.constant 16 : index
      %c0_153 = arith.constant 0 : index
      %302 = vector.load %arg18[%c2_151, %c16_152, %c0_153] : memref<4x32x8xbf16, #tpu.memory_space<vmem>>, vector<1x16x8xbf16>
      %303 = vector.shape_cast %302 : vector<1x16x8xbf16> to vector<16x8xbf16>
      %304 = vector.shape_cast %301 : vector<16x8xbf16> to vector<1x16x8xbf16>
      tpu.vector_store %arg18[%c2_151, %c16_152, %c0_153], %304 {strides = array<i32>} : memref<4x32x8xbf16, #tpu.memory_space<vmem>>, vector<1x16x8xbf16>,
      %305 = vector.extract_strided_slice %279 {offsets = [0, 48], sizes = [16, 8], strides = [1, 1]} : vector<16x64xf32> to vector<16x8xf32>
      %306 = arith.truncf %305 : vector<16x8xf32> to vector<16x8xbf16>
      %c2_154 = arith.constant 2 : index
      %c16_155 = arith.constant 16 : index
      %c0_156 = arith.constant 0 : index
      %307 = vector.load %arg19[%c2_154, %c16_155, %c0_156] : memref<4x32x8xbf16, #tpu.memory_space<vmem>>, vector<1x16x8xbf16>
      %308 = vector.shape_cast %307 : vector<1x16x8xbf16> to vector<16x8xbf16>
      %309 = vector.shape_cast %306 : vector<16x8xbf16> to vector<1x16x8xbf16>
      tpu.vector_store %arg19[%c2_154, %c16_155, %c0_156], %309 {strides = array<i32>} : memref<4x32x8xbf16, #tpu.memory_space<vmem>>, vector<1x16x8xbf16>,
      %310 = vector.extract_strided_slice %279 {offsets = [0, 24], sizes = [16, 8], strides = [1, 1]} : vector<16x64xf32> to vector<16x8xf32>
      %311 = arith.truncf %310 : vector<16x8xf32> to vector<16x8xbf16>
      %c3_157 = arith.constant 3 : index
      %c16_158 = arith.constant 16 : index
      %c0_159 = arith.constant 0 : index
      %312 = vector.load %arg18[%c3_157, %c16_158, %c0_159] : memref<4x32x8xbf16, #tpu.memory_space<vmem>>, vector<1x16x8xbf16>
      %313 = vector.shape_cast %312 : vector<1x16x8xbf16> to vector<16x8xbf16>
      %314 = vector.shape_cast %311 : vector<16x8xbf16> to vector<1x16x8xbf16>
      tpu.vector_store %arg18[%c3_157, %c16_158, %c0_159], %314 {strides = array<i32>} : memref<4x32x8xbf16, #tpu.memory_space<vmem>>, vector<1x16x8xbf16>,
      %315 = vector.extract_strided_slice %279 {offsets = [0, 56], sizes = [16, 8], strides = [1, 1]} : vector<16x64xf32> to vector<16x8xf32>
      %316 = arith.truncf %315 : vector<16x8xf32> to vector<16x8xbf16>
      %c3_160 = arith.constant 3 : index
      %c16_161 = arith.constant 16 : index
      %c0_162 = arith.constant 0 : index
      %317 = vector.load %arg19[%c3_160, %c16_161, %c0_162] : memref<4x32x8xbf16, #tpu.memory_space<vmem>>, vector<1x16x8xbf16>
      %318 = vector.shape_cast %317 : vector<1x16x8xbf16> to vector<16x8xbf16>
      %319 = vector.shape_cast %316 : vector<16x8xbf16> to vector<1x16x8xbf16>
      tpu.vector_store %arg19[%c3_160, %c16_161, %c0_162], %319 {strides = array<i32>} : memref<4x32x8xbf16, #tpu.memory_space<vmem>>, vector<1x16x8xbf16>,
    } else {
    }
    %c8_i32 = arith.constant 8 : i32
    %3 = arith.muli %arg1, %c8_i32 : i32
    %4 = tpu.assume_multiple %3, 8 : i32
    %c0 = arith.constant 0 : index
    %5 = arith.index_cast %4 : i32 to index
    %c0_1 = arith.constant 0 : index
    %6 = vector.load %arg2[%c0, %5, %c0_1] : memref<1x32x32xf32, #tpu.memory_space<vmem>>, vector<1x8x32xf32>
    %7 = vector.shape_cast %6 : vector<1x8x32xf32> to vector<8x32xf32>
    %cst = arith.constant dense<0.000000e+00> : vector<8xf32>
    %8 = vector.multi_reduction <add>, %7, %cst [1] : vector<8x32xf32> to vector<8xf32>
    %9 = vector.shape_cast %8 : vector<8xf32> to vector<8x1xf32>
    %cst_2 = arith.constant 3.200000e+01 : f32
    %10 = vector.broadcast %cst_2 : f32 to vector<8x1xf32>
    %11 = arith.divf %9, %10 : vector<8x1xf32>
    %12 = vector.broadcast %11 : vector<8x1xf32> to vector<8x32xf32>
    %13 = arith.subf %7, %12 : vector<8x32xf32>
    %14 = arith.mulf %13, %13 : vector<8x32xf32>
    %cst_3 = arith.constant dense<0.000000e+00> : vector<8xf32>
    %15 = vector.multi_reduction <add>, %14, %cst_3 [1] : vector<8x32xf32> to vector<8xf32>
    %16 = vector.shape_cast %15 : vector<8xf32> to vector<8x1xf32>
    %cst_4 = arith.constant 3.200000e+01 : f32
    %17 = vector.broadcast %cst_4 : f32 to vector<8x1xf32>
    %18 = arith.divf %16, %17 : vector<8x1xf32>
    %cst_5 = arith.constant 9.99999974E-6 : f32
    %19 = vector.broadcast %cst_5 : f32 to vector<8x1xf32>
    %20 = arith.addf %18, %19 : vector<8x1xf32>
    %21 = math.rsqrt %20 : vector<8x1xf32>
    %22 = vector.broadcast %21 : vector<8x1xf32> to vector<8x32xf32>
    %23 = arith.mulf %13, %22 : vector<8x32xf32>
    %c0_6 = arith.constant 0 : index
    %c0_7 = arith.constant 0 : index
    %24 = vector.load %arg3[%c0_6, %c0_7] : memref<1x32xf32, #tpu.memory_space<vmem>>, vector<1x32xf32>
    %25 = vector.shape_cast %24 : vector<1x32xf32> to vector<32xf32>
    %26 = vector.shape_cast %25 : vector<32xf32> to vector<1x32xf32>
    %27 = vector.broadcast %26 : vector<1x32xf32> to vector<8x32xf32>
    %28 = arith.mulf %23, %27 : vector<8x32xf32>
    %c0_8 = arith.constant 0 : index
    %c0_9 = arith.constant 0 : index
    %29 = vector.load %arg4[%c0_8, %c0_9] : memref<1x32xf32, #tpu.memory_space<vmem>>, vector<1x32xf32>
    %30 = vector.shape_cast %29 : vector<1x32xf32> to vector<32xf32>
    %31 = vector.shape_cast %30 : vector<32xf32> to vector<1x32xf32>
    %32 = vector.broadcast %31 : vector<1x32xf32> to vector<8x32xf32>
    %33 = arith.addf %28, %32 : vector<8x32xf32>
    %34 = arith.truncf %33 : vector<8x32xf32> to vector<8x32xbf16>
    %c0_10 = arith.constant 0 : index
    %c0_11 = arith.constant 0 : index
    %35 = vector.load %arg5[%c0_10, %c0_11] : memref<32x32xbf16, #tpu.memory_space<vmem>>, vector<32x32xbf16>
    %cst_12 = arith.constant dense<0.000000e+00> : vector<8x32xf32>
    %36 = tpu.matmul %34, %35, %cst_12 {dimension_numbers = #tpu.dot_dimension_numbers<[1], [0], [0], [1], [0, 0, 1, 1], [], []>} : vector<8x32xbf16>, vector<32x32xbf16>, vector<8x32xf32> -> vector<8x32xf32>
    %c0_13 = arith.constant 0 : index
    %c0_14 = arith.constant 0 : index
    %37 = vector.load %arg6[%c0_13, %c0_14] : memref<1x32xf32, #tpu.memory_space<vmem>>, vector<1x32xf32>
    %38 = vector.shape_cast %37 : vector<1x32xf32> to vector<32xf32>
    %39 = vector.shape_cast %38 : vector<32xf32> to vector<1x32xf32>
    %40 = vector.broadcast %39 : vector<1x32xf32> to vector<8x32xf32>
    %41 = arith.addf %36, %40 : vector<8x32xf32>
    %cst_15 = arith.constant 0.353553385 : f32
    %42 = vector.broadcast %cst_15 : f32 to vector<8x32xf32>
    %43 = arith.mulf %41, %42 : vector<8x32xf32>
    %44 = vector.extract_strided_slice %43 {offsets = [0, 0], sizes = [8, 8], strides = [1, 1]} : vector<8x32xf32> to vector<8x8xf32>
    %45 = vector.extract_strided_slice %43 {offsets = [0, 8], sizes = [8, 8], strides = [1, 1]} : vector<8x32xf32> to vector<8x8xf32>
    %46 = vector.extract_strided_slice %43 {offsets = [0, 16], sizes = [8, 8], strides = [1, 1]} : vector<8x32xf32> to vector<8x8xf32>
    %47 = vector.extract_strided_slice %43 {offsets = [0, 24], sizes = [8, 8], strides = [1, 1]} : vector<8x32xf32> to vector<8x8xf32>
    %48 = vector.shape_cast %44 : vector<8x8xf32> to vector<1x8x8xf32>
    %49 = vector.shape_cast %45 : vector<8x8xf32> to vector<1x8x8xf32>
    %50 = vector.shape_cast %46 : vector<8x8xf32> to vector<1x8x8xf32>
    %51 = vector.shape_cast %47 : vector<8x8xf32> to vector<1x8x8xf32>
    %52 = tpu.concatenate %48, %49, %50, %51 in 0 : vector<1x8x8xf32>, vector<1x8x8xf32>, vector<1x8x8xf32>, vector<1x8x8xf32> -> vector<4x8x8xf32>
    %53 = arith.truncf %52 : vector<4x8x8xf32> to vector<4x8x8xbf16>
    %cst_16 = arith.constant -1.000000e+30 : f32
    %54 = vector.broadcast %cst_16 : f32 to vector<4x8x1xf32>
    %c0_17 = arith.constant 0 : index
    %c0_18 = arith.constant 0 : index
    %c0_19 = arith.constant 0 : index
    %55 = vector.load %arg20[%c0_17, %c0_18, %c0_19] : memref<4x8x1xf32, #tpu.memory_space<vmem>>, vector<4x8x1xf32>
    tpu.vector_store %arg20[%c0_17, %c0_18, %c0_19], %54 {strides = array<i32>} : memref<4x8x1xf32, #tpu.memory_space<vmem>>, vector<4x8x1xf32>,
    %cst_20 = arith.constant 0.000000e+00 : f32
    %56 = vector.broadcast %cst_20 : f32 to vector<4x8x1xf32>
    %c0_21 = arith.constant 0 : index
    %c0_22 = arith.constant 0 : index
    %c0_23 = arith.constant 0 : index
    %57 = vector.load %arg21[%c0_21, %c0_22, %c0_23] : memref<4x8x1xf32, #tpu.memory_space<vmem>>, vector<4x8x1xf32>
    tpu.vector_store %arg21[%c0_21, %c0_22, %c0_23], %56 {strides = array<i32>} : memref<4x8x1xf32, #tpu.memory_space<vmem>>, vector<4x8x1xf32>,
    %cst_24 = arith.constant 0.000000e+00 : f32
    %58 = vector.broadcast %cst_24 : f32 to vector<4x8x8xf32>
    %c0_25 = arith.constant 0 : index
    %c0_26 = arith.constant 0 : index
    %c0_27 = arith.constant 0 : index
    %59 = vector.load %arg22[%c0_25, %c0_26, %c0_27] : memref<4x8x8xf32, #tpu.memory_space<vmem>>, vector<4x8x8xf32>
    tpu.vector_store %arg22[%c0_25, %c0_26, %c0_27], %58 {strides = array<i32>} : memref<4x8x8xf32, #tpu.memory_space<vmem>>, vector<4x8x8xf32>,
    %60 = tpu.iota {dimensions = array<i32: 0>} : vector<8x16xi32>
    %61 = vector.broadcast %4 : i32 to vector<8x16xi32>
    %62 = arith.addi %61, %60 : vector<8x16xi32>
    %63 = tpu.iota {dimensions = array<i32: 1>} : vector<8x16xi32>
    %c1_i32 = arith.constant 1 : i32
    %64 = arith.addi %arg1, %c1_i32 : i32
    %c8_i32_28 = arith.constant 8 : i32
    %65 = arith.muli %64, %c8_i32_28 : i32
    %c15_i32 = arith.constant 15 : i32
    %66 = arith.addi %65, %c15_i32 : i32
    %c16_i32 = arith.constant 16 : i32
    %67 = arith.divsi %66, %c16_i32 : i32
    %c0_i32_29 = arith.constant 0 : i32
    %c0_i32_30 = arith.constant 0 : i32
    %68 = arith.subi %67, %c0_i32_30 : i32
    %69 = arith.addi %c0_i32_30, %68 : i32
    %c1_i32_31 = arith.constant 1 : i32
    scf.for %arg23 = %c0_i32_30 to %69 step %c1_i32_31  : i32 {
      %c16_i32_86 = arith.constant 16 : i32
      %171 = arith.muli %arg23, %c16_i32_86 : i32
      %172 = tpu.assume_multiple %171, 16 : i32
      %c0_87 = arith.constant 0 : index
      %173 = arith.index_cast %172 : i32 to index
      %c0_88 = arith.constant 0 : index
      %174 = vector.load %arg18[%c0_87, %173, %c0_88] : memref<4x32x8xbf16, #tpu.memory_space<vmem>>, vector<4x16x8xbf16>
      %c0_89 = arith.constant 0 : index
      %175 = arith.index_cast %172 : i32 to index
      %c0_90 = arith.constant 0 : index
      %176 = vector.load %arg19[%c0_89, %175, %c0_90] : memref<4x32x8xbf16, #tpu.memory_space<vmem>>, vector<4x16x8xbf16>
      "tpu.trace_start"() <{level = 10 : i32, message = "hqd,hkd->hqk"}> : () -> ()
      %cst_91 = arith.constant dense<0.000000e+00> : vector<4x8x16xf32>
      %177 = tpu.matmul %53, %174, %cst_91 {dimension_numbers = #tpu.dot_dimension_numbers<[2], [2], [1], [1], [0, 0, 0, 1, 1, 1], [0], [0]>} : vector<4x8x8xbf16>, vector<4x16x8xbf16>, vector<4x8x16xf32> -> vector<4x8x16xf32>
      "tpu.trace_stop"() : () -> ()
      %178 = vector.broadcast %172 : i32 to vector<8x16xi32>
      %179 = arith.addi %178, %63 : vector<8x16xi32>
      %180 = arith.cmpi sle, %179, %62 : vector<8x16xi32>
      %cst_92 = arith.constant 0.000000e+00 : f32
      %cst_93 = arith.constant -1.000000e+30 : f32
      %181 = vector.broadcast %cst_92 : f32 to vector<8x16xf32>
      %182 = vector.broadcast %cst_93 : f32 to vector<8x16xf32>
      %183 = arith.select %180, %181, %182 : vector<8x16xi1>, vector<8x16xf32>
      %184 = vector.shape_cast %183 : vector<8x16xf32> to vector<1x8x16xf32>
      %185 = vector.broadcast %184 : vector<1x8x16xf32> to vector<4x8x16xf32>
      %186 = arith.addf %177, %185 : vector<4x8x16xf32>
      %c0_94 = arith.constant 0 : index
      %c0_95 = arith.constant 0 : index
      %c0_96 = arith.constant 0 : index
      %187 = vector.load %arg20[%c0_94, %c0_95, %c0_96] : memref<4x8x1xf32, #tpu.memory_space<vmem>>, vector<4x8x1xf32>
      %cst_97 = arith.constant dense<0xFF800000> : vector<4x8xf32>
      %188 = vector.multi_reduction <maximumf>, %186, %cst_97 [2] : vector<4x8x16xf32> to vector<4x8xf32>
      %189 = vector.shape_cast %188 : vector<4x8xf32> to vector<4x8x1xf32>
      %190 = arith.maximumf %187, %189 : vector<4x8x1xf32>
      %191 = arith.subf %187, %190 : vector<4x8x1xf32>
      %192 = math.exp %191 : vector<4x8x1xf32>
      %193 = vector.broadcast %190 : vector<4x8x1xf32> to vector<4x8x16xf32>
      %194 = arith.subf %186, %193 : vector<4x8x16xf32>
      %195 = math.exp %194 : vector<4x8x16xf32>
      %c0_98 = arith.constant 0 : index
      %c0_99 = arith.constant 0 : index
      %c0_100 = arith.constant 0 : index
      %196 = vector.load %arg21[%c0_98, %c0_99, %c0_100] : memref<4x8x1xf32, #tpu.memory_space<vmem>>, vector<4x8x1xf32>
      %197 = arith.mulf %192, %196 : vector<4x8x1xf32>
      %cst_101 = arith.constant dense<0.000000e+00> : vector<4x8xf32>
      %198 = vector.multi_reduction <add>, %195, %cst_101 [2] : vector<4x8x16xf32> to vector<4x8xf32>
      %199 = vector.shape_cast %198 : vector<4x8xf32> to vector<4x8x1xf32>
      %200 = arith.addf %197, %199 : vector<4x8x1xf32>
      %c0_102 = arith.constant 0 : index
      %c0_103 = arith.constant 0 : index
      %c0_104 = arith.constant 0 : index
      %201 = vector.load %arg21[%c0_102, %c0_103, %c0_104] : memref<4x8x1xf32, #tpu.memory_space<vmem>>, vector<4x8x1xf32>
      tpu.vector_store %arg21[%c0_102, %c0_103, %c0_104], %200 {strides = array<i32>} : memref<4x8x1xf32, #tpu.memory_space<vmem>>, vector<4x8x1xf32>,
      %c0_105 = arith.constant 0 : index
      %c0_106 = arith.constant 0 : index
      %c0_107 = arith.constant 0 : index
      %202 = vector.load %arg22[%c0_105, %c0_106, %c0_107] : memref<4x8x8xf32, #tpu.memory_space<vmem>>, vector<4x8x8xf32>
      %203 = vector.broadcast %192 : vector<4x8x1xf32> to vector<4x8x8xf32>
      %204 = arith.mulf %203, %202 : vector<4x8x8xf32>
      %205 = arith.truncf %195 : vector<4x8x16xf32> to vector<4x8x16xbf16>
      "tpu.trace_start"() <{level = 10 : i32, message = "hqk,hkd->hqd"}> : () -> ()
      %cst_108 = arith.constant dense<0.000000e+00> : vector<4x8x8xf32>
      %206 = tpu.matmul %205, %176, %cst_108 {dimension_numbers = #tpu.dot_dimension_numbers<[2], [1], [1], [2], [0, 0, 0, 1, 1, 2], [0], [0]>} : vector<4x8x16xbf16>, vector<4x16x8xbf16>, vector<4x8x8xf32> -> vector<4x8x8xf32>
      "tpu.trace_stop"() : () -> ()
      %207 = arith.addf %204, %206 : vector<4x8x8xf32>
      %c0_109 = arith.constant 0 : index
      %c0_110 = arith.constant 0 : index
      %c0_111 = arith.constant 0 : index
      %208 = vector.load %arg22[%c0_109, %c0_110, %c0_111] : memref<4x8x8xf32, #tpu.memory_space<vmem>>, vector<4x8x8xf32>
      tpu.vector_store %arg22[%c0_109, %c0_110, %c0_111], %207 {strides = array<i32>} : memref<4x8x8xf32, #tpu.memory_space<vmem>>, vector<4x8x8xf32>,
      %c0_112 = arith.constant 0 : index
      %c0_113 = arith.constant 0 : index
      %c0_114 = arith.constant 0 : index
      %209 = vector.load %arg20[%c0_112, %c0_113, %c0_114] : memref<4x8x1xf32, #tpu.memory_space<vmem>>, vector<4x8x1xf32>
      tpu.vector_store %arg20[%c0_112, %c0_113, %c0_114], %190 {strides = array<i32>} : memref<4x8x1xf32, #tpu.memory_space<vmem>>, vector<4x8x1xf32>,
    }
    %c0_32 = arith.constant 0 : index
    %c0_33 = arith.constant 0 : index
    %c0_34 = arith.constant 0 : index
    %70 = vector.load %arg21[%c0_32, %c0_33, %c0_34] : memref<4x8x1xf32, #tpu.memory_space<vmem>>, vector<4x8x1xf32>
    %71 = tpu.reciprocal %70 {approx = true} : vector<4x8x1xf32> -> vector<4x8x1xf32>
    %cst_35 = arith.constant 0.000000e+00 : f32
    %72 = vector.broadcast %cst_35 : f32 to vector<8x32xf32>
    %c0_36 = arith.constant 0 : index
    %c0_37 = arith.constant 0 : index
    %c0_38 = arith.constant 0 : index
    %73 = vector.load %arg22[%c0_36, %c0_37, %c0_38] : memref<4x8x8xf32, #tpu.memory_space<vmem>>, vector<1x8x8xf32>
    %74 = vector.shape_cast %73 : vector<1x8x8xf32> to vector<8x8xf32>
    %75 = vector.extract_strided_slice %71 {offsets = [0, 0, 0], sizes = [1, 8, 1], strides = [1, 1, 1]} : vector<4x8x1xf32> to vector<1x8x1xf32>
    %76 = vector.shape_cast %75 : vector<1x8x1xf32> to vector<8x1xf32>
    %77 = vector.broadcast %76 : vector<8x1xf32> to vector<8x8xf32>
    %78 = arith.mulf %74, %77 : vector<8x8xf32>
    %79 = arith.truncf %78 : vector<8x8xf32> to vector<8x8xbf16>
    %c0_39 = arith.constant 0 : index
    %c0_40 = arith.constant 0 : index
    %c0_41 = arith.constant 0 : index
    %80 = vector.load %arg9[%c0_39, %c0_40, %c0_41] : memref<4x8x32xbf16, #tpu.memory_space<vmem>>, vector<1x8x32xbf16>
    %81 = vector.shape_cast %80 : vector<1x8x32xbf16> to vector<8x32xbf16>
    %cst_42 = arith.constant dense<0.000000e+00> : vector<8x32xf32>
    %82 = tpu.matmul %79, %81, %cst_42 {dimension_numbers = #tpu.dot_dimension_numbers<[1], [0], [0], [1], [0, 0, 1, 1], [], []>} : vector<8x8xbf16>, vector<8x32xbf16>, vector<8x32xf32> -> vector<8x32xf32>
    %83 = arith.addf %72, %82 : vector<8x32xf32>
    %c1 = arith.constant 1 : index
    %c0_43 = arith.constant 0 : index
    %c0_44 = arith.constant 0 : index
    %84 = vector.load %arg22[%c1, %c0_43, %c0_44] : memref<4x8x8xf32, #tpu.memory_space<vmem>>, vector<1x8x8xf32>
    %85 = vector.shape_cast %84 : vector<1x8x8xf32> to vector<8x8xf32>
    %86 = vector.extract_strided_slice %71 {offsets = [1, 0, 0], sizes = [1, 8, 1], strides = [1, 1, 1]} : vector<4x8x1xf32> to vector<1x8x1xf32>
    %87 = vector.shape_cast %86 : vector<1x8x1xf32> to vector<8x1xf32>
    %88 = vector.broadcast %87 : vector<8x1xf32> to vector<8x8xf32>
    %89 = arith.mulf %85, %88 : vector<8x8xf32>
    %90 = arith.truncf %89 : vector<8x8xf32> to vector<8x8xbf16>
    %c1_45 = arith.constant 1 : index
    %c0_46 = arith.constant 0 : index
    %c0_47 = arith.constant 0 : index
    %91 = vector.load %arg9[%c1_45, %c0_46, %c0_47] : memref<4x8x32xbf16, #tpu.memory_space<vmem>>, vector<1x8x32xbf16>
    %92 = vector.shape_cast %91 : vector<1x8x32xbf16> to vector<8x32xbf16>
    %cst_48 = arith.constant dense<0.000000e+00> : vector<8x32xf32>
    %93 = tpu.matmul %90, %92, %cst_48 {dimension_numbers = #tpu.dot_dimension_numbers<[1], [0], [0], [1], [0, 0, 1, 1], [], []>} : vector<8x8xbf16>, vector<8x32xbf16>, vector<8x32xf32> -> vector<8x32xf32>
    %94 = arith.addf %83, %93 : vector<8x32xf32>
    %c2 = arith.constant 2 : index
    %c0_49 = arith.constant 0 : index
    %c0_50 = arith.constant 0 : index
    %95 = vector.load %arg22[%c2, %c0_49, %c0_50] : memref<4x8x8xf32, #tpu.memory_space<vmem>>, vector<1x8x8xf32>
    %96 = vector.shape_cast %95 : vector<1x8x8xf32> to vector<8x8xf32>
    %97 = vector.extract_strided_slice %71 {offsets = [2, 0, 0], sizes = [1, 8, 1], strides = [1, 1, 1]} : vector<4x8x1xf32> to vector<1x8x1xf32>
    %98 = vector.shape_cast %97 : vector<1x8x1xf32> to vector<8x1xf32>
    %99 = vector.broadcast %98 : vector<8x1xf32> to vector<8x8xf32>
    %100 = arith.mulf %96, %99 : vector<8x8xf32>
    %101 = arith.truncf %100 : vector<8x8xf32> to vector<8x8xbf16>
    %c2_51 = arith.constant 2 : index
    %c0_52 = arith.constant 0 : index
    %c0_53 = arith.constant 0 : index
    %102 = vector.load %arg9[%c2_51, %c0_52, %c0_53] : memref<4x8x32xbf16, #tpu.memory_space<vmem>>, vector<1x8x32xbf16>
    %103 = vector.shape_cast %102 : vector<1x8x32xbf16> to vector<8x32xbf16>
    %cst_54 = arith.constant dense<0.000000e+00> : vector<8x32xf32>
    %104 = tpu.matmul %101, %103, %cst_54 {dimension_numbers = #tpu.dot_dimension_numbers<[1], [0], [0], [1], [0, 0, 1, 1], [], []>} : vector<8x8xbf16>, vector<8x32xbf16>, vector<8x32xf32> -> vector<8x32xf32>
    %105 = arith.addf %94, %104 : vector<8x32xf32>
    %c3 = arith.constant 3 : index
    %c0_55 = arith.constant 0 : index
    %c0_56 = arith.constant 0 : index
    %106 = vector.load %arg22[%c3, %c0_55, %c0_56] : memref<4x8x8xf32, #tpu.memory_space<vmem>>, vector<1x8x8xf32>
    %107 = vector.shape_cast %106 : vector<1x8x8xf32> to vector<8x8xf32>
    %108 = vector.extract_strided_slice %71 {offsets = [3, 0, 0], sizes = [1, 8, 1], strides = [1, 1, 1]} : vector<4x8x1xf32> to vector<1x8x1xf32>
    %109 = vector.shape_cast %108 : vector<1x8x1xf32> to vector<8x1xf32>
    %110 = vector.broadcast %109 : vector<8x1xf32> to vector<8x8xf32>
    %111 = arith.mulf %107, %110 : vector<8x8xf32>
    %112 = arith.truncf %111 : vector<8x8xf32> to vector<8x8xbf16>
    %c3_57 = arith.constant 3 : index
    %c0_58 = arith.constant 0 : index
    %c0_59 = arith.constant 0 : index
    %113 = vector.load %arg9[%c3_57, %c0_58, %c0_59] : memref<4x8x32xbf16, #tpu.memory_space<vmem>>, vector<1x8x32xbf16>
    %114 = vector.shape_cast %113 : vector<1x8x32xbf16> to vector<8x32xbf16>
    %cst_60 = arith.constant dense<0.000000e+00> : vector<8x32xf32>
    %115 = tpu.matmul %112, %114, %cst_60 {dimension_numbers = #tpu.dot_dimension_numbers<[1], [0], [0], [1], [0, 0, 1, 1], [], []>} : vector<8x8xbf16>, vector<8x32xbf16>, vector<8x32xf32> -> vector<8x32xf32>
    %116 = arith.addf %105, %115 : vector<8x32xf32>
    %117 = arith.addf %7, %116 : vector<8x32xf32>
    %c0_61 = arith.constant 0 : index
    %c0_62 = arith.constant 0 : index
    %118 = vector.load %arg10[%c0_61, %c0_62] : memref<1x32xf32, #tpu.memory_space<vmem>>, vector<1x32xf32>
    %119 = vector.shape_cast %118 : vector<1x32xf32> to vector<32xf32>
    %120 = vector.shape_cast %119 : vector<32xf32> to vector<1x32xf32>
    %121 = vector.broadcast %120 : vector<1x32xf32> to vector<8x32xf32>
    %122 = arith.addf %117, %121 : vector<8x32xf32>
    %cst_63 = arith.constant dense<0.000000e+00> : vector<8xf32>
    %123 = vector.multi_reduction <add>, %122, %cst_63 [1] : vector<8x32xf32> to vector<8xf32>
    %124 = vector.shape_cast %123 : vector<8xf32> to vector<8x1xf32>
    %cst_64 = arith.constant 3.200000e+01 : f32
    %125 = vector.broadcast %cst_64 : f32 to vector<8x1xf32>
    %126 = arith.divf %124, %125 : vector<8x1xf32>
    %127 = vector.broadcast %126 : vector<8x1xf32> to vector<8x32xf32>
    %128 = arith.subf %122, %127 : vector<8x32xf32>
    %129 = arith.mulf %128, %128 : vector<8x32xf32>
    %cst_65 = arith.constant dense<0.000000e+00> : vector<8xf32>
    %130 = vector.multi_reduction <add>, %129, %cst_65 [1] : vector<8x32xf32> to vector<8xf32>
    %131 = vector.shape_cast %130 : vector<8xf32> to vector<8x1xf32>
    %cst_66 = arith.constant 3.200000e+01 : f32
    %132 = vector.broadcast %cst_66 : f32 to vector<8x1xf32>
    %133 = arith.divf %131, %132 : vector<8x1xf32>
    %cst_67 = arith.constant 9.99999974E-6 : f32
    %134 = vector.broadcast %cst_67 : f32 to vector<8x1xf32>
    %135 = arith.addf %133, %134 : vector<8x1xf32>
    %136 = math.rsqrt %135 : vector<8x1xf32>
    %137 = vector.broadcast %136 : vector<8x1xf32> to vector<8x32xf32>
    %138 = arith.mulf %128, %137 : vector<8x32xf32>
    %c0_68 = arith.constant 0 : index
    %c0_69 = arith.constant 0 : index
    %139 = vector.load %arg11[%c0_68, %c0_69] : memref<1x32xf32, #tpu.memory_space<vmem>>, vector<1x32xf32>
    %140 = vector.shape_cast %139 : vector<1x32xf32> to vector<32xf32>
    %141 = vector.shape_cast %140 : vector<32xf32> to vector<1x32xf32>
    %142 = vector.broadcast %141 : vector<1x32xf32> to vector<8x32xf32>
    %143 = arith.mulf %138, %142 : vector<8x32xf32>
    %c0_70 = arith.constant 0 : index
    %c0_71 = arith.constant 0 : index
    %144 = vector.load %arg12[%c0_70, %c0_71] : memref<1x32xf32, #tpu.memory_space<vmem>>, vector<1x32xf32>
    %145 = vector.shape_cast %144 : vector<1x32xf32> to vector<32xf32>
    %146 = vector.shape_cast %145 : vector<32xf32> to vector<1x32xf32>
    %147 = vector.broadcast %146 : vector<1x32xf32> to vector<8x32xf32>
    %148 = arith.addf %143, %147 : vector<8x32xf32>
    %149 = arith.truncf %148 : vector<8x32xf32> to vector<8x32xbf16>
    %c0_72 = arith.constant 0 : index
    %c0_73 = arith.constant 0 : index
    %150 = vector.load %arg13[%c0_72, %c0_73] : memref<32x128xbf16, #tpu.memory_space<vmem>>, vector<32x128xbf16>
    %cst_74 = arith.constant dense<0.000000e+00> : vector<8x128xf32>
    %151 = tpu.matmul %149, %150, %cst_74 {dimension_numbers = #tpu.dot_dimension_numbers<[1], [0], [0], [1], [0, 0, 1, 1], [], []>} : vector<8x32xbf16>, vector<32x128xbf16>, vector<8x128xf32> -> vector<8x128xf32>
    %c0_75 = arith.constant 0 : index
    %c0_76 = arith.constant 0 : index
    %152 = vector.load %arg14[%c0_75, %c0_76] : memref<1x128xf32, #tpu.memory_space<vmem>>, vector<1x128xf32>
    %153 = vector.shape_cast %152 : vector<1x128xf32> to vector<128xf32>
    %154 = vector.shape_cast %153 : vector<128xf32> to vector<1x128xf32>
    %155 = vector.broadcast %154 : vector<1x128xf32> to vector<8x128xf32>
    %156 = arith.addf %151, %155 : vector<8x128xf32>
    %cst_77 = arith.constant 0.000000e+00 : f32
    %157 = vector.broadcast %cst_77 : f32 to vector<8x128xf32>
    %158 = arith.maximumf %156, %157 : vector<8x128xf32>
    %159 = arith.truncf %158 : vector<8x128xf32> to vector<8x128xbf16>
    %c0_78 = arith.constant 0 : index
    %c0_79 = arith.constant 0 : index
    %160 = vector.load %arg15[%c0_78, %c0_79] : memref<128x32xbf16, #tpu.memory_space<vmem>>, vector<128x32xbf16>
    %cst_80 = arith.constant dense<0.000000e+00> : vector<8x32xf32>
    %161 = tpu.matmul %159, %160, %cst_80 {dimension_numbers = #tpu.dot_dimension_numbers<[1], [0], [0], [1], [0, 0, 1, 1], [], []>} : vector<8x128xbf16>, vector<128x32xbf16>, vector<8x32xf32> -> vector<8x32xf32>
    %c0_81 = arith.constant 0 : index
    %c0_82 = arith.constant 0 : index
    %162 = vector.load %arg16[%c0_81, %c0_82] : memref<1x32xf32, #tpu.memory_space<vmem>>, vector<1x32xf32>
    %163 = vector.shape_cast %162 : vector<1x32xf32> to vector<32xf32>
    %164 = vector.shape_cast %163 : vector<32xf32> to vector<1x32xf32>
    %165 = vector.broadcast %164 : vector<1x32xf32> to vector<8x32xf32>
    %166 = arith.addf %161, %165 : vector<8x32xf32>
    %167 = arith.addf %122, %166 : vector<8x32xf32>
    %c0_83 = arith.constant 0 : index
    %c0_84 = arith.constant 0 : index
    %c0_85 = arith.constant 0 : index
    %168 = vector.load %arg17[%c0_83, %c0_84, %c0_85] : memref<1x8x32xf32, #tpu.memory_space<vmem>>, vector<1x8x32xf32>
    %169 = vector.shape_cast %168 : vector<1x8x32xf32> to vector<8x32xf32>
    %170 = vector.shape_cast %167 : vector<8x32xf32> to vector<1x8x32xf32>
    tpu.vector_store %arg17[%c0_83, %c0_84, %c0_85], %170 {strides = array<i32>} : memref<1x8x32xf32, #tpu.memory_space<vmem>>, vector<1x8x32xf32>,
    return
  }
  func.func @transform_0(%arg0: i32, %arg1: i32) -> (i32, i32, i32) {
    %c0_i32 = arith.constant 0 : i32
    %c0_i32_0 = arith.constant 0 : i32
    %c0_i32_1 = arith.constant 0 : i32
    return %arg0, %c0_i32, %c0_i32_0 : i32, i32, i32
  }
  func.func @transform_1(%arg0: i32, %arg1: i32) -> (i32, i32) {
    %c0_i32 = arith.constant 0 : i32
    %c0_i32_0 = arith.constant 0 : i32
    %c0_i32_1 = arith.constant 0 : i32
    return %c0_i32, %c0_i32_0 : i32, i32
  }
  func.func @transform_2(%arg0: i32, %arg1: i32) -> (i32, i32) {
    %c0_i32 = arith.constant 0 : i32
    %c0_i32_0 = arith.constant 0 : i32
    %c0_i32_1 = arith.constant 0 : i32
    return %c0_i32, %c0_i32_0 : i32, i32
  }
  func.func @transform_3(%arg0: i32, %arg1: i32) -> (i32, i32) {
    %c0_i32 = arith.constant 0 : i32
    %c0_i32_0 = arith.constant 0 : i32
    %c0_i32_1 = arith.constant 0 : i32
    return %c0_i32, %c0_i32_0 : i32, i32
  }
  func.func @transform_4(%arg0: i32, %arg1: i32) -> (i32, i32) {
    %c0_i32 = arith.constant 0 : i32
    %c0_i32_0 = arith.constant 0 : i32
    %c0_i32_1 = arith.constant 0 : i32
    return %c0_i32, %c0_i32_0 : i32, i32
  }
  func.func @transform_5(%arg0: i32, %arg1: i32) -> (i32, i32) {
    %c0_i32 = arith.constant 0 : i32
    %c0_i32_0 = arith.constant 0 : i32
    %c0_i32_1 = arith.constant 0 : i32
    return %c0_i32, %c0_i32_0 : i32, i32
  }
  func.func @transform_6(%arg0: i32, %arg1: i32) -> (i32, i32) {
    %c0_i32 = arith.constant 0 : i32
    %c0_i32_0 = arith.constant 0 : i32
    %c0_i32_1 = arith.constant 0 : i32
    return %c0_i32, %c0_i32_0 : i32, i32
  }
  func.func @transform_7(%arg0: i32, %arg1: i32) -> (i32, i32, i32) {
    %c0_i32 = arith.constant 0 : i32
    %c0_i32_0 = arith.constant 0 : i32
    %c0_i32_1 = arith.constant 0 : i32
    %c0_i32_2 = arith.constant 0 : i32
    return %c0_i32, %c0_i32_0, %c0_i32_1 : i32, i32, i32
  }
  func.func @transform_8(%arg0: i32, %arg1: i32) -> (i32, i32) {
    %c0_i32 = arith.constant 0 : i32
    %c0_i32_0 = arith.constant 0 : i32
    %c0_i32_1 = arith.constant 0 : i32
    return %c0_i32, %c0_i32_0 : i32, i32
  }
  func.func @transform_9(%arg0: i32, %arg1: i32) -> (i32, i32) {
    %c0_i32 = arith.constant 0 : i32
    %c0_i32_0 = arith.constant 0 : i32
    %c0_i32_1 = arith.constant 0 : i32
    return %c0_i32, %c0_i32_0 : i32, i32
  }
  func.func @transform_10(%arg0: i32, %arg1: i32) -> (i32, i32) {
    %c0_i32 = arith.constant 0 : i32
    %c0_i32_0 = arith.constant 0 : i32
    %c0_i32_1 = arith.constant 0 : i32
    return %c0_i32, %c0_i32_0 : i32, i32
  }
  func.func @transform_11(%arg0: i32, %arg1: i32) -> (i32, i32) {
    %c0_i32 = arith.constant 0 : i32
    %c0_i32_0 = arith.constant 0 : i32
    %c0_i32_1 = arith.constant 0 : i32
    return %c0_i32, %c0_i32_0 : i32, i32
  }
  func.func @transform_12(%arg0: i32, %arg1: i32) -> (i32, i32) {
    %c0_i32 = arith.constant 0 : i32
    %c0_i32_0 = arith.constant 0 : i32
    %c0_i32_1 = arith.constant 0 : i32
    return %c0_i32, %c0_i32_0 : i32, i32
  }
  func.func @transform_13(%arg0: i32, %arg1: i32) -> (i32, i32) {
    %c0_i32 = arith.constant 0 : i32
    %c0_i32_0 = arith.constant 0 : i32
    %c0_i32_1 = arith.constant 0 : i32
    return %c0_i32, %c0_i32_0 : i32, i32
  }
  func.func @transform_14(%arg0: i32, %arg1: i32) -> (i32, i32) {
    %c0_i32 = arith.constant 0 : i32
    %c0_i32_0 = arith.constant 0 : i32
    %c0_i32_1 = arith.constant 0 : i32
    return %c0_i32, %c0_i32_0 : i32, i32
  }
  func.func @transform_15(%arg0: i32, %arg1: i32) -> (i32, i32, i32) {
    %c0_i32 = arith.constant 0 : i32
    %c0_i32_0 = arith.constant 0 : i32
    return %arg0, %arg1, %c0_i32 : i32, i32, i32
  }
}

</mosaic_0001>

<bundles_post_ra>
// kernel: tpu_custom_call.1
= control target key start
LH: loop header
LB: loop body
LE: loop exit
PB: predicated region body
PF: predicated region fallthrough
CT: control target
= control target key end

     0   :  { %s2969_s0 = inlined_call_operand.vmem [shape: f32[2,32,32], index: 0, kind: input, shape index: {}]   ;;  %s2970_s1 = inlined_call_operand.hbm [shape: f32[1,32], index: 1, kind: input, shape index: {}]   ;;  %s2971_s2 = inlined_call_operand.vmem [shape: f32[1,32], index: 2, kind: input, shape index: {}]   ;;  %s2972_s3 = inlined_call_operand.vmem [shape: bf16[32,32], index: 3, kind: input, shape index: {}]   ;;  %s2973_s4 = inlined_call_operand.vmem [shape: f32[1,32], index: 4, kind: input, shape index: {}]   ;;  %s2974_s5 = inlined_call_operand.hbm [shape: bf16[32,64], index: 5, kind: input, shape index: {}]   ;;  %s2975_s6 = inlined_call_operand.vmem [shape: f32[1,64], index: 6, kind: input, shape index: {}]   ;;  %s2976_s7 = inlined_call_operand.hbm [shape: bf16[4,8,32], index: 7, kind: input, shape index: {}]   ;;  %s2977_s8 = inlined_call_operand.vmem [shape: f32[1,32], index: 8, kind: input, shape index: {}]   ;;  %s2978_s9 = inlined_call_operand.vmem [shape: f32[1,32], index: 9, kind: input, shape index: {}]   ;;  %s2979_s10 = inlined_call_operand.vmem [shape: f32[1,32], index: 10, kind: input, shape index: {}]   ;;  %s2980_s11 = inlined_call_operand.hbm [shape: bf16[32,128], index: 11, kind: input, shape index: {}]   ;;  %s2981_s12 = inlined_call_operand.vmem [shape: f32[1,128], index: 12, kind: input, shape index: {}]   ;;  %s2982_s13 = inlined_call_operand.vmem [shape: bf16[128,32], index: 13, kind: input, shape index: {}]   ;;  %s2983_s14 = inlined_call_operand.vmem [shape: f32[1,32], index: 14, kind: input, shape index: {}]   ;;  %s2984_s15 = inlined_call_operand.hbm [shape: f32[2,32,32], index: 15, kind: output, shape index: {}]  }
   0x1   :  { %2997 = sst [smem:[#allocation30_spill]] %s2974_s5 }
   0x2   :  { %2998 = sst [smem:[#allocation31_spill]] %s2978_s9 }
   0x3   :  { %2999 = sst [smem:[#allocation32_spill]] %s2979_s10 }
   0x4   :  { %3000 = sst [smem:[#allocation33_spill]] %s2981_s12 }
   0x5   :  { %3001 = sst [smem:[#allocation34_spill]] %s2983_s14 }
   0x6   :  { %3002 = sst [smem:[#allocation35_spill]] %s2984_s15 }
   0x7   :  { %20 = vsyncpa [#allocation8], 0 }
   0x8   :  { %21 = vsyncpa [#allocation11], 0 }
   0x9   :  { %22 = vsyncpa [#allocation14], 0 }
   0xa   :  { %23 = vsyncpa [#allocation9], 0 }
   0xb   :  { %25 = vsyncpa [#allocation9 + $0x1], 0  ;;  %s2493_s18 = smov 0   ;;  %s2495_s19 = smov 0  }
   0xc   :  { %s2497_s20 = smov 0   ;;  %s2499_s21 = smov 0  }
   0xd   :  { %s2501_s22 = smov 0   ;;  %s2503_s23 = smov 0  }
   0xe   :  { %s2505_s24 = smov 0   ;;  %s2507_s25 = smov 0  }
   0xf LB: > { %3003 = sst [smem:[#allocation20_spill]] %s2356_s18  ;;  %s1800_s26 = sadd.s32 4294967295, %s2384_s25   ;;  %s2384_s25 = sphi %s2507_s25, %s31_s25   ;;  %s2380_s24 = sphi %s2505_s24, %s3034_s24   ;;  %s2376_s23 = sphi %s2503_s23, %s3033_s23   ;;  %s2372_s22 = sphi %s2501_s22, %s3032_s22   ;;  %s2368_s21 = sphi %s2499_s21, %s3031_s21   ;;  %s2364_s20 = sphi %s2497_s20, %s3030_s20   ;;  %s2360_s19 = sphi %s2495_s19, %s3036_s19   ;;  %s2356_s18 = sphi %s2493_s18, %s3035_s18  }
  0x10   : > { %3004 = sst [smem:[#allocation21_spill]] %s2364_s20  ;;  %s1801_s27 = sadd.s32 4294967294, %s2384_s25  }
  0x11   : > { %3005 = sst [smem:[#allocation22_spill]] %s2376_s23  ;;  %s40_s28 = sadd.s32 1, %s2376_s23 }
  0x12   : > { %3006 = sst [smem:[#allocation23_spill]] %s2380_s24  ;;  %s43_s29 = sadd.s32 1, %s2380_s24 }
  0x13   : > { %3007 = sst [smem:[#allocation24_spill]] %s2384_s25  ;;  %p41_p0 = scmp.ge.s32.totalorder %s40_s28, 4 }
  0x14   : > { %s372_s30 = sadd.s32 1, %s2364_s20  ;;  %p382_p1 = scmp.ne.s32.totalorder %s2364_s20, %s2360_s19 }
  0x15   : > { %p383_p2 = scmp.eq.s32.totalorder %s1800_s26, 7  ;;  %s3038_s28 = smov (%p41_p0, %s40_s28), 0 }
  0x16   : > { %3008 = sst [smem:[#allocation25_spill]] %s3038_s28  ;;  %s3040_s29 = smov (!%p41_p0, %s43_s29), %s2380_s24 }
  0x17   : > { %s368_s16 = ssub.s32 %s2376_s23, %s3038_s28  ;;  %p2545_p3 = por %p383_p2, %p382_p1 }
  0x18   : > { %p45_p4 = scmp.ge.s32.totalorder %s3040_s29, 2  ;;  %p388_p5 = scmp.ne.s32.totalorder %s2360_s19, %s2356_s18 }
  0x19   : > { %s3009_s17 = scalar_select %p2545_p3, 1, 0 }
  0x1a   : > { %p389_p6 = scmp.eq.s32.totalorder %s1801_s27, 7  ;;  %p1802_p7 = scmp.ge.s32.totalorder %s2384_s25, 1 }
  0x1b   : > { %3010 = sst [smem:[#allocation26_spill]] %s3009_s17  ;;  %s3042_s29 = smov (%p45_p4, %s3040_s29), 0 }
  0x1c   : > { %3011 = sst [smem:[#allocation27_spill]] %s3042_s29  ;;  %p2554_p8 = por %p389_p6, %p388_p5 }
  0x1d   : > { %p396_p9 = scmp.lt.s32.totalorder %s2384_s25, 9  ;;  %s367_s14 = ssub.s32 %s2380_s24, %s3042_s29 }
  0x1e   : > { %s3012_s15 = scalar_select %p2554_p8, 1, 0 }
  0x1f   : > { %s369_s12 = sor.u32 %s368_s16, %s367_s14  ;;  %p2561_p10 = pnand %p1802_p7, %p396_p9 }
  0x20   : > { %3013 = sst [smem:[#allocation28_spill]] %s3012_s15  ;;  %p370_p11 = scmp.eq.s32.totalorder %s369_s12, 0 }
  0x21   : > { %p2565_p12 = scmp.eq.s32.totalorder %s1800_s26, 0  ;;  %p1975_p13 = pneg %p2561_p10 }
  0x22   : > { %s3016_s5 = sld [smem:[#allocation30_spill]]  ;;  %s2390_s12 = smov [#allocation10]  }
  0x23   : > { %s2575_s25 = scalar_select %p370_p11, %s2364_s20, %s372_s30  }
  0x24   : > { %p2579_p0 = pnand %p2565_p12, %p1975_p13  ;;  %s438_s26 = sshll.u32 %s2390_s12, 4  ;;  %s439_s26 = int_to_ptr.vmem [resolvable:$true] %s438_s26 }
  0x25   : > { %3017 = sst [smem:[#allocation29_spill]] %s2575_s25  ;;  %s2391_s16 = smov 64  }
  0x26   : > { %s2392_s29 = smov 4   ;;  %s416_s30 = sshll.u32 %s2970_s1, 4  ;;  %s417_s30 = int_to_ptr.hbm [resolvable:$true] %s416_s30 }
  0x27   : > { %s453_s17 = sshll.u32 %s2976_s7, 4  ;;  %s2394_s12 = smov [#allocation12]   ;;  %s454_s17 = int_to_ptr.hbm [resolvable:$true] %s453_s17 }
  0x28   : > { %s436_s15 = sshll.u32 %s3016_s5, 4  ;;  %s2393_s5 = smov [#allocation7]   ;;  %s437_s15 = int_to_ptr.hbm [resolvable:$true] %s436_s15 }
  0x29   : > { %1981 = dma.hbm_to_vmem [thread:$0]  (!%p2579_p0), %s437_s15, 256, %s439_s26, [#allocation11], %s2391_s16, %s2391_s16, %s2392_s29  }
  0x2a   : > { %s418_s24 = sshll.u32 %s2393_s5, 4  ;;  %s455_s10 = sshll.u32 %s2394_s12, 4  ;;  %s419_s24 = int_to_ptr.vmem [resolvable:$true] %s418_s24  ;;  %s456_s10 = int_to_ptr.vmem [resolvable:$true] %s455_s10 }
  0x2b   : > { %1978 = dma.hbm_to_vmem [thread:$0]  (!%p2579_p0), %s417_s30, 16, %s419_s24, [#allocation8]  }
  0x2c   : > { %s476_s26 = sshll.u32 %s2980_s11, 4  ;;  %s2395_s18 = smov [#allocation13]   ;;  %s477_s26 = int_to_ptr.hbm [resolvable:$true] %s476_s26 }
  0x2d   : > { %1984 = dma.hbm_to_vmem [thread:$0]  (!%p2579_p0), %s454_s17, 256, %s456_s10, [#allocation11], %s2391_s16, %s2391_s16, %s2392_s29  }
  0x2e   : > { %s478_s5 = sshll.u32 %s2395_s18, 4  ;;  %503 = sbr.rel (%p2561_p10) target bundleno = 2532 (0x9e4), region = 80  ;;  %s479_s5 = int_to_ptr.vmem [resolvable:$true] %s478_s5 }
  0x2f   : > { %1987 = dma.hbm_to_vmem [thread:$0]  (!%p2579_p0), %s477_s26, 256, %s479_s5, [#allocation14], %s2391_s16, %s2391_s16, %s2392_s29  }
  0x33   : > { %2339 = dma.done.wait (%p2565_p12), [#allocation8], 16  }
  0x34   : > { %2341 = vsyncadd (%p2565_p12), [#allocation8], 4294967280 }
  0x35   : > { %2343 = dma.done.wait (%p2565_p12), [#allocation11], 512  }
  0x36   : > { %2345 = vsyncadd (%p2565_p12), [#allocation11], 4294966784 }
  0x37   : > { %2347 = dma.done.wait (%p2565_p12), [#allocation14], 256  }
  0x38   : > { %2349 = vsyncadd (%p2565_p12), [#allocation14], 4294967040  ;;  %s564_s9 = sand.u32 1, %s2360_s19   ;;  %p567_p1 = scmp.lt.s32.totalorder %s2372_s22, 1 }
  0x39   : > { %s2618_s10 = sshll.u32 %s564_s9, 3  ;;  %p1815_p2 = scmp.ne.s32.totalorder %s2368_s21, 0 }
  0x3a   : > { %s568_s20 = scalar_select %p567_p1, %s2372_s22, 1 }
  0x3b   : > { %s566_s17 = scalar_lea.vmem [#allocation15], %s2618_s10  ;;  %576 = sbr.rel (%p1815_p2) target bundleno = 655 (0x28f), region = 100 }
  0x3c   : > { %s1932_s24 = sshll.u32 %s568_s20, 5  ;;  %s2397_s15 = smov (!%p1815_p2), 88  }
  0x3d   : > { %s2624_s29 = scalar_lea.vmem %s2969_s0, %s1932_s24  ;;  %s2398_s26 = smov (!%p1815_p2), 120  }
  0x3e   : > { %s2399_s18 = smov (!%p1815_p2), 96   ;;  %s2400_s5 = smov (!%p1815_p2), 104  }
  0x3f   : > { %s2401_s20 = smov (!%p1815_p2), 112   ;;  %s2402_s24 = smov (!%p1815_p2), 80  }
  0x40   : > { %vm584_vm0 = vcmask 261120   ;;  %v750_v0 = vld [vmem:[%s2624_s29 + $0x10] sm:$0xff]  ;;  %v582_v1 = vld [vmem:[%s2624_s29] sm:$0xff]  ;;  %v751_v4 = vld [vmem:[%s2624_s29 + $0x18] sm:$0xff]  ;;  %v2396_v8 = vmov 32.0   ;;  %vm683_vm14 = vcmask 60416  }
  0x41   : > { %v752_v2 = vsel %vm584_vm0, %v750_v0, 0.0  ;;  %v585_v3 = vsel %vm584_vm0, %v582_v1, 0.0  ;;  %v583_v5 = vld [vmem:[%s2624_s29 + $0x8] sm:$0xff]  ;;  %v755_v6 = vsel %vm584_vm0, %v751_v4, 0.0  ;;  %2101 = vrcp.f32 %v2396_v8  ;;  %s2403_s25 = smov 72  }
  0x42   : > { %753 = vadd.xlane.f32.xlu1 %v752_v2  ;;  %586 = vadd.xlane.f32.xlu0 %v585_v3  ;;  %v588_v7 = vsel %vm584_vm0, %v583_v5, 0.0  ;;  %v1934_v35 = vld [vmem:[#allocation10 + $0x8] sm:$0xff]  ;;  %v1933_v40 = vld [vmem:[#allocation10] sm:$0xff] }
  0x43   : > { %673 = vmatpush.bf16.msra.mxu0 %v1934_v35  ;;  %818 = vmatpush.bf16.msra.mxu1 %v1934_v35 }
  0x47   : > { %v2102_v9 = vpop.eup %2101  ;;  %674 = vmatpush.bf16.msra.mxu0 %v1933_v40  ;;  %819 = vmatpush.bf16.msra.mxu1 %v1933_v40 }
  0x48   : > { %v592_v10 = vmul.f32 32.0, %v2102_v9  ;;  %vm596_vm1 = vweird.f32 %v2102_v9 }
  0x4a   : > { %756 = vadd.xlane.f32.xlu1 %v755_v6  ;;  %589 = vadd.xlane.f32.xlu0 %v588_v7  ;;  %v593_v11 = vsub.f32 1.0, %v592_v10  ;;  %v2098_v10 = vld [vmem:[#allocation7] ss:$0 sm:$0xff] }
  0x4c   : > { %v594_v12 = vmul.f32 %v2102_v9, %v593_v11 }
  0x4e   : > { %v595_v13 = vadd.f32 %v2102_v9, %v594_v12 }
  0x50   : > { %v597_v14 = vsel %vm596_vm1, %v2102_v9, %v595_v13  ;;  %v2096_v13 = vld [vmem:[#allocation7] ss:$0 sm:$0xff] }
  0xb5   : > { %v754_v15 = vpop.xlane.xlu1 %753  ;;  %v587_v16 = vpop.xlane.xlu0 %586 }
  0xb6   : > { %v758_v17 = vmul.f32 %v754_v15, %v597_v14  ;;  %v598_v18 = vmul.f32 %v597_v14, %v587_v16 }
  0xb8   : > { %v2636_v19 = vsub.f32 %v750_v0, %v758_v17  ;;  %v2638_v20 = vsub.f32 %v582_v1, %v598_v18 }
  0xba   : > { %v762_v21 = vmul.f32 %v2636_v19, %v2636_v19  ;;  %v602_v22 = vmul.f32 %v2638_v20, %v2638_v20 }
  0xbc   : > { %v764_v23 = vsel %vm584_vm0, %v762_v21, 0.0  ;;  %v604_v24 = vsel %vm584_vm0, %v602_v22, 0.0 }
  0xbd   : > { %v757_v25 = vpop.xlane.xlu1 %756  ;;  %765 = vadd.xlane.f32.xlu0 %v764_v23  ;;  %605 = vadd.xlane.f32.xlu2 %v604_v24  ;;  %v590_v26 = vpop.xlane.xlu0 %589 }
  0xbe   : > { %v759_v27 = vmul.f32 %v757_v25, %v597_v14  ;;  %v599_v28 = vmul.f32 %v597_v14, %v590_v26 }
  0xc0   : > { %v2646_v29 = vsub.f32 %v751_v4, %v759_v27  ;;  %v2648_v30 = vsub.f32 %v583_v5, %v599_v28 }
  0xc2   : > { %v763_v31 = vmul.f32 %v2646_v29, %v2646_v29  ;;  %v603_v32 = vmul.f32 %v2648_v30, %v2648_v30 }
  0xc4   : > { %v767_v33 = vsel %vm584_vm0, %v763_v31, 0.0  ;;  %v607_v34 = vsel %vm584_vm0, %v603_v32, 0.0 }
  0xc5   : > { %768 = vadd.xlane.f32.xlu1 %v767_v33  ;;  %608 = vadd.xlane.f32.xlu2 %v607_v34 }
 0x130   : > { %v606_v36 = vpop.xlane.xlu2 %605  ;;  %v766_v37 = vpop.xlane.xlu0 %765 }
 0x131   : > { %v610_v38 = vmul.f32 %v606_v36, %v597_v14  ;;  %v770_v39 = vmul.f32 %v766_v37, %v597_v14 }
 0x133   : > { %v612_v41 = vadd.f32 1e-05, %v610_v38  ;;  %v772_v42 = vadd.f32 1e-05, %v770_v39 }
 0x135   : > { %2103 = vrsqrt.f32 %v612_v41  ;;  %vm780_vm2 = vweird.f32 %v772_v42  ;;  %vm620_vm6 = vweird.f32 %v612_v41 }
 0x136   : > { %2105 = vrsqrt.f32 %v772_v42 }
 0x138   : > { %v769_v43 = vpop.xlane.xlu1 %768  ;;  %v609_v44 = vpop.xlane.xlu2 %608 }
 0x139   : > { %v771_v45 = vmul.f32 %v769_v43, %v597_v14  ;;  %v611_v46 = vmul.f32 %v609_v44, %v597_v14 }
 0x13b   : > { %v2104_v47 = vpop.eup %2103  ;;  %v773_v48 = vadd.f32 1e-05, %v771_v45  ;;  %v613_v49 = vadd.f32 1e-05, %v611_v46 }
 0x13c   : > { %v2106_v50 = vpop.eup %2105  ;;  %v615_v51 = vmul.f32 %v2104_v47, %v612_v41  ;;  %vm621_vm4 = vweird.f32 %v2104_v47 }
 0x13d   : > { %v775_v52 = vmul.f32 %v2106_v50, %v772_v42  ;;  %2107 = vrsqrt.f32 %v773_v48  ;;  %vm781_vm3 = vweird.f32 %v2106_v50  ;;  %vm622_vm7 = vmor %vm620_vm6, %vm621_vm4  ;;  %vm790_vm8 = vweird.f32 %v773_v48 }
 0x13e   : > { %v616_v53 = vmul.f32 %v2104_v47, %v615_v51  ;;  %2109 = vrsqrt.f32 %v613_v49  ;;  %vm782_vm5 = vmor %vm780_vm2, %vm781_vm3  ;;  %vm630_vm12 = vweird.f32 %v613_v49 }
 0x13f   : > { %v776_v54 = vmul.f32 %v2106_v50, %v775_v52 }
 0x140   : > { %v617_v55 = vmul.f32 0.5, %v616_v53 }
 0x141   : > { %v777_v56 = vmul.f32 0.5, %v776_v54 }
 0x142   : > { %v618_v57 = vsub.f32 1.5, %v617_v55 }
 0x143   : > { %v2108_v58 = vpop.eup %2107  ;;  %v778_v59 = vsub.f32 1.5, %v777_v56 }
 0x144   : > { %v2110_v60 = vpop.eup %2109  ;;  %v785_v61 = vmul.f32 %v2108_v58, %v773_v48  ;;  %v619_v62 = vmul.f32 %v2104_v47, %v618_v57  ;;  %vm791_vm9 = vweird.f32 %v2108_v58 }
 0x145   : > { %v779_v63 = vmul.f32 %v2106_v50, %v778_v59  ;;  %v625_v0 = vmul.f32 %v2110_v60, %v613_v49  ;;  %vm792_vm10 = vmor %vm790_vm8, %vm791_vm9  ;;  %vm631_vm11 = vweird.f32 %v2110_v60 }
 0x146   : > { %v786_v1 = vmul.f32 %v2108_v58, %v785_v61  ;;  %v623_v5 = vsel %vm622_vm7, %v2104_v47, %v619_v62  ;;  %vm632_vm13 = vmor %vm630_vm12, %vm631_vm11 }
 0x147   : > { %v626_v2 = vmul.f32 %v2110_v60, %v625_v0  ;;  %v783_v3 = vsel %vm782_vm5, %v2106_v50, %v779_v63  ;;  %v634_v11 = vmul.f32 %v623_v5, %v2638_v20  ;;  %v2097_v20 = vld [vmem:[%s2971_s2] ss:$0 sm:$0xff] }
 0x148   : > { %v787_v4 = vmul.f32 0.5, %v786_v1  ;;  %v794_v8 = vmul.f32 %v783_v3, %v2636_v19  ;;  %v2099_v19 = vld [vmem:[%s2971_s2] ss:$0 sm:$0xff] }
 0x149   : > { %v627_v6 = vmul.f32 0.5, %v626_v2  ;;  %v640_v22 = vmul.f32 %v2096_v13, %v634_v11 }
 0x14a   : > { %v788_v7 = vsub.f32 1.5, %v787_v4  ;;  %v800_v18 = vmul.f32 %v2098_v10, %v794_v8 }
 0x14b   : > { %v628_v9 = vsub.f32 1.5, %v627_v6  ;;  %v646_v27 = vadd.f32 %v2097_v20, %v640_v22 }
 0x14c   : > { %v789_v12 = vmul.f32 %v2108_v58, %v788_v7  ;;  %v806_v25 = vadd.f32 %v2099_v19, %v800_v18 }
 0x14d   : > { %v629_v14 = vmul.f32 %v2110_v60, %v628_v9 }
 0x14e   : > { %v793_v15 = vsel %vm792_vm10, %v2108_v58, %v789_v12 }
 0x14f   : > { %v795_v16 = vmul.f32 %v793_v15, %v2646_v29  ;;  %v633_v17 = vsel %vm632_vm13, %v2110_v60, %v629_v14 }
 0x150   : > { %v635_v21 = vmul.f32 %v633_v17, %v2648_v30  ;;  %v2100_v30 = vld [vmem:[%s2975_s6] ss:$0 sm:$0xff] }
 0x151   : > { %v801_v23 = vmul.f32 %v2098_v10, %v795_v16 }
 0x152   : > { %v641_v24 = vmul.f32 %v2096_v13, %v635_v21 }
 0x153   : > { %v807_v26 = vadd.f32 %v2099_v19, %v801_v23 }
 0x154   : > { %v647_v28 = vadd.f32 %v2097_v20, %v641_v24 }
 0x155   : > { %v808_v29 = vpack.c.bf16 %v807_v26, %v806_v25 }
 0x156   : > { %v648_v31 = vpack.c.bf16 %v647_v28, %v646_v27 }
 0x157   : > { %1825 = vmatmul.msk.bf16.vlgmr.msra.gmra.mxu1 %vm584_vm0, %v808_v29 }
 0x158   : > { %1824 = vmatmul.msk.bf16.vlgmr.msra.gmra.mxu0 %vm584_vm0, %v648_v31 }
 0x1d4   : > { %v821_v32 = vpop.f32.mrf.mxu1 }
 0x1d5   : > { %v676_v33 = vpop.f32.mrf.mxu0  ;;  %v822_v34 = vadd.f32 %v2100_v30, %v821_v32 }
 0x1d6   : > { %v677_v35 = vadd.f32 %v2100_v30, %v676_v33 }
 0x1d7   : > { %v826_v36 = vpack.c.bf16 %v822_v34, %v822_v34 }
 0x1d8   : > { %v681_v37 = vpack.c.bf16 %v677_v35, %v677_v35 }
 0x1d9   : > { %828 = vst.msk [vmem:[#allocation2 + $0x8] sm:$0xf] %vm683_vm14, %v826_v36 }
 0x1da   : > { %684 = vst.msk [vmem:[#allocation2] sm:$0xf] %vm683_vm14, %v681_v37  ;;  %705 = vrot.lane.b32.xlu0 %v681_v37, %s2397_s15  ;;  %696 = vrot.lane.b32.xlu1 %v681_v37, %s2398_s26 }
 0x1db   : > { %688 = vrot.lane.b32.xlu2 %v681_v37, %s2399_s18 }
 0x1dc   : > { %v823_v38 = vpop.f32.mrf.mxu1 }
 0x1dd   : > { %v678_v39 = vpop.f32.mrf.mxu0  ;;  %v824_v40 = vadd.f32 %v2100_v30, %v823_v38 }
 0x1de   : > { %v679_v41 = vadd.f32 %v2100_v30, %v678_v39 }
 0x1df   : > { %v827_v42 = vpack.c.bf16 %v824_v40, %v824_v40 }
 0x1e0   : > { %v682_v43 = vpack.c.bf16 %v679_v41, %v679_v41 }
 0x1e1   : > { %829 = vst.msk [vmem:[#allocation2 + $0xc] sm:$0xf] %vm683_vm14, %v827_v42 }
 0x1e2   : > { %685 = vst.msk [vmem:[#allocation2 + $0x4] sm:$0xf] %vm683_vm14, %v682_v43  ;;  %732 = vrot.lane.b32.xlu0 %v681_v37, %s2400_s5  ;;  %714 = vrot.lane.b32.xlu1 %v681_v37, %s2401_s20 }
 0x1e3   : > { %723 = vrot.lane.b32.xlu2 %v681_v37, %s2402_s24 }
 0x1ea   : > { %840 = vrot.lane.b32.xlu0 %v826_v36, %s2398_s26  ;;  %741 = vrot.lane.b32.xlu1 %v681_v37, %s2403_s25 }
 0x1eb   : > { %832 = vrot.lane.b32.xlu2 %v826_v36, %s2399_s18 }
 0x1f2   : > { %864 = vrot.lane.b32.xlu0 %v826_v36, %s2402_s24  ;;  %848 = vrot.lane.b32.xlu1 %v826_v36, %s2397_s15 }
 0x1f3   : > { %856 = vrot.lane.b32.xlu2 %v826_v36, %s2401_s20 }
 0x1fa   : > { %690 = vrot.lane.b32.xlu0 %v682_v43, %s2399_s18  ;;  %872 = vrot.lane.b32.xlu1 %v826_v36, %s2400_s5 }
 0x1fb   : > { %698 = vrot.lane.b32.xlu2 %v682_v43, %s2398_s26 }
 0x202   : > { %716 = vrot.lane.b32.xlu0 %v682_v43, %s2401_s20  ;;  %725 = vrot.lane.b32.xlu1 %v682_v43, %s2402_s24 }
 0x203   : > { %707 = vrot.lane.b32.xlu2 %v682_v43, %s2397_s15 }
 0x20a   : > { %743 = vrot.lane.b32.xlu0 %v682_v43, %s2403_s25  ;;  %834 = vrot.lane.b32.xlu1 %v827_v42, %s2399_s18 }
 0x20b   : > { %734 = vrot.lane.b32.xlu2 %v682_v43, %s2400_s5 }
 0x212   : > { %850 = vrot.lane.b32.xlu0 %v827_v42, %s2397_s15  ;;  %858 = vrot.lane.b32.xlu1 %v827_v42, %s2401_s20 }
 0x213   : > { %842 = vrot.lane.b32.xlu2 %v827_v42, %s2398_s26 }
 0x21a   : > { %874 = vrot.lane.b32.xlu0 %v827_v42, %s2400_s5  ;;  %882 = vrot.lane.b32.xlu1 %v827_v42, %s2403_s25 }
 0x21b   : > { %866 = vrot.lane.b32.xlu2 %v827_v42, %s2402_s24 }
 0x223   : > { %880 = vrot.lane.b32.xlu2 %v826_v36, %s2403_s25 }
 0x235   : > { %v689_v44 = vpop.permute.xlu2 %688 }
 0x236   : > { %694 = vst.msk [vmem:[#allocation3] sm:$0xf] %vm683_vm14, %v689_v44 }
 0x23d   : > { %v724_v45 = vpop.permute.xlu2 %723 }
 0x23e   : > { %730 = vst.msk [vmem:[#allocation3 + $0x20] sm:$0xf] %vm683_vm14, %v724_v45 }
 0x245   : > { %v833_v46 = vpop.permute.xlu2 %832 }
 0x246   : > { %838 = vst.msk [vmem:[#allocation3 + $0x8] sm:$0xf] %vm683_vm14, %v833_v46 }
 0x24c   : > { %v706_v47 = vpop.permute.xlu0 %705  ;;  %v697_v48 = vpop.permute.xlu1 %696 }
 0x24d   : > { %712 = vst.msk [vmem:[#allocation3 + $0x10] sm:$0xf] %vm683_vm14, %v706_v47  ;;  %v857_v49 = vpop.permute.xlu2 %856 }
 0x24e   : > { %703 = vst.msk [vmem:[#allocation2 + $0x10] sm:$0xf] %vm683_vm14, %v697_v48 }
 0x24f   : > { %862 = vst.msk [vmem:[#allocation2 + $0x28] sm:$0xf] %vm683_vm14, %v857_v49 }
 0x254   : > { %v733_v50 = vpop.permute.xlu0 %732  ;;  %v715_v51 = vpop.permute.xlu1 %714 }
 0x255   : > { %739 = vst.msk [vmem:[#allocation2 + $0x30] sm:$0xf] %vm683_vm14, %v733_v50  ;;  %v699_v52 = vpop.permute.xlu2 %698 }
 0x256   : > { %721 = vst.msk [vmem:[#allocation2 + $0x20] sm:$0xf] %vm683_vm14, %v715_v51 }
 0x257   : > { %704 = vst.msk [vmem:[#allocation2 + $0x14] sm:$0xf] %vm683_vm14, %v699_v52 }
 0x25c   : > { %v841_v53 = vpop.permute.xlu0 %840  ;;  %v742_v54 = vpop.permute.xlu1 %741 }
 0x25d   : > { %846 = vst.msk [vmem:[#allocation2 + $0x18] sm:$0xf] %vm683_vm14, %v841_v53  ;;  %v708_v55 = vpop.permute.xlu2 %707 }
 0x25e   : > { %748 = vst.msk [vmem:[#allocation3 + $0x30] sm:$0xf] %vm683_vm14, %v742_v54 }
 0x25f   : > { %713 = vst.msk [vmem:[#allocation3 + $0x14] sm:$0xf] %vm683_vm14, %v708_v55 }
 0x264   : > { %v865_v56 = vpop.permute.xlu0 %864  ;;  %v849_v57 = vpop.permute.xlu1 %848 }
 0x265   : > { %870 = vst.msk [vmem:[#allocation3 + $0x28] sm:$0xf] %vm683_vm14, %v865_v56  ;;  %v735_v58 = vpop.permute.xlu2 %734 }
 0x266   : > { %854 = vst.msk [vmem:[#allocation3 + $0x18] sm:$0xf] %vm683_vm14, %v849_v57 }
 0x267   : > { %740 = vst.msk [vmem:[#allocation2 + $0x34] sm:$0xf] %vm683_vm14, %v735_v58 }
 0x26c   : > { %v691_v59 = vpop.permute.xlu0 %690  ;;  %v873_v60 = vpop.permute.xlu1 %872 }
 0x26d   : > { %695 = vst.msk [vmem:[#allocation3 + $0x4] sm:$0xf] %vm683_vm14, %v691_v59  ;;  %v843_v61 = vpop.permute.xlu2 %842 }
 0x26e   : > { %878 = vst.msk [vmem:[#allocation2 + $0x38] sm:$0xf] %vm683_vm14, %v873_v60 }
 0x26f   : > { %847 = vst.msk [vmem:[#allocation2 + $0x1c] sm:$0xf] %vm683_vm14, %v843_v61 }
 0x274   : > { %v717_v62 = vpop.permute.xlu0 %716  ;;  %v726_v63 = vpop.permute.xlu1 %725 }
 0x275   : > { %722 = vst.msk [vmem:[#allocation2 + $0x24] sm:$0xf] %vm683_vm14, %v717_v62  ;;  %v867_v0 = vpop.permute.xlu2 %866 }
 0x276   : > { %731 = vst.msk [vmem:[#allocation3 + $0x24] sm:$0xf] %vm683_vm14, %v726_v63 }
 0x277   : > { %871 = vst.msk [vmem:[#allocation3 + $0x2c] sm:$0xf] %vm683_vm14, %v867_v0 }
 0x27c   : > { %v744_v1 = vpop.permute.xlu0 %743  ;;  %v835_v2 = vpop.permute.xlu1 %834 }
 0x27d   : > { %749 = vst.msk [vmem:[#allocation3 + $0x34] sm:$0xf] %vm683_vm14, %v744_v1  ;;  %v881_v3 = vpop.permute.xlu2 %880 }
 0x27e   : > { %839 = vst.msk [vmem:[#allocation3 + $0xc] sm:$0xf] %vm683_vm14, %v835_v2 }
 0x27f   : > { %886 = vst.msk [vmem:[#allocation3 + $0x38] sm:$0xf] %vm683_vm14, %v881_v3 }
 0x284   : > { %v851_v4 = vpop.permute.xlu0 %850  ;;  %v859_v5 = vpop.permute.xlu1 %858 }
 0x285   : > { %855 = vst.msk [vmem:[#allocation3 + $0x1c] sm:$0xf] %vm683_vm14, %v851_v4 }
 0x286   : > { %863 = vst.msk [vmem:[#allocation2 + $0x2c] sm:$0xf] %vm683_vm14, %v859_v5 }
 0x28c   : > { %v875_v6 = vpop.permute.xlu0 %874  ;;  %v883_v7 = vpop.permute.xlu1 %882 }
 0x28d   : > { %879 = vst.msk [vmem:[#allocation2 + $0x3c] sm:$0xf] %vm683_vm14, %v875_v6 }
 0x28e   : > { %887 = vst.msk [vmem:[#allocation3 + $0x3c] sm:$0xf] %vm683_vm14, %v883_v7 }
 0x28f PF: > { %s1826_s28 = sshll.u32 %s2368_s21, 3  ;;  %vm891_vm15 = vcmask 261120   ;;  %v997_v8 = vlaneseq  ;;  %v2404_v15 = vmov 32.0   ;;  %v1936_v27 = vld [vmem:[%s2972_s3 + $0x8] sm:$0xff]  ;;  %v1935_v28 = vld [vmem:[%s2972_s3] sm:$0xff]  ;;  %vm983_vm4 = vcmask 7168  }
 0x290   : > { %s889_s23 = scalar_lea.vmem %s2624_s29, %s1826_s28  ;;  %v999_v9 = vstv %s1826_s28  ;;  %s1938_s14 = sadd.s32 8, %s1826_s28  ;;  %2114 = vrcp.f32 %v2404_v15  ;;  %961 = vmatpush.bf16.msra.mxu0 %v1936_v27  ;;  %v2111_v38 = vld [vmem:[#allocation7] ss:$0 sm:$0xff]  ;;  %v2408_v53 = vmov -1e+30   ;;  %v2409_v54 = vmov 0.0  }
 0x291   : > { %v2717_v10 = vld [vmem:[%s889_s23] sm:$0xff]  ;;  %v998_v11 = vshrl.u32 %v997_v8, 7  ;;  %v2719_v12 = vand.u32 127, %v997_v8  ;;  %s1005_s16 = sadd.s32 15, %s1938_s14  ;;  %s2405_s23 = smov 104   ;;  %984 = vst.msk [vmem:[#allocation4] sm:$0xff] %vm983_vm4, %v2408_v53 }
 0x292   : > { %v892_v13 = vsel %vm891_vm15, %v2717_v10, 0.0  ;;  %p1006_p4 = scmp.lt.s32.totalorder %s1005_s16, 0  ;;  %s1007_s27 = ssub.s32 0, %s1005_s16  ;;  %v2112_v41 = vld [vmem:[%s2971_s2] ss:$0 sm:$0xff]  ;;  %985 = vst.msk [vmem:[#allocation4 + $0x8] sm:$0xff] %vm983_vm4, %v2408_v53 }
 0x293   : > { %v2723_v14 = vadd.s32 %v999_v9, %v998_v11  ;;  %s1837_s30 = smin.u32 %s1007_s27, %s1005_s16  ;;  %893 = vadd.xlane.f32.xlu0 %v892_v13  ;;  %v2113_v45 = vld [vmem:[%s2973_s4] ss:$0 sm:$0xff]  ;;  %s2406_s14 = smov 120   ;;  %986 = vst.msk [vmem:[#allocation4 + $0x10] sm:$0xff] %vm983_vm4, %v2408_v53  ;;  %vm992_vm5 = vcmask 64512  }
 0x294   : > { %s1009_s12 = sshrl.u32 %s1837_s30, 4  ;;  %962 = vmatpush.bf16.msra.mxu0 %v1935_v28  ;;  %s2407_s16 = smov 112   ;;  %987 = vst.msk [vmem:[#allocation4 + $0x18] sm:$0xff] %vm983_vm4, %v2408_v53 }
 0x295   : > { %s1010_s15 = ssub.s32 0, %s1009_s12  ;;  %988 = vst.msk [vmem:[#allocation5] sm:$0xff] %vm983_vm4, %v2409_v54 }
 0x296   : > { %s3044_s15 = smov (!%p1006_p4, %s1010_s15), %s1009_s12  ;;  %v2115_v16 = vpop.eup %2114  ;;  %989 = vst.msk [vmem:[#allocation5 + $0x8] sm:$0xff] %vm983_vm4, %v2409_v54 }
 0x297   : > { %v896_v17 = vmul.f32 32.0, %v2115_v16  ;;  %vm900_vm0 = vweird.f32 %v2115_v16  ;;  %990 = vst.msk [vmem:[#allocation5 + $0x10] sm:$0xff] %vm983_vm4, %v2409_v54  ;;  %p1838_p5 = scmp.le.s32.totalorder %s3044_s15, 0 }
 0x298   : > { %991 = vst.msk [vmem:[#allocation5 + $0x18] sm:$0xff] %vm983_vm4, %v2409_v54  ;;  %s2778_s27 = smov (!%p1838_p5), 0  }
 0x299   : > { %v897_v18 = vsub.f32 1.0, %v896_v17  ;;  %993 = vst.msk [vmem:[#allocation6] sm:$0xff] %vm992_vm5, %v2409_v54 }
 0x29a   : > { %994 = vst.msk [vmem:[#allocation6 + $0x8] sm:$0xff] %vm992_vm5, %v2409_v54 }
 0x29b   : > { %v898_v19 = vmul.f32 %v2115_v16, %v897_v18  ;;  %995 = vst.msk [vmem:[#allocation6 + $0x10] sm:$0xff] %vm992_vm5, %v2409_v54 }
 0x29c   : > { %996 = vst.msk [vmem:[#allocation6 + $0x18] sm:$0xff] %vm992_vm5, %v2409_v54 }
 0x29d   : > { %v899_v21 = vadd.f32 %v2115_v16, %v898_v19 }
 0x29f   : > { %v2727_v22 = vsel %vm900_vm0, %v2115_v16, %v899_v21 }
 0x306   : > { %v894_v20 = vpop.xlane.xlu0 %893 }
 0x307   : > { %v902_v23 = vmul.f32 %v2727_v22, %v894_v20 }
 0x309   : > { %v903_v24 = vsub.f32 %v2717_v10, %v902_v23 }
 0x30b   : > { %v904_v25 = vmul.f32 %v903_v24, %v903_v24 }
 0x30d   : > { %v905_v26 = vsel %vm891_vm15, %v904_v25, 0.0 }
 0x30e   : > { %906 = vadd.xlane.f32.xlu0 %v905_v26 }
 0x381   : > { %v907_v29 = vpop.xlane.xlu0 %906 }
 0x382   : > { %v908_v31 = vmul.f32 %v907_v29, %v2727_v22 }
 0x384   : > { %v909_v30 = vadd.f32 1e-05, %v908_v31 }
 0x386   : > { %2116 = vrsqrt.f32 %v909_v30  ;;  %vm916_vm2 = vweird.f32 %v909_v30 }
 0x38c   : > { %v2117_v32 = vpop.eup %2116 }
 0x38d   : > { %v911_v33 = vmul.f32 %v2117_v32, %v909_v30  ;;  %vm917_vm1 = vweird.f32 %v2117_v32 }
 0x38e   : > { %vm918_vm3 = vmor %vm916_vm2, %vm917_vm1 }
 0x38f   : > { %v912_v34 = vmul.f32 %v2117_v32, %v911_v33 }
 0x391   : > { %v913_v35 = vmul.f32 0.5, %v912_v34 }
 0x393   : > { %v914_v36 = vsub.f32 1.5, %v913_v35 }
 0x395   : > { %v915_v37 = vmul.f32 %v2117_v32, %v914_v36 }
 0x397   : > { %v919_v39 = vsel %vm918_vm3, %v2117_v32, %v915_v37 }
 0x398   : > { %v920_v40 = vmul.f32 %v919_v39, %v903_v24 }
 0x39a   : > { %v925_v42 = vmul.f32 %v2111_v38, %v920_v40 }
 0x39c   : > { %v930_v43 = vadd.f32 %v2112_v41, %v925_v42 }
 0x39e   : > { %v931_v44 = vpack.c.bf16 %v930_v43, %v930_v43 }
 0x3a0   : > { %1835 = vmatmul.msk.bf16.vlgmr.msra.gmra.mxu0 %vm891_vm15, %v931_v44 }
 0x41d   : > { %v964_v46 = vpop.f32.mrf.mxu0 }
 0x41e   : > { %v965_v47 = vadd.f32 %v2113_v45, %v964_v46 }
 0x420   : > { %v2746_v48 = vmul.f32 0.35355338, %v965_v47 }
 0x422   : > { %v979_v49 = vpack.c.bf16 %v2746_v48, %v2746_v48  ;;  %976 = vrot.lane.b32.xlu2 %v2746_v48, %s2405_s23  ;;  %970 = vrot.lane.b32.xlu1 %v2746_v48, %s2406_s14 }
 0x425   : > { %v966_v50 = vpop.f32.mrf.mxu0 }
 0x42a   : > { %973 = vrot.lane.b32.xlu1 %v2746_v48, %s2407_s16 }
 0x47c   : > { %v2753_v51 = vpop.permute.xlu2 %976 }
 0x47d   : > { %v982_v52 = vpack.c.bf16 %v2753_v51, %v2753_v51 }
 0x494   : > { %v2769_v55 = vpop.permute.xlu1 %970 }
 0x495   : > { %v980_v56 = vpack.c.bf16 %v2769_v55, %v2769_v55 }
 0x499   : > { %1726 = sbr.rel (%p1838_p5) target bundleno = 1712 (0x6b0), region = 152 }
 0x49c   : > { %v2773_v57 = vpop.permute.xlu1 %973 }
 0x49d   : > { %v981_v58 = vpack.c.bf16 %v2773_v57, %v2773_v57 }
 0x49e LB: >> { %s1839_s30 = sshll.u32 %s2388_s27, 4  ;;  %v2410_v5 = vmov -1e+30   ;;  %vm1145_vm7 = vcmask 130048   ;;  %v2411_v27 = vmov 0   ;;  %v1141_v28 = vld [vmem:[#allocation4] sm:$0xff]  ;;  %s2388_s27 = sphi %s2778_s27, %s1015_s27  }
 0x49f   : >> { %s2784_s12 = sshra.s32 %s1839_s30, 3  ;;  %v1041_v3 = vstv %s1839_s30  ;;  %2119 = vset.pattern.permute.xlu0 %v2411_v27  ;;  %2118 = vset.pattern.permute.xlu2 %v2411_v27  ;;  %v1143_v32 = vld [vmem:[#allocation4 + $0x10] sm:$0xff]  ;;  %v1142_v33 = vld [vmem:[#allocation4 + $0x8] sm:$0xff]  ;;  %v1144_v42 = vld [vmem:[#allocation4 + $0x18] sm:$0xff]  ;;  %s1015_s27 = sadd.s32 1, %s2388_s27  }
 0x4a0   : >> { %s1840_s29 = sshll.u32 %s2784_s12, 2  ;;  %v1042_v4 = vadd.s32 %v1041_v3, %v2719_v12  ;;  %2120 = vset.pattern.permute.xlu1 %v2411_v27  ;;  %p1014_p6 = scmp.ge.s32.totalorder %s1015_s27, %s3044_s15 }
 0x4a1   : >> { %s1022_s26 = scalar_lea.vmem [#allocation2], %s1840_s29  ;;  %s1032_s18 = scalar_lea.vmem [#allocation3], %s1840_s29 }
 0x4a2   : >> { %v1939_v59 = vld [vmem:[%s1022_s26] sm:$0xff]  ;;  %v1940_v60 = vld [vmem:[%s1022_s26 + $0x10] sm:$0xff]  ;;  %vm1043_vm6 = vcmp.le.s32.totalorder %v1042_v4, %v2723_v14 }
 0x4a3   : >> { %v1941_v61 = vld [vmem:[%s1022_s26 + $0x20] sm:$0xff]  ;;  %v1942_v62 = vld [vmem:[%s1022_s26 + $0x30] sm:$0xff]  ;;  %v1054_v63 = vsel %vm992_vm5, %v1939_v59, 0  ;;  %v1078_v0 = vsel %vm992_vm5, %v1940_v60, 0  ;;  %v1044_v6 = vsel %vm1043_vm6, 0.0, %v2410_v5 }
 0x4a4   : >> { %v1102_v1 = vsel %vm992_vm5, %v1941_v61, 0  ;;  %1063 = vmatpush.bf16.xpose.msra.mxu0 %v1054_v63  ;;  %1087 = vmatpush.bf16.xpose.msra.mxu1 %v1078_v0  ;;  %v1126_v2 = vsel %vm992_vm5, %v1942_v62, 0  ;;  %v1945_v60 = vld [vmem:[%s1032_s18 + $0x20] sm:$0xff]  ;;  %v1946_v61 = vld [vmem:[%s1032_s18 + $0x30] sm:$0xff] }
 0x4a5   : >> { %1111 = vmatpush.bf16.xpose.msra.mxu2 %v1102_v1  ;;  %1135 = vmatpush.bf16.xpose.msra.mxu3 %v1126_v2  ;;  %v1943_v62 = vld [vmem:[%s1032_s18] sm:$0xff]  ;;  %v1944_v63 = vld [vmem:[%s1032_s18 + $0x10] sm:$0xff] }
 0x4ab   : >> { %1846 = vmatmul.msk.bf16.vlgmr.msra.gmra.mxu0 %vm992_vm5, %v979_v49  ;;  %1851 = vmatmul.msk.bf16.vlgmr.msra.gmra.mxu1 %vm992_vm5, %v980_v56 }
 0x4ac   : >> { %1856 = vmatmul.msk.bf16.vlgmr.msra.gmra.mxu2 %vm992_vm5, %v981_v58  ;;  %1861 = vmatmul.msk.bf16.vlgmr.msra.gmra.mxu3 %vm992_vm5, %v982_v52 }
 0x4ad   : >> { %1326 = vmatpush.bf16.msrb.mxu2 %v1945_v60  ;;  %1348 = vmatpush.bf16.msrb.mxu3 %v1946_v61  ;;  %v1207_v60 = vld [vmem:[#allocation5 + $0x8] sm:$0xff] }
 0x4ae   : >> { %1282 = vmatpush.bf16.msrb.mxu0 %v1943_v62  ;;  %1304 = vmatpush.bf16.msrb.mxu1 %v1944_v63 }
 0x528   : >> { %v1065_v7 = vpop.f32.mrf.mxu0  ;;  %v1089_v8 = vpop.f32.mrf.mxu1 }
 0x529   : >> { %v2811_v9 = vadd.f32 %v1065_v7, %v1044_v6  ;;  %v2815_v13 = vadd.f32 %v1089_v8, %v1044_v6 }
 0x52b   : >> { %v1146_v11 = vsel %vm1145_vm7, %v2811_v9, -inf  ;;  %v1149_v21 = vsel %vm1145_vm7, %v2815_v13, -inf }
 0x52c   : >> { %1147 = vmax.xlane.f32.xlu1 %v1146_v11 }
 0x52f   : >> { %v1113_v15 = vpop.f32.mrf.mxu2  ;;  %v1137_v16 = vpop.f32.mrf.mxu3 }
 0x530   : >> { %v2817_v17 = vadd.f32 %v1113_v15, %v1044_v6  ;;  %v1067_v18 = vpop.f32.mrf.mxu0  ;;  %v1091_v19 = vpop.f32.mrf.mxu1  ;;  %v2823_v23 = vadd.f32 %v1137_v16, %v1044_v6 }
 0x532   : >> { %v1152_v20 = vsel %vm1145_vm7, %v2817_v17, -inf  ;;  %v1155_v26 = vsel %vm1145_vm7, %v2823_v23, -inf }
 0x533   : >> { %1153 = vmax.xlane.f32.xlu0 %v1152_v20 }
 0x534   : >> { %1150 = vmax.xlane.f32.xlu1 %v1149_v21 }
 0x537   : >> { %v1115_v24 = vpop.f32.mrf.mxu2  ;;  %v1139_v25 = vpop.f32.mrf.mxu3 }
 0x53b   : >> { %1156 = vmax.xlane.f32.xlu0 %v1155_v26 }
 0x59f   : >> { %v1148_v29 = vpop.xlane.xlu1 %1147 }
 0x5a0   : >> { %v1158_v31 = vmax.f32 %v1141_v28, %v1148_v29 }
 0x5a2   : >> { %1362 = vst.msk [vmem:[#allocation4] sm:$0xff] %vm983_vm4, %v1158_v31  ;;  %1176 = vperm.xlu0 %2119, %v1158_v31   ;;  %v1162_v30 = vsub.f32 %v1141_v28, %v1158_v31 }
 0x5a4   : >> { %v1166_v35 = vmul.f32 1.442695, %v1162_v30 }
 0x5a6   : >> { %v1154_v34 = vpop.xlane.xlu0 %1153  ;;  %2121 = vpow2.f32 %v1166_v35 }
 0x5a7   : >> { %v1160_v36 = vmax.f32 %v1143_v32, %v1154_v34  ;;  %v1151_v37 = vpop.xlane.xlu1 %1150 }
 0x5a8   : >> { %v1159_v38 = vmax.f32 %v1142_v33, %v1151_v37 }
 0x5a9   : >> { %v1164_v39 = vsub.f32 %v1143_v32, %v1160_v36  ;;  %1364 = vst.msk [vmem:[#allocation4 + $0x10] sm:$0xff] %vm983_vm4, %v1160_v36  ;;  %1186 = vperm.xlu2 %2118, %v1160_v36   ;;  %v1209_v36 = vld [vmem:[#allocation5 + $0x18] sm:$0xff] }
 0x5aa   : >> { %1363 = vst.msk [vmem:[#allocation4 + $0x8] sm:$0xff] %vm983_vm4, %v1159_v38  ;;  %1181 = vperm.xlu1 %2120, %v1159_v38   ;;  %v1163_v41 = vsub.f32 %v1142_v33, %v1159_v38 }
 0x5ab   : >> { %v1170_v40 = vmul.f32 1.442695, %v1164_v39 }
 0x5ac   : >> { %v1168_v44 = vmul.f32 1.442695, %v1163_v41  ;;  %v2830_v46 = vpop.eup %2121  ;;  %v1206_v41 = vld [vmem:[#allocation5] sm:$0xff] }
 0x5ad   : >> { %2123 = vpow2.f32 %v1170_v40  ;;  %v1236_v40 = vld [vmem:[#allocation6 + $0x10] sm:$0xff] }
 0x5ae   : >> { %v1157_v43 = vpop.xlane.xlu0 %1156  ;;  %2125 = vpow2.f32 %v1168_v44 }
 0x5af   : >> { %v1161_v45 = vmax.f32 %v1144_v42, %v1157_v43  ;;  %v1210_v43 = vmul.f32 %v2830_v46, %v1206_v41 }
 0x5b1   : >> { %v1165_v47 = vsub.f32 %v1144_v42, %v1161_v45  ;;  %1365 = vst.msk [vmem:[#allocation4 + $0x18] sm:$0xff] %vm983_vm4, %v1161_v45  ;;  %1191 = vperm.xlu2 %2118, %v1161_v45  }
 0x5b2   : >> { %1240 = vperm.xlu1 %2120, %v2830_v46  }
 0x5b3   : >> { %v2124_v50 = vpop.eup %2123  ;;  %v1172_v53 = vmul.f32 1.442695, %v1165_v47 }
 0x5b4   : >> { %1250 = vperm.xlu0 %2119, %v2124_v50   ;;  %v2834_v54 = vpop.eup %2125 }
 0x5b5   : >> { %2127 = vpow2.f32 %v1172_v53  ;;  %v1237_v53 = vld [vmem:[#allocation6 + $0x18] sm:$0xff] }
 0x5ba   : >> { %1245 = vperm.xlu1 %2120, %v2834_v54  }
 0x5bb   : >> { %v2128_v59 = vpop.eup %2127 }
 0x5bc   : >> { %v1213_v37 = vmul.f32 %v2128_v59, %v1209_v36 }
 0x5c2   : >> { %1255 = vperm.xlu1 %2120, %v2128_v59   ;;  %v1234_v59 = vld [vmem:[#allocation6] sm:$0xff] }
 0x603   : >> { %v1187_v0 = vpop.permute.xlu2 %1186 }
 0x604   : >> { %v1196_v1 = vsub.f32 %v2817_v17, %v1187_v0  ;;  %v1211_v0 = vmul.f32 %v2834_v54, %v1207_v60 }
 0x606   : >> { %v1202_v2 = vmul.f32 1.442695, %v1196_v1 }
 0x608   : >> { %2129 = vpow2.f32 %v1202_v2 }
 0x60b   : >> { %v1192_v3 = vpop.permute.xlu2 %1191 }
 0x60c   : >> { %v1197_v4 = vsub.f32 %v2823_v23, %v1192_v3 }
 0x60e   : >> { %v2130_v5 = vpop.eup %2129  ;;  %v1204_v6 = vmul.f32 1.442695, %v1197_v4 }
 0x60f   : >> { %v1220_v7 = vsel %vm1145_vm7, %v2130_v5, 0.0  ;;  %v1264_v8 = vpack.c.bf16 %v2130_v5, %v2130_v5 }
 0x610   : >> { %2131 = vpow2.f32 %v1204_v6  ;;  %1221 = vadd.xlane.f32.xlu0 %v1220_v7  ;;  %v1235_v6 = vld [vmem:[#allocation6 + $0x8] sm:$0xff] }
 0x611   : >> { %1876 = vmatmul.msk.bf16.vlgmr.msrb.gmra.mxu2 %vm1145_vm7, %v1264_v8 }
 0x614   : >> { %v1177_v11 = vpop.permute.xlu0 %1176 }
 0x615   : >> { %v1194_v15 = vsub.f32 %v2811_v9, %v1177_v11 }
 0x616   : >> { %v2132_v16 = vpop.eup %2131 }
 0x617   : >> { %v1198_v18 = vmul.f32 1.442695, %v1194_v15  ;;  %v1223_v17 = vsel %vm1145_vm7, %v2132_v16, 0.0  ;;  %v1265_v19 = vpack.c.bf16 %v2132_v16, %v2132_v16 }
 0x618   : >> { %1224 = vadd.xlane.f32.xlu1 %v1223_v17 }
 0x619   : >> { %2133 = vpow2.f32 %v1198_v18  ;;  %1881 = vmatmul.msk.bf16.vlgmr.msrb.gmra.mxu3 %vm1145_vm7, %v1265_v19 }
 0x61c   : >> { %v1182_v21 = vpop.permute.xlu1 %1181 }
 0x61d   : >> { %v1195_v20 = vsub.f32 %v2815_v13, %v1182_v21  ;;  %v1208_v13 = vld [vmem:[#allocation5 + $0x10] sm:$0xff] }
 0x61e   : >> { %v1212_v32 = vmul.f32 %v2124_v50, %v1208_v13 }
 0x61f   : >> { %v2134_v23 = vpop.eup %2133  ;;  %v1200_v24 = vmul.f32 1.442695, %v1195_v20 }
 0x620   : >> { %v1214_v25 = vsel %vm1145_vm7, %v2134_v23, 0.0  ;;  %v1262_v26 = vpack.c.bf16 %v2134_v23, %v2134_v23 }
 0x621   : >> { %2135 = vpow2.f32 %v1200_v24  ;;  %1215 = vadd.xlane.f32.xlu2 %v1214_v25 }
 0x622   : >> { %1866 = vmatmul.msk.bf16.vlgmr.msrb.gmra.mxu0 %vm1145_vm7, %v1262_v26 }
 0x624   : >> { %v1241_v29 = vpop.permute.xlu1 %1240 }
 0x625   : >> { %v1258_v3 = vmul.f32 %v1241_v29, %v1234_v59 }
 0x626   : >> { %v1251_v30 = vpop.permute.xlu0 %1250 }
 0x627   : >> { %v2136_v9 = vpop.eup %2135  ;;  %v1260_v42 = vmul.f32 %v1251_v30, %v1236_v40 }
 0x628   : >> { %v1217_v27 = vsel %vm1145_vm7, %v2136_v9, 0.0  ;;  %v1263_v28 = vpack.c.bf16 %v2136_v9, %v2136_v9 }
 0x629   : >> { %1218 = vadd.xlane.f32.xlu2 %v1217_v27 }
 0x62a   : >> { %1871 = vmatmul.msk.bf16.vlgmr.msrb.gmra.mxu1 %vm1145_vm7, %v1263_v28 }
 0x62c   : >> { %v1246_v31 = vpop.permute.xlu1 %1245 }
 0x62d   : >> { %v1259_v8 = vmul.f32 %v1246_v31, %v1235_v6 }
 0x634   : >> { %v1256_v33 = vpop.permute.xlu1 %1255 }
 0x635   : >> { %v1261_v61 = vmul.f32 %v1256_v33, %v1237_v53 }
 0x683   : >> { %v1222_v34 = vpop.xlane.xlu0 %1221 }
 0x684   : >> { %v1228_v35 = vadd.f32 %v1222_v34, %v1212_v32 }
 0x686   : >> { %1232 = vst.msk [vmem:[#allocation5 + $0x10] sm:$0xff] %vm983_vm4, %v1228_v35 }
 0x68b   : >> { %v1225_v38 = vpop.xlane.xlu1 %1224 }
 0x68c   : >> { %v1229_v39 = vadd.f32 %v1225_v38, %v1213_v37 }
 0x68e   : >> { %1233 = vst.msk [vmem:[#allocation5 + $0x18] sm:$0xff] %vm983_vm4, %v1229_v39 }
 0x694   : >> { %v1328_v44 = vpop.f32.mrf.mxu2  ;;  %v1216_v45 = vpop.xlane.xlu2 %1215 }
 0x695   : >> { %v1356_v47 = vadd.f32 %v1328_v44, %v1260_v42  ;;  %v1226_v50 = vadd.f32 %v1216_v45, %v1210_v43 }
 0x697   : >> { %1360 = vst.msk [vmem:[#allocation6 + $0x10] sm:$0xff] %vm992_vm5, %v1356_v47 }
 0x698   : >> { %1230 = vst.msk [vmem:[#allocation5] sm:$0xff] %vm983_vm4, %v1226_v50 }
 0x69c   : >> { %v1330_v62 = vpop.f32.mrf.mxu2  ;;  %v1350_v63 = vpop.f32.mrf.mxu3 }
 0x69d   : >> { %v1357_v1 = vadd.f32 %v1350_v63, %v1261_v61  ;;  %v1219_v2 = vpop.xlane.xlu2 %1218 }
 0x69e   : >> { %v1227_v46 = vadd.f32 %v1219_v2, %v1211_v0 }
 0x69f   : >> { %1361 = vst.msk [vmem:[#allocation6 + $0x18] sm:$0xff] %vm992_vm5, %v1357_v1  ;;  %v1284_v4 = vpop.f32.mrf.mxu0 }
 0x6a0   : >> { %1231 = vst.msk [vmem:[#allocation5 + $0x8] sm:$0xff] %vm983_vm4, %v1227_v46  ;;  %v1354_v5 = vadd.f32 %v1284_v4, %v1258_v3 }
 0x6a2   : >> { %1358 = vst.msk [vmem:[#allocation6] sm:$0xff] %vm992_vm5, %v1354_v5 }
 0x6a4   : >> { %v1352_v7 = vpop.f32.mrf.mxu3 }
 0x6a7   : >> { %v1286_v11 = vpop.f32.mrf.mxu0  ;;  %v1306_v15 = vpop.f32.mrf.mxu1 }
 0x6a8   : >> { %v1355_v16 = vadd.f32 %v1306_v15, %v1259_v8 }
 0x6aa   : >> { %1359 = vst.msk [vmem:[#allocation6 + $0x8] sm:$0xff] %vm992_vm5, %v1355_v16 }
 0x6ab   : > { %1017 = sbr.rel (!%p1014_p6) target bundleno = 1182 (0x49e), region = 158 }
 0x6af   : >> { %v1308_v54 = vpop.f32.mrf.mxu1 }
 0x6b0 PF: > { %v1369_v18 = vld [vmem:[#allocation5 + $0x18] sm:$0xff]  ;;  %v1366_v17 = vld [vmem:[#allocation5] sm:$0xff]  ;;  %v2412_v19 = vmov 0   ;;  %v1367_v21 = vld [vmem:[#allocation5 + $0x8] sm:$0xff]  ;;  %vm1397_vm8 = vcmask 1043456   ;;  %s3019_s5 = sld [smem:[#allocation31_spill]] }
 0x6b1   : > { %2138 = vset.pattern.permute.xlu1 %v2412_v19  ;;  %2137 = vset.pattern.permute.xlu0 %v2412_v19  ;;  %2144 = vrcp.f32 %v1369_v18  ;;  %v1368_v20 = vld [vmem:[#allocation5 + $0x10] sm:$0xff]  ;;  %v1474_v48 = vld [vmem:[#allocation12 + $0xc] sm:$0xf]  ;;  %v1443_v49 = vld [vmem:[#allocation12 + $0x8] sm:$0xf]  ;;  %s3020_s25 = sld [smem:[#allocation32_spill]] }
 0x6b2   : > { %2146 = vrcp.f32 %v1366_v17  ;;  %v1382_v12 = vld [vmem:[#allocation12] sm:$0xf]  ;;  %v1479_v51 = vsel %vm1397_vm8, %v1474_v48, 0  ;;  %v1448_v52 = vsel %vm1397_vm8, %v1443_v49, 0  ;;  %v1393_v55 = vld [vmem:[#allocation12 + $0x4] sm:$0xf] }
 0x6b3   : > { %2148 = vrcp.f32 %v1367_v21  ;;  %v1418_v14 = vsel %vm1397_vm8, %v1382_v12, 0  ;;  %1488 = vmatpush.bf16.msra.mxu3 %v1479_v51  ;;  %v1399_v56 = vsel %vm1397_vm8, %v1393_v55, 0  ;;  %v1465_v57 = vld [vmem:[#allocation6 + $0x18] sm:$0xff]  ;;  %v1374_v58 = vld [vmem:[#allocation6] sm:$0xff]  ;;  %v1384_v13 = vld [vmem:[#allocation6 + $0x8] sm:$0xff]  ;;  %s3021_s12 = sld [smem:[#allocation33_spill]] }
 0x6b4   : > { %2150 = vrcp.f32 %v1368_v20  ;;  %1427 = vmatpush.bf16.msra.mxu2 %v1418_v14  ;;  %1408 = vmatpush.bf16.msra.mxu0 %v1399_v56  ;;  %v1434_v35 = vld [vmem:[#allocation6 + $0x10] sm:$0xff]  ;;  %v2139_v60 = vld [vmem:[%s2977_s8] ss:$0 sm:$0xff]  ;;  %v1947_v5 = vld [vmem:[#allocation13] sm:$0xff]  ;;  %s1928_s29 = sshll.u32 %s2372_s22, 2  ;;  %s3022_s20 = sld [smem:[#allocation34_spill]] }
 0x6b5   : > { %v1948_v4 = vld [vmem:[#allocation13 + $0x8] sm:$0xff]  ;;  %v1953_v16 = vld [vmem:[%s2982_s13 + $0x20] sm:$0xff]  ;;  %s1666_s26 = sadd.s32 %s2368_s21, %s1928_s29  ;;  %s3024_s23 = sld [smem:[#allocation35_spill]] }
 0x6b6   : > { %v1955_v8 = vld [vmem:[%s2982_s13 + $0x30] sm:$0xff]  ;;  %v1954_v15 = vld [vmem:[%s2982_s13 + $0x28] sm:$0xff]  ;;  %s1929_s18 = sshll.u32 %s1666_s26, 3  ;;  %s1670_s27 = sshll.u32 %s566_s17, 4  ;;  %s1671_s27 = int_to_ptr.vmem [resolvable:$true] %s1670_s27 }
 0x6b7   : > { %v2145_v23 = vpop.eup %2144  ;;  %v1951_v21 = vld [vmem:[%s2982_s13 + $0x10] sm:$0xff]  ;;  %v2141_v12 = vld [vmem:[%s3020_s25] ss:$0 sm:$0xff]  ;;  %v1950_v51 = vld [vmem:[%s2982_s13 + $0x8] sm:$0xff]  ;;  %s1656_s21 = scalar_lea.sflag [#allocation9], %s564_s9 }
 0x6b8   : > { %v2147_v24 = vpop.eup %2146  ;;  %1468 = vperm.xlu1 %2138, %v2145_v23   ;;  %1457 = vmatpush.bf16.msrb.mxu2 %v1448_v52  ;;  %v1949_v52 = vld [vmem:[%s2982_s13] sm:$0xff] }
 0x6b9   : > { %1377 = vperm.xlu0 %2137, %v2147_v24   ;;  %v2149_v25 = vpop.eup %2148  ;;  %1563 = vmatpush.bf16.msrb.mxu0 %v1948_v4  ;;  %v2140_v24 = vld [vmem:[%s3019_s5] ss:$0 sm:$0xff] }
 0x6ba   : > { %v2151_v26 = vpop.eup %2150  ;;  %v2142_v55 = vld [vmem:[%s3021_s12] ss:$0 sm:$0xff] }
 0x6bb   : > { %s3025_s14 = smov %s3024_s23  ;;  %s1668_s16 = scalar_lea.hbm %s3024_s23, %s1929_s18 }
 0x6bc   : > { %s1672_s30 = sshll.u32 %s1668_s16, 4  ;;  %s2294_s18 = scalar_lea.hbm %s3025_s14, 64  ;;  %s1673_s30 = int_to_ptr.hbm [resolvable:$true] %s1672_s30 }
 0x6bd   : > { %1564 = vmatpush.bf16.msrb.mxu0 %v1947_v5  ;;  %s2288_s22 = sshra.s32 %s1673_s30, 4  ;;  %s2289_s22 = int_to_ptr.hbm [resolvable:$true] %s2288_s22 }
 0x6be   : > { %s2290_s12 = scalar_lea.hbm %s2289_s22, 8  ;;  %p2295_p11 = scmp.lt.s32.totalorder %s2289_s22, %s3025_s14 }
 0x6bf   : > { %p2291_p7 = scmp.ne.s32.totalorder %s2289_s22, %s2290_s12  ;;  %p2296_p12 = scmp.lt.s32.totalorder %s2294_s18, %s2290_s12 }
 0x6c0   : > { %1387 = vperm.xlu1 %2138, %v2149_v25  }
 0x6c1   : > { %1437 = vperm.xlu0 %2137, %v2151_v26   ;;  %p2292_p9 = pnand %p2291_p7, %p2545_p3  ;;  %p2297_p13 = por %p2296_p12, %p2295_p11 }
 0x6c3   : > { %p2293_p10 = pneg %p2292_p9 }
 0x6c5   : > { %p2298_p0 = pnand %p2297_p13, %p2293_p10 }
 0x72a   : > { %v1469_v9 = vpop.permute.xlu1 %1468 }
 0x72b   : > { %v1471_v27 = vmul.f32 %v1469_v9, %v1465_v57  ;;  %v1378_v28 = vpop.permute.xlu0 %1377 }
 0x72c   : > { %v1380_v29 = vmul.f32 %v1378_v28, %v1374_v58  ;;  %v2143_v28 = vld [vmem:[%s3022_s20] ss:$0 sm:$0xff] }
 0x72d   : > { %v1472_v31 = vpack.c.bf16 %v1471_v27, %v1471_v27 }
 0x72e   : > { %v1381_v30 = vpack.c.bf16 %v1380_v29, %v1380_v29 }
 0x72f   : > { %1885 = vmatmul.msk.bf16.vlgmr.msra.gmra.mxu3 %vm992_vm5, %v1472_v31 }
 0x730   : > { %1883 = vmatmul.msk.bf16.vlgmr.msra.gmra.mxu2 %vm992_vm5, %v1381_v30 }
 0x732   : > { %v1388_v32 = vpop.permute.xlu1 %1387 }
 0x733   : > { %v1390_v33 = vmul.f32 %v1388_v32, %v1384_v13  ;;  %v1438_v36 = vpop.permute.xlu0 %1437 }
 0x734   : > { %v1440_v37 = vmul.f32 %v1438_v36, %v1434_v35 }
 0x735   : > { %v1391_v34 = vpack.c.bf16 %v1390_v33, %v1390_v33 }
 0x736   : > { %v1441_v38 = vpack.c.bf16 %v1440_v37, %v1440_v37 }
 0x737   : > { %1882 = vmatmul.msk.bf16.vlgmr.msra.gmra.mxu0 %vm992_vm5, %v1391_v34 }
 0x740   : > { %1884 = vmatmul.msk.bf16.vlgmr.msrb.gmra.mxu2 %vm992_vm5, %v1441_v38 }
 0x7b2   : > { %v1490_v39 = vpop.f32.mrf.mxu3 }
 0x7b3   : > { %v1429_v40 = vpop.f32.mrf.mxu2 }
 0x7b4   : > { %v1410_v41 = vpop.f32.mrf.mxu0 }
 0x7b5   : > { %v1430_v45 = vadd.f32 %v1429_v40, %v1410_v41 }
 0x7ba   : > { %v1492_v42 = vpop.f32.mrf.mxu3 }
 0x7bb   : > { %v1431_v43 = vpop.f32.mrf.mxu2 }
 0x7bc   : > { %v1412_v44 = vpop.f32.mrf.mxu0 }
 0x7c3   : > { %v1459_v47 = vpop.f32.mrf.mxu2 }
 0x7c4   : > { %v1463_v50 = vadd.f32 %v1459_v47, %v1430_v45 }
 0x7c6   : > { %v1494_v53 = vadd.f32 %v1490_v39, %v1463_v50 }
 0x7c8   : > { %v1495_v59 = vadd.f32 %v1494_v53, %v2717_v10  ;;  %v1956_v10 = vld [vmem:[%s2982_s13 + $0x38] sm:$0xff] }
 0x7c9   : > { %1640 = vmatpush.bf16.msra.mxu1 %v1956_v10 }
 0x7ca   : > { %v2873_v61 = vadd.f32 %v2139_v60, %v1495_v59 }
 0x7cb   : > { %v1461_v62 = vpop.f32.mrf.mxu2 }
 0x7cc   : > { %v1501_v63 = vsel %vm891_vm15, %v2873_v61, 0.0 }
 0x7cd   : > { %1502 = vadd.xlane.f32.xlu2 %v1501_v63  ;;  %1641 = vmatpush.bf16.msra.mxu1 %v1955_v8 }
 0x7d1   : > { %1642 = vmatpush.bf16.msra.mxu1 %v1954_v15 }
 0x7d5   : > { %1643 = vmatpush.bf16.msra.mxu1 %v1953_v16 }
 0x840   : > { %v1503_v0 = vpop.xlane.xlu2 %1502 }
 0x841   : > { %v1504_v1 = vmul.f32 %v1503_v0, %v2727_v22 }
 0x843   : > { %v1505_v2 = vsub.f32 %v2873_v61, %v1504_v1 }
 0x845   : > { %v1506_v3 = vmul.f32 %v1505_v2, %v1505_v2 }
 0x847   : > { %v1507_v46 = vsel %vm891_vm15, %v1506_v3, 0.0 }
 0x848   : > { %1508 = vadd.xlane.f32.xlu2 %v1507_v46 }
 0x8bb   : > { %v1509_v6 = vpop.xlane.xlu2 %1508 }
 0x8bc   : > { %v1510_v7 = vmul.f32 %v1509_v6, %v2727_v22  ;;  %v1952_v22 = vld [vmem:[%s2982_s13 + $0x18] sm:$0xff] }
 0x8bd   : > { %1644 = vmatpush.bf16.msra.mxu1 %v1952_v22 }
 0x8be   : > { %v1511_v11 = vadd.f32 1e-05, %v1510_v7 }
 0x8c0   : > { %2152 = vrsqrt.f32 %v1511_v11  ;;  %vm1518_vm10 = vweird.f32 %v1511_v11 }
 0x8c1   : > { %1645 = vmatpush.bf16.msra.mxu1 %v1951_v21 }
 0x8c5   : > { %1646 = vmatpush.bf16.msra.mxu1 %v1950_v51 }
 0x8c6   : > { %v2153_v54 = vpop.eup %2152 }
 0x8c7   : > { %v1513_v18 = vmul.f32 %v2153_v54, %v1511_v11  ;;  %vm1519_vm9 = vweird.f32 %v2153_v54 }
 0x8c8   : > { %vm1520_vm11 = vmor %vm1518_vm10, %vm1519_vm9 }
 0x8c9   : > { %v1514_v17 = vmul.f32 %v2153_v54, %v1513_v18  ;;  %1647 = vmatpush.bf16.msra.mxu1 %v1949_v52 }
 0x8cb   : > { %v1515_v19 = vmul.f32 0.5, %v1514_v17 }
 0x8cd   : > { %v1516_v20 = vsub.f32 1.5, %v1515_v19 }
 0x8cf   : > { %v1517_v23 = vmul.f32 %v2153_v54, %v1516_v20 }
 0x8d1   : > { %v1521_v25 = vsel %vm1520_vm11, %v2153_v54, %v1517_v23 }
 0x8d2   : > { %v1522_v26 = vmul.f32 %v1521_v25, %v1505_v2 }
 0x8d4   : > { %v1527_v14 = vmul.f32 %v2140_v24, %v1522_v26 }
 0x8d6   : > { %v1532_v48 = vadd.f32 %v2141_v12, %v1527_v14 }
 0x8d8   : > { %v1533_v49 = vpack.c.bf16 %v1532_v48, %v1532_v48 }
 0x8da   : > { %1894 = vmatmul.msk.bf16.vlgmr.msrb.gmra.mxu0 %vm891_vm15, %v1533_v49 }
 0x957   : > { %v1566_v56 = vpop.f32.mrf.mxu0 }
 0x958   : > { %v1567_v57 = vadd.f32 %v2142_v55, %v1566_v56 }
 0x95a   : > { %v1570_v58 = vmax.f32 %v1567_v57, 0.0 }
 0x95c   : > { %v1571_v9 = vpack.c.bf16 %v1570_v58, %v1570_v58 }
 0x95e   : > { %1648 = vmatmul.bf16.vlgmr.msra.gmra.mxu1 %v1571_v9 }
 0x95f   : > { %v1568_v27 = vpop.f32.mrf.mxu0 }
 0x9db   : > { %v1649_v29 = vpop.f32.mrf.mxu1 }
 0x9dc   : > { %v1650_v31 = vadd.f32 %v2143_v28, %v1649_v29 }
 0x9de   : > { %v1653_v30 = vadd.f32 %v1650_v31, %v2873_v61 }
 0x9e0   : > { %1654 = vst.msk [vmem:[%s566_s17] sm:$0xff] %vm891_vm15, %v1653_v30 }
 0x9e1   : > { %2301 = shalt.err (!%p2298_p0)
}
 0x9e2   : > { %1973 = dma.vmem_to_hbm [thread:$0]  (%p2545_p3), %s1671_s27, 128, %s1673_s30, %s1656_s21  }
 0x9e3   : > { %v1651_v13 = vpop.f32.mrf.mxu1 }
 0x9e4 PF: > { %s3026_s9 = sld [smem:[#allocation24_spill]] }
 0x9e5   : > { %s3027_s10 = sld [smem:[#allocation20_spill]] }
 0x9ea   : > { %p2000_p1 = scmp.ge.s32.totalorder %s3026_s9, 2 }
 0x9eb   : > { %s1684_s20 = sand.u32 1, %s3027_s10  }
 0x9ec   : > { %p1989_p2 = pnand %p2000_p1, %p2554_p8  ;;  %s1685_s25 = scalar_lea.sflag [#allocation9], %s1684_s20 }
 0x9ee   : > { %p1990_p4 = pneg %p1989_p2 }
 0x9f0   : > { %2351 = dma.done.wait (%p1990_p4), %s1685_s25, 128  }
 0x9f1   : > { %2353 = vsyncadd (%p1990_p4), %s1685_s25, 4294967168  ;;  %s31_s25 = sadd.s32 1, %s3026_s9   ;;  %s3029_s28 = sld [smem:[#allocation21_spill]] }
 0x9f2   : > { %p28_p5 = scmp.ge.s32.totalorder %s31_s25, 10   ;;  %s3030_s20 = sld [smem:[#allocation29_spill]] }
 0x9f3   : > { %s3031_s21 = sld [smem:[#allocation22_spill]]  ;;  %s3035_s18 = smov %s2360_s19 }
 0x9f4   : > { %s3032_s22 = sld [smem:[#allocation23_spill]]  ;;  %30 = sbr.rel (!%p28_p5) target bundleno = 15 (0xf), region = 169 }
 0x9f5   : > { %s3033_s23 = sld [smem:[#allocation25_spill]] }
 0x9f6   : > { %s3034_s24 = sld [smem:[#allocation27_spill]] }
 0x9f7   : > { %s3036_s19 = smov %s3029_s28 }
 0x9f9   :  { %1691 = vsyncpa [#allocation8], 1 }
 0x9fa   :  { %1693 = vsyncpa [#allocation8 + $0x1], 1 }
 0x9fb   :  { %1694 = vsyncpa [#allocation11], 1 }
 0x9fc   :  { %1695 = vsyncpa [#allocation14], 1 }
 0x9fd   :  { %1696 = vsyncpa [#allocation9], 1 }
 0x9fe   :  { %1698 = vsyncpa [#allocation9 + $0x1], 1 }

// kernel: tpu_custom_call.1
= control target key start
LH: loop header
LB: loop body
LE: loop exit
PB: predicated region body
PF: predicated region fallthrough
CT: control target
= control target key end

     0   :  { %s2967_s0 = inlined_call_operand.vmem [shape: f32[2,32,32], index: 0, kind: input, shape index: {}]   ;;  %s2968_s1 = inlined_call_operand.hbm [shape: f32[1,32], index: 1, kind: input, shape index: {}]   ;;  %s2969_s2 = inlined_call_operand.vmem [shape: f32[1,32], index: 2, kind: input, shape index: {}]   ;;  %s2970_s3 = inlined_call_operand.vmem [shape: bf16[32,32], index: 3, kind: input, shape index: {}]   ;;  %s2971_s4 = inlined_call_operand.vmem [shape: f32[1,32], index: 4, kind: input, shape index: {}]   ;;  %s2972_s5 = inlined_call_operand.hbm [shape: bf16[32,64], index: 5, kind: input, shape index: {}]   ;;  %s2973_s6 = inlined_call_operand.vmem [shape: f32[1,64], index: 6, kind: input, shape index: {}]   ;;  %s2974_s7 = inlined_call_operand.hbm [shape: bf16[4,8,32], index: 7, kind: input, shape index: {}]   ;;  %s2975_s8 = inlined_call_operand.vmem [shape: f32[1,32], index: 8, kind: input, shape index: {}]   ;;  %s2976_s9 = inlined_call_operand.vmem [shape: f32[1,32], index: 9, kind: input, shape index: {}]   ;;  %s2977_s10 = inlined_call_operand.vmem [shape: f32[1,32], index: 10, kind: input, shape index: {}]   ;;  %s2978_s11 = inlined_call_operand.hbm [shape: bf16[32,128], index: 11, kind: input, shape index: {}]   ;;  %s2979_s12 = inlined_call_operand.vmem [shape: f32[1,128], index: 12, kind: input, shape index: {}]   ;;  %s2980_s13 = inlined_call_operand.vmem [shape: bf16[128,32], index: 13, kind: input, shape index: {}]   ;;  %s2981_s14 = inlined_call_operand.vmem [shape: f32[1,32], index: 14, kind: input, shape index: {}]   ;;  %s2982_s15 = inlined_call_operand.hbm [shape: f32[2,32,32], index: 15, kind: output, shape index: {}]  }
   0x1   :  { %2995 = sst [smem:[#allocation30_spill]] %s2972_s5 }
   0x2   :  { %2996 = sst [smem:[#allocation31_spill]] %s2976_s9 }
   0x3   :  { %2997 = sst [smem:[#allocation32_spill]] %s2977_s10 }
   0x4   :  { %2998 = sst [smem:[#allocation33_spill]] %s2979_s12 }
   0x5   :  { %2999 = sst [smem:[#allocation34_spill]] %s2981_s14 }
   0x6   :  { %3000 = sst [smem:[#allocation35_spill]] %s2982_s15 }
   0x7   :  { %20 = vsyncpa [#allocation8], 0 }
   0x8   :  { %21 = vsyncpa [#allocation11], 0 }
   0x9   :  { %22 = vsyncpa [#allocation14], 0 }
   0xa   :  { %23 = vsyncpa [#allocation9], 0 }
   0xb   :  { %25 = vsyncpa [#allocation9 + $0x1], 0  ;;  %s2491_s18 = smov 0   ;;  %s2493_s19 = smov 0  }
   0xc   :  { %s2495_s20 = smov 0   ;;  %s2497_s21 = smov 0  }
   0xd   :  { %s2499_s22 = smov 0   ;;  %s2501_s23 = smov 0  }
   0xe   :  { %s2503_s24 = smov 0   ;;  %s2505_s25 = smov 0  }
   0xf LB: > { %3001 = sst [smem:[#allocation20_spill]] %s2354_s18  ;;  %s1797_s26 = sadd.s32 4294967295, %s2382_s25   ;;  %s2382_s25 = sphi %s2505_s25, %s31_s25   ;;  %s2378_s24 = sphi %s2503_s24, %s3032_s24   ;;  %s2374_s23 = sphi %s2501_s23, %s3031_s23   ;;  %s2370_s22 = sphi %s2499_s22, %s3030_s22   ;;  %s2366_s21 = sphi %s2497_s21, %s3029_s21   ;;  %s2362_s20 = sphi %s2495_s20, %s3028_s20   ;;  %s2358_s19 = sphi %s2493_s19, %s3034_s19   ;;  %s2354_s18 = sphi %s2491_s18, %s3033_s18  }
  0x10   : > { %3002 = sst [smem:[#allocation21_spill]] %s2362_s20  ;;  %s1798_s27 = sadd.s32 4294967294, %s2382_s25  }
  0x11   : > { %3003 = sst [smem:[#allocation22_spill]] %s2374_s23  ;;  %s40_s28 = sadd.s32 1, %s2374_s23 }
  0x12   : > { %3004 = sst [smem:[#allocation23_spill]] %s2378_s24  ;;  %s43_s29 = sadd.s32 1, %s2378_s24 }
  0x13   : > { %3005 = sst [smem:[#allocation24_spill]] %s2382_s25  ;;  %p41_p0 = scmp.ge.s32.totalorder %s40_s28, 4 }
  0x14   : > { %s372_s30 = sadd.s32 1, %s2362_s20  ;;  %p382_p1 = scmp.ne.s32.totalorder %s2362_s20, %s2358_s19 }
  0x15   : > { %p383_p2 = scmp.eq.s32.totalorder %s1797_s26, 7  ;;  %s3036_s28 = smov (%p41_p0, %s40_s28), 0 }
  0x16   : > { %3006 = sst [smem:[#allocation25_spill]] %s3036_s28  ;;  %s3038_s29 = smov (!%p41_p0, %s43_s29), %s2378_s24 }
  0x17   : > { %s368_s16 = ssub.s32 %s2374_s23, %s3036_s28  ;;  %p2543_p3 = por %p383_p2, %p382_p1 }
  0x18   : > { %p45_p4 = scmp.ge.s32.totalorder %s3038_s29, 2  ;;  %p388_p5 = scmp.ne.s32.totalorder %s2358_s19, %s2354_s18 }
  0x19   : > { %s3007_s17 = scalar_select %p2543_p3, 1, 0 }
  0x1a   : > { %p389_p6 = scmp.eq.s32.totalorder %s1798_s27, 7  ;;  %p1799_p7 = scmp.ge.s32.totalorder %s2382_s25, 1 }
  0x1b   : > { %3008 = sst [smem:[#allocation26_spill]] %s3007_s17  ;;  %s3040_s29 = smov (%p45_p4, %s3038_s29), 0 }
  0x1c   : > { %3009 = sst [smem:[#allocation27_spill]] %s3040_s29  ;;  %p2552_p8 = por %p389_p6, %p388_p5 }
  0x1d   : > { %p396_p9 = scmp.lt.s32.totalorder %s2382_s25, 9  ;;  %s367_s14 = ssub.s32 %s2378_s24, %s3040_s29 }
  0x1e   : > { %s3010_s15 = scalar_select %p2552_p8, 1, 0 }
  0x1f   : > { %s369_s12 = sor.u32 %s368_s16, %s367_s14  ;;  %p2559_p10 = pnand %p1799_p7, %p396_p9 }
  0x20   : > { %3011 = sst [smem:[#allocation28_spill]] %s3010_s15  ;;  %p370_p11 = scmp.eq.s32.totalorder %s369_s12, 0 }
  0x21   : > { %p2563_p12 = scmp.eq.s32.totalorder %s1797_s26, 0  ;;  %p1973_p13 = pneg %p2559_p10 }
  0x22   : > { %s3014_s5 = sld [smem:[#allocation30_spill]]  ;;  %s2388_s12 = smov [#allocation10]  }
  0x23   : > { %s2573_s25 = scalar_select %p370_p11, %s2362_s20, %s372_s30  }
  0x24   : > { %p2577_p0 = pnand %p2563_p12, %p1973_p13  ;;  %s430_s26 = sshll.u32 %s2388_s12, 4  ;;  %s431_s26 = int_to_ptr.vmem [resolvable:$true] %s430_s26 }
  0x25   : > { %3015 = sst [smem:[#allocation29_spill]] %s2573_s25  ;;  %s2389_s16 = smov 64  }
  0x26   : > { %s2390_s29 = smov 4   ;;  %s408_s30 = sshll.u32 %s2968_s1, 4  ;;  %s409_s30 = int_to_ptr.hbm [resolvable:$true] %s408_s30 }
  0x27   : > { %s445_s17 = sshll.u32 %s2974_s7, 4  ;;  %s2392_s12 = smov [#allocation12]   ;;  %s446_s17 = int_to_ptr.hbm [resolvable:$true] %s445_s17 }
  0x28   : > { %s428_s15 = sshll.u32 %s3014_s5, 4  ;;  %s2391_s5 = smov [#allocation7]   ;;  %s429_s15 = int_to_ptr.hbm [resolvable:$true] %s428_s15 }
  0x29   : > { %1979 = dma.hbm_to_vmem [thread:$0]  (!%p2577_p0), %s429_s15, 256, %s431_s26, [#allocation11], %s2389_s16, %s2389_s16, %s2390_s29  }
  0x2a   : > { %s410_s24 = sshll.u32 %s2391_s5, 4  ;;  %s447_s10 = sshll.u32 %s2392_s12, 4  ;;  %s411_s24 = int_to_ptr.vmem [resolvable:$true] %s410_s24  ;;  %s448_s10 = int_to_ptr.vmem [resolvable:$true] %s447_s10 }
  0x2b   : > { %1976 = dma.hbm_to_vmem [thread:$0]  (!%p2577_p0), %s409_s30, 16, %s411_s24, [#allocation8]  }
  0x2c   : > { %s468_s26 = sshll.u32 %s2978_s11, 4  ;;  %s2393_s18 = smov [#allocation13]   ;;  %s469_s26 = int_to_ptr.hbm [resolvable:$true] %s468_s26 }
  0x2d   : > { %1982 = dma.hbm_to_vmem [thread:$0]  (!%p2577_p0), %s446_s17, 256, %s448_s10, [#allocation11], %s2389_s16, %s2389_s16, %s2390_s29  }
  0x2e   : > { %s470_s5 = sshll.u32 %s2393_s18, 4  ;;  %503 = sbr.rel (%p2559_p10) target bundleno = 2532 (0x9e4), region = 80  ;;  %s471_s5 = int_to_ptr.vmem [resolvable:$true] %s470_s5 }
  0x2f   : > { %1985 = dma.hbm_to_vmem [thread:$0]  (!%p2577_p0), %s469_s26, 256, %s471_s5, [#allocation14], %s2389_s16, %s2389_s16, %s2390_s29  }
  0x33   : > { %2337 = dma.done.wait (%p2563_p12), [#allocation8], 16  }
  0x34   : > { %2339 = vsyncadd (%p2563_p12), [#allocation8], 4294967280 }
  0x35   : > { %2341 = dma.done.wait (%p2563_p12), [#allocation11], 512  }
  0x36   : > { %2343 = vsyncadd (%p2563_p12), [#allocation11], 4294966784 }
  0x37   : > { %2345 = dma.done.wait (%p2563_p12), [#allocation14], 256  }
  0x38   : > { %2347 = vsyncadd (%p2563_p12), [#allocation14], 4294967040  ;;  %s564_s9 = sand.u32 1, %s2358_s19   ;;  %p567_p1 = scmp.lt.s32.totalorder %s2370_s22, 1 }
  0x39   : > { %s2616_s10 = sshll.u32 %s564_s9, 3  ;;  %p1813_p2 = scmp.ne.s32.totalorder %s2366_s21, 0 }
  0x3a   : > { %s568_s20 = scalar_select %p567_p1, %s2370_s22, 1 }
  0x3b   : > { %s566_s17 = scalar_lea.vmem [#allocation15], %s2616_s10  ;;  %576 = sbr.rel (%p1813_p2) target bundleno = 655 (0x28f), region = 100 }
  0x3c   : > { %s1930_s24 = sshll.u32 %s568_s20, 5  ;;  %s2395_s15 = smov (!%p1813_p2), 88  }
  0x3d   : > { %s2622_s29 = scalar_lea.vmem %s2967_s0, %s1930_s24  ;;  %s2396_s26 = smov (!%p1813_p2), 120  }
  0x3e   : > { %s2397_s18 = smov (!%p1813_p2), 96   ;;  %s2398_s5 = smov (!%p1813_p2), 104  }
  0x3f   : > { %s2399_s20 = smov (!%p1813_p2), 112   ;;  %s2400_s24 = smov (!%p1813_p2), 80  }
  0x40   : > { %vm584_vm0 = vcmask 261120   ;;  %v750_v0 = vld [vmem:[%s2622_s29 + $0x10] sm:$0xff]  ;;  %v582_v1 = vld [vmem:[%s2622_s29] sm:$0xff]  ;;  %v751_v4 = vld [vmem:[%s2622_s29 + $0x18] sm:$0xff]  ;;  %v2394_v8 = vmov 32.0   ;;  %vm683_vm14 = vcmask 60416  }
  0x41   : > { %v752_v2 = vsel %vm584_vm0, %v750_v0, 0.0  ;;  %v585_v3 = vsel %vm584_vm0, %v582_v1, 0.0  ;;  %v583_v5 = vld [vmem:[%s2622_s29 + $0x8] sm:$0xff]  ;;  %v755_v6 = vsel %vm584_vm0, %v751_v4, 0.0  ;;  %2099 = vrcp.f32 %v2394_v8  ;;  %s2401_s25 = smov 72  }
  0x42   : > { %753 = vadd.xlane.f32.xlu1 %v752_v2  ;;  %586 = vadd.xlane.f32.xlu0 %v585_v3  ;;  %v588_v7 = vsel %vm584_vm0, %v583_v5, 0.0  ;;  %v1932_v35 = vld [vmem:[#allocation10 + $0x8] sm:$0xff]  ;;  %v1931_v40 = vld [vmem:[#allocation10] sm:$0xff] }
  0x43   : > { %673 = vmatpush.bf16.msra.mxu0 %v1932_v35  ;;  %818 = vmatpush.bf16.msra.mxu1 %v1932_v35 }
  0x47   : > { %v2100_v9 = vpop.eup %2099  ;;  %674 = vmatpush.bf16.msra.mxu0 %v1931_v40  ;;  %819 = vmatpush.bf16.msra.mxu1 %v1931_v40 }
  0x48   : > { %v592_v10 = vmul.f32 32.0, %v2100_v9  ;;  %vm596_vm1 = vweird.f32 %v2100_v9 }
  0x4a   : > { %756 = vadd.xlane.f32.xlu1 %v755_v6  ;;  %589 = vadd.xlane.f32.xlu0 %v588_v7  ;;  %v593_v11 = vsub.f32 1.0, %v592_v10  ;;  %v2096_v10 = vld [vmem:[#allocation7] ss:$0 sm:$0xff] }
  0x4c   : > { %v594_v12 = vmul.f32 %v2100_v9, %v593_v11 }
  0x4e   : > { %v595_v13 = vadd.f32 %v2100_v9, %v594_v12 }
  0x50   : > { %v597_v14 = vsel %vm596_vm1, %v2100_v9, %v595_v13  ;;  %v2094_v13 = vld [vmem:[#allocation7] ss:$0 sm:$0xff] }
  0xb5   : > { %v754_v15 = vpop.xlane.xlu1 %753  ;;  %v587_v16 = vpop.xlane.xlu0 %586 }
  0xb6   : > { %v758_v17 = vmul.f32 %v754_v15, %v597_v14  ;;  %v598_v18 = vmul.f32 %v597_v14, %v587_v16 }
  0xb8   : > { %v2634_v19 = vsub.f32 %v750_v0, %v758_v17  ;;  %v2636_v20 = vsub.f32 %v582_v1, %v598_v18 }
  0xba   : > { %v762_v21 = vmul.f32 %v2634_v19, %v2634_v19  ;;  %v602_v22 = vmul.f32 %v2636_v20, %v2636_v20 }
  0xbc   : > { %v764_v23 = vsel %vm584_vm0, %v762_v21, 0.0  ;;  %v604_v24 = vsel %vm584_vm0, %v602_v22, 0.0 }
  0xbd   : > { %v757_v25 = vpop.xlane.xlu1 %756  ;;  %765 = vadd.xlane.f32.xlu0 %v764_v23  ;;  %605 = vadd.xlane.f32.xlu2 %v604_v24  ;;  %v590_v26 = vpop.xlane.xlu0 %589 }
  0xbe   : > { %v759_v27 = vmul.f32 %v757_v25, %v597_v14  ;;  %v599_v28 = vmul.f32 %v597_v14, %v590_v26 }
  0xc0   : > { %v2644_v29 = vsub.f32 %v751_v4, %v759_v27  ;;  %v2646_v30 = vsub.f32 %v583_v5, %v599_v28 }
  0xc2   : > { %v763_v31 = vmul.f32 %v2644_v29, %v2644_v29  ;;  %v603_v32 = vmul.f32 %v2646_v30, %v2646_v30 }
  0xc4   : > { %v767_v33 = vsel %vm584_vm0, %v763_v31, 0.0  ;;  %v607_v34 = vsel %vm584_vm0, %v603_v32, 0.0 }
  0xc5   : > { %768 = vadd.xlane.f32.xlu1 %v767_v33  ;;  %608 = vadd.xlane.f32.xlu2 %v607_v34 }
 0x130   : > { %v606_v36 = vpop.xlane.xlu2 %605  ;;  %v766_v37 = vpop.xlane.xlu0 %765 }
 0x131   : > { %v610_v38 = vmul.f32 %v606_v36, %v597_v14  ;;  %v770_v39 = vmul.f32 %v766_v37, %v597_v14 }
 0x133   : > { %v612_v41 = vadd.f32 1e-05, %v610_v38  ;;  %v772_v42 = vadd.f32 1e-05, %v770_v39 }
 0x135   : > { %2101 = vrsqrt.f32 %v612_v41  ;;  %vm780_vm2 = vweird.f32 %v772_v42  ;;  %vm620_vm6 = vweird.f32 %v612_v41 }
 0x136   : > { %2103 = vrsqrt.f32 %v772_v42 }
 0x138   : > { %v769_v43 = vpop.xlane.xlu1 %768  ;;  %v609_v44 = vpop.xlane.xlu2 %608 }
 0x139   : > { %v771_v45 = vmul.f32 %v769_v43, %v597_v14  ;;  %v611_v46 = vmul.f32 %v609_v44, %v597_v14 }
 0x13b   : > { %v2102_v47 = vpop.eup %2101  ;;  %v773_v48 = vadd.f32 1e-05, %v771_v45  ;;  %v613_v49 = vadd.f32 1e-05, %v611_v46 }
 0x13c   : > { %v2104_v50 = vpop.eup %2103  ;;  %v615_v51 = vmul.f32 %v2102_v47, %v612_v41  ;;  %vm621_vm4 = vweird.f32 %v2102_v47 }
 0x13d   : > { %v775_v52 = vmul.f32 %v2104_v50, %v772_v42  ;;  %2105 = vrsqrt.f32 %v773_v48  ;;  %vm781_vm3 = vweird.f32 %v2104_v50  ;;  %vm622_vm7 = vmor %vm620_vm6, %vm621_vm4  ;;  %vm790_vm8 = vweird.f32 %v773_v48 }
 0x13e   : > { %v616_v53 = vmul.f32 %v2102_v47, %v615_v51  ;;  %2107 = vrsqrt.f32 %v613_v49  ;;  %vm782_vm5 = vmor %vm780_vm2, %vm781_vm3  ;;  %vm630_vm12 = vweird.f32 %v613_v49 }
 0x13f   : > { %v776_v54 = vmul.f32 %v2104_v50, %v775_v52 }
 0x140   : > { %v617_v55 = vmul.f32 0.5, %v616_v53 }
 0x141   : > { %v777_v56 = vmul.f32 0.5, %v776_v54 }
 0x142   : > { %v618_v57 = vsub.f32 1.5, %v617_v55 }
 0x143   : > { %v2106_v58 = vpop.eup %2105  ;;  %v778_v59 = vsub.f32 1.5, %v777_v56 }
 0x144   : > { %v2108_v60 = vpop.eup %2107  ;;  %v785_v61 = vmul.f32 %v2106_v58, %v773_v48  ;;  %v619_v62 = vmul.f32 %v2102_v47, %v618_v57  ;;  %vm791_vm9 = vweird.f32 %v2106_v58 }
 0x145   : > { %v779_v63 = vmul.f32 %v2104_v50, %v778_v59  ;;  %v625_v0 = vmul.f32 %v2108_v60, %v613_v49  ;;  %vm792_vm10 = vmor %vm790_vm8, %vm791_vm9  ;;  %vm631_vm11 = vweird.f32 %v2108_v60 }
 0x146   : > { %v786_v1 = vmul.f32 %v2106_v58, %v785_v61  ;;  %v623_v5 = vsel %vm622_vm7, %v2102_v47, %v619_v62  ;;  %vm632_vm13 = vmor %vm630_vm12, %vm631_vm11 }
 0x147   : > { %v626_v2 = vmul.f32 %v2108_v60, %v625_v0  ;;  %v783_v3 = vsel %vm782_vm5, %v2104_v50, %v779_v63  ;;  %v634_v11 = vmul.f32 %v623_v5, %v2636_v20  ;;  %v2095_v20 = vld [vmem:[%s2969_s2] ss:$0 sm:$0xff] }
 0x148   : > { %v787_v4 = vmul.f32 0.5, %v786_v1  ;;  %v794_v8 = vmul.f32 %v783_v3, %v2634_v19  ;;  %v2097_v19 = vld [vmem:[%s2969_s2] ss:$0 sm:$0xff] }
 0x149   : > { %v627_v6 = vmul.f32 0.5, %v626_v2  ;;  %v640_v22 = vmul.f32 %v2094_v13, %v634_v11 }
 0x14a   : > { %v788_v7 = vsub.f32 1.5, %v787_v4  ;;  %v800_v18 = vmul.f32 %v2096_v10, %v794_v8 }
 0x14b   : > { %v628_v9 = vsub.f32 1.5, %v627_v6  ;;  %v646_v27 = vadd.f32 %v2095_v20, %v640_v22 }
 0x14c   : > { %v789_v12 = vmul.f32 %v2106_v58, %v788_v7  ;;  %v806_v25 = vadd.f32 %v2097_v19, %v800_v18 }
 0x14d   : > { %v629_v14 = vmul.f32 %v2108_v60, %v628_v9 }
 0x14e   : > { %v793_v15 = vsel %vm792_vm10, %v2106_v58, %v789_v12 }
 0x14f   : > { %v795_v16 = vmul.f32 %v793_v15, %v2644_v29  ;;  %v633_v17 = vsel %vm632_vm13, %v2108_v60, %v629_v14 }
 0x150   : > { %v635_v21 = vmul.f32 %v633_v17, %v2646_v30  ;;  %v2098_v30 = vld [vmem:[%s2973_s6] ss:$0 sm:$0xff] }
 0x151   : > { %v801_v23 = vmul.f32 %v2096_v10, %v795_v16 }
 0x152   : > { %v641_v24 = vmul.f32 %v2094_v13, %v635_v21 }
 0x153   : > { %v807_v26 = vadd.f32 %v2097_v19, %v801_v23 }
 0x154   : > { %v647_v28 = vadd.f32 %v2095_v20, %v641_v24 }
 0x155   : > { %v808_v29 = vpack.c.bf16 %v807_v26, %v806_v25 }
 0x156   : > { %v648_v31 = vpack.c.bf16 %v647_v28, %v646_v27 }
 0x157   : > { %1823 = vmatmul.msk.bf16.vlgmr.msra.gmra.mxu1 %vm584_vm0, %v808_v29 }
 0x158   : > { %1822 = vmatmul.msk.bf16.vlgmr.msra.gmra.mxu0 %vm584_vm0, %v648_v31 }
 0x1d4   : > { %v821_v32 = vpop.f32.mrf.mxu1 }
 0x1d5   : > { %v676_v33 = vpop.f32.mrf.mxu0  ;;  %v822_v34 = vadd.f32 %v2098_v30, %v821_v32 }
 0x1d6   : > { %v677_v35 = vadd.f32 %v2098_v30, %v676_v33 }
 0x1d7   : > { %v826_v36 = vpack.c.bf16 %v822_v34, %v822_v34 }
 0x1d8   : > { %v681_v37 = vpack.c.bf16 %v677_v35, %v677_v35 }
 0x1d9   : > { %828 = vst.msk [vmem:[#allocation2 + $0x8] sm:$0xf] %vm683_vm14, %v826_v36 }
 0x1da   : > { %684 = vst.msk [vmem:[#allocation2] sm:$0xf] %vm683_vm14, %v681_v37  ;;  %705 = vrot.lane.b32.xlu0 %v681_v37, %s2395_s15  ;;  %696 = vrot.lane.b32.xlu1 %v681_v37, %s2396_s26 }
 0x1db   : > { %688 = vrot.lane.b32.xlu2 %v681_v37, %s2397_s18 }
 0x1dc   : > { %v823_v38 = vpop.f32.mrf.mxu1 }
 0x1dd   : > { %v678_v39 = vpop.f32.mrf.mxu0  ;;  %v824_v40 = vadd.f32 %v2098_v30, %v823_v38 }
 0x1de   : > { %v679_v41 = vadd.f32 %v2098_v30, %v678_v39 }
 0x1df   : > { %v827_v42 = vpack.c.bf16 %v824_v40, %v824_v40 }
 0x1e0   : > { %v682_v43 = vpack.c.bf16 %v679_v41, %v679_v41 }
 0x1e1   : > { %829 = vst.msk [vmem:[#allocation2 + $0xc] sm:$0xf] %vm683_vm14, %v827_v42 }
 0x1e2   : > { %685 = vst.msk [vmem:[#allocation2 + $0x4] sm:$0xf] %vm683_vm14, %v682_v43  ;;  %732 = vrot.lane.b32.xlu0 %v681_v37, %s2398_s5  ;;  %714 = vrot.lane.b32.xlu1 %v681_v37, %s2399_s20 }
 0x1e3   : > { %723 = vrot.lane.b32.xlu2 %v681_v37, %s2400_s24 }
 0x1ea   : > { %840 = vrot.lane.b32.xlu0 %v826_v36, %s2396_s26  ;;  %741 = vrot.lane.b32.xlu1 %v681_v37, %s2401_s25 }
 0x1eb   : > { %832 = vrot.lane.b32.xlu2 %v826_v36, %s2397_s18 }
 0x1f2   : > { %864 = vrot.lane.b32.xlu0 %v826_v36, %s2400_s24  ;;  %848 = vrot.lane.b32.xlu1 %v826_v36, %s2395_s15 }
 0x1f3   : > { %856 = vrot.lane.b32.xlu2 %v826_v36, %s2399_s20 }
 0x1fa   : > { %690 = vrot.lane.b32.xlu0 %v682_v43, %s2397_s18  ;;  %872 = vrot.lane.b32.xlu1 %v826_v36, %s2398_s5 }
 0x1fb   : > { %698 = vrot.lane.b32.xlu2 %v682_v43, %s2396_s26 }
 0x202   : > { %716 = vrot.lane.b32.xlu0 %v682_v43, %s2399_s20  ;;  %725 = vrot.lane.b32.xlu1 %v682_v43, %s2400_s24 }
 0x203   : > { %707 = vrot.lane.b32.xlu2 %v682_v43, %s2395_s15 }
 0x20a   : > { %743 = vrot.lane.b32.xlu0 %v682_v43, %s2401_s25  ;;  %834 = vrot.lane.b32.xlu1 %v827_v42, %s2397_s18 }
 0x20b   : > { %734 = vrot.lane.b32.xlu2 %v682_v43, %s2398_s5 }
 0x212   : > { %850 = vrot.lane.b32.xlu0 %v827_v42, %s2395_s15  ;;  %858 = vrot.lane.b32.xlu1 %v827_v42, %s2399_s20 }
 0x213   : > { %842 = vrot.lane.b32.xlu2 %v827_v42, %s2396_s26 }
 0x21a   : > { %874 = vrot.lane.b32.xlu0 %v827_v42, %s2398_s5  ;;  %882 = vrot.lane.b32.xlu1 %v827_v42, %s2401_s25 }
 0x21b   : > { %866 = vrot.lane.b32.xlu2 %v827_v42, %s2400_s24 }
 0x223   : > { %880 = vrot.lane.b32.xlu2 %v826_v36, %s2401_s25 }
 0x235   : > { %v689_v44 = vpop.permute.xlu2 %688 }
 0x236   : > { %694 = vst.msk [vmem:[#allocation3] sm:$0xf] %vm683_vm14, %v689_v44 }
 0x23d   : > { %v724_v45 = vpop.permute.xlu2 %723 }
 0x23e   : > { %730 = vst.msk [vmem:[#allocation3 + $0x20] sm:$0xf] %vm683_vm14, %v724_v45 }
 0x245   : > { %v833_v46 = vpop.permute.xlu2 %832 }
 0x246   : > { %838 = vst.msk [vmem:[#allocation3 + $0x8] sm:$0xf] %vm683_vm14, %v833_v46 }
 0x24c   : > { %v706_v47 = vpop.permute.xlu0 %705  ;;  %v697_v48 = vpop.permute.xlu1 %696 }
 0x24d   : > { %712 = vst.msk [vmem:[#allocation3 + $0x10] sm:$0xf] %vm683_vm14, %v706_v47  ;;  %v857_v49 = vpop.permute.xlu2 %856 }
 0x24e   : > { %703 = vst.msk [vmem:[#allocation2 + $0x10] sm:$0xf] %vm683_vm14, %v697_v48 }
 0x24f   : > { %862 = vst.msk [vmem:[#allocation2 + $0x28] sm:$0xf] %vm683_vm14, %v857_v49 }
 0x254   : > { %v733_v50 = vpop.permute.xlu0 %732  ;;  %v715_v51 = vpop.permute.xlu1 %714 }
 0x255   : > { %739 = vst.msk [vmem:[#allocation2 + $0x30] sm:$0xf] %vm683_vm14, %v733_v50  ;;  %v699_v52 = vpop.permute.xlu2 %698 }
 0x256   : > { %721 = vst.msk [vmem:[#allocation2 + $0x20] sm:$0xf] %vm683_vm14, %v715_v51 }
 0x257   : > { %704 = vst.msk [vmem:[#allocation2 + $0x14] sm:$0xf] %vm683_vm14, %v699_v52 }
 0x25c   : > { %v841_v53 = vpop.permute.xlu0 %840  ;;  %v742_v54 = vpop.permute.xlu1 %741 }
 0x25d   : > { %846 = vst.msk [vmem:[#allocation2 + $0x18] sm:$0xf] %vm683_vm14, %v841_v53  ;;  %v708_v55 = vpop.permute.xlu2 %707 }
 0x25e   : > { %748 = vst.msk [vmem:[#allocation3 + $0x30] sm:$0xf] %vm683_vm14, %v742_v54 }
 0x25f   : > { %713 = vst.msk [vmem:[#allocation3 + $0x14] sm:$0xf] %vm683_vm14, %v708_v55 }
 0x264   : > { %v865_v56 = vpop.permute.xlu0 %864  ;;  %v849_v57 = vpop.permute.xlu1 %848 }
 0x265   : > { %870 = vst.msk [vmem:[#allocation3 + $0x28] sm:$0xf] %vm683_vm14, %v865_v56  ;;  %v735_v58 = vpop.permute.xlu2 %734 }
 0x266   : > { %854 = vst.msk [vmem:[#allocation3 + $0x18] sm:$0xf] %vm683_vm14, %v849_v57 }
 0x267   : > { %740 = vst.msk [vmem:[#allocation2 + $0x34] sm:$0xf] %vm683_vm14, %v735_v58 }
 0x26c   : > { %v691_v59 = vpop.permute.xlu0 %690  ;;  %v873_v60 = vpop.permute.xlu1 %872 }
 0x26d   : > { %695 = vst.msk [vmem:[#allocation3 + $0x4] sm:$0xf] %vm683_vm14, %v691_v59  ;;  %v843_v61 = vpop.permute.xlu2 %842 }
 0x26e   : > { %878 = vst.msk [vmem:[#allocation2 + $0x38] sm:$0xf] %vm683_vm14, %v873_v60 }
 0x26f   : > { %847 = vst.msk [vmem:[#allocation2 + $0x1c] sm:$0xf] %vm683_vm14, %v843_v61 }
 0x274   : > { %v717_v62 = vpop.permute.xlu0 %716  ;;  %v726_v63 = vpop.permute.xlu1 %725 }
 0x275   : > { %722 = vst.msk [vmem:[#allocation2 + $0x24] sm:$0xf] %vm683_vm14, %v717_v62  ;;  %v867_v0 = vpop.permute.xlu2 %866 }
 0x276   : > { %731 = vst.msk [vmem:[#allocation3 + $0x24] sm:$0xf] %vm683_vm14, %v726_v63 }
 0x277   : > { %871 = vst.msk [vmem:[#allocation3 + $0x2c] sm:$0xf] %vm683_vm14, %v867_v0 }
 0x27c   : > { %v744_v1 = vpop.permute.xlu0 %743  ;;  %v835_v2 = vpop.permute.xlu1 %834 }
 0x27d   : > { %749 = vst.msk [vmem:[#allocation3 + $0x34] sm:$0xf] %vm683_vm14, %v744_v1  ;;  %v881_v3 = vpop.permute.xlu2 %880 }
 0x27e   : > { %839 = vst.msk [vmem:[#allocation3 + $0xc] sm:$0xf] %vm683_vm14, %v835_v2 }
 0x27f   : > { %886 = vst.msk [vmem:[#allocation3 + $0x38] sm:$0xf] %vm683_vm14, %v881_v3 }
 0x284   : > { %v851_v4 = vpop.permute.xlu0 %850  ;;  %v859_v5 = vpop.permute.xlu1 %858 }
 0x285   : > { %855 = vst.msk [vmem:[#allocation3 + $0x1c] sm:$0xf] %vm683_vm14, %v851_v4 }
 0x286   : > { %863 = vst.msk [vmem:[#allocation2 + $0x2c] sm:$0xf] %vm683_vm14, %v859_v5 }
 0x28c   : > { %v875_v6 = vpop.permute.xlu0 %874  ;;  %v883_v7 = vpop.permute.xlu1 %882 }
 0x28d   : > { %879 = vst.msk [vmem:[#allocation2 + $0x3c] sm:$0xf] %vm683_vm14, %v875_v6 }
 0x28e   : > { %887 = vst.msk [vmem:[#allocation3 + $0x3c] sm:$0xf] %vm683_vm14, %v883_v7 }
 0x28f PF: > { %s1824_s28 = sshll.u32 %s2366_s21, 3  ;;  %vm891_vm15 = vcmask 261120   ;;  %v997_v8 = vlaneseq  ;;  %v2402_v15 = vmov 32.0   ;;  %v1934_v27 = vld [vmem:[%s2970_s3 + $0x8] sm:$0xff]  ;;  %v1933_v28 = vld [vmem:[%s2970_s3] sm:$0xff]  ;;  %vm983_vm4 = vcmask 7168  }
 0x290   : > { %s889_s23 = scalar_lea.vmem %s2622_s29, %s1824_s28  ;;  %v999_v9 = vstv %s1824_s28  ;;  %s1936_s14 = sadd.s32 8, %s1824_s28  ;;  %2112 = vrcp.f32 %v2402_v15  ;;  %961 = vmatpush.bf16.msra.mxu0 %v1934_v27  ;;  %v2109_v38 = vld [vmem:[#allocation7] ss:$0 sm:$0xff]  ;;  %v2406_v53 = vmov -1e+30   ;;  %v2407_v54 = vmov 0.0  }
 0x291   : > { %v2715_v10 = vld [vmem:[%s889_s23] sm:$0xff]  ;;  %v998_v11 = vshrl.u32 %v997_v8, 7  ;;  %v2717_v12 = vand.u32 127, %v997_v8  ;;  %s1005_s16 = sadd.s32 15, %s1936_s14  ;;  %s2403_s23 = smov 104   ;;  %984 = vst.msk [vmem:[#allocation4] sm:$0xff] %vm983_vm4, %v2406_v53 }
 0x292   : > { %v892_v13 = vsel %vm891_vm15, %v2715_v10, 0.0  ;;  %p1006_p4 = scmp.lt.s32.totalorder %s1005_s16, 0  ;;  %s1007_s27 = ssub.s32 0, %s1005_s16  ;;  %v2110_v41 = vld [vmem:[%s2969_s2] ss:$0 sm:$0xff]  ;;  %985 = vst.msk [vmem:[#allocation4 + $0x8] sm:$0xff] %vm983_vm4, %v2406_v53 }
 0x293   : > { %v2721_v14 = vadd.s32 %v999_v9, %v998_v11  ;;  %s1835_s30 = smin.u32 %s1007_s27, %s1005_s16  ;;  %893 = vadd.xlane.f32.xlu0 %v892_v13  ;;  %v2111_v45 = vld [vmem:[%s2971_s4] ss:$0 sm:$0xff]  ;;  %s2404_s14 = smov 120   ;;  %986 = vst.msk [vmem:[#allocation4 + $0x10] sm:$0xff] %vm983_vm4, %v2406_v53  ;;  %vm992_vm5 = vcmask 64512  }
 0x294   : > { %s1009_s12 = sshrl.u32 %s1835_s30, 4  ;;  %962 = vmatpush.bf16.msra.mxu0 %v1933_v28  ;;  %s2405_s16 = smov 112   ;;  %987 = vst.msk [vmem:[#allocation4 + $0x18] sm:$0xff] %vm983_vm4, %v2406_v53 }
 0x295   : > { %s1010_s15 = ssub.s32 0, %s1009_s12  ;;  %988 = vst.msk [vmem:[#allocation5] sm:$0xff] %vm983_vm4, %v2407_v54 }
 0x296   : > { %s3042_s15 = smov (!%p1006_p4, %s1010_s15), %s1009_s12  ;;  %v2113_v16 = vpop.eup %2112  ;;  %989 = vst.msk [vmem:[#allocation5 + $0x8] sm:$0xff] %vm983_vm4, %v2407_v54 }
 0x297   : > { %v896_v17 = vmul.f32 32.0, %v2113_v16  ;;  %vm900_vm0 = vweird.f32 %v2113_v16  ;;  %990 = vst.msk [vmem:[#allocation5 + $0x10] sm:$0xff] %vm983_vm4, %v2407_v54  ;;  %p1836_p5 = scmp.le.s32.totalorder %s3042_s15, 0 }
 0x298   : > { %991 = vst.msk [vmem:[#allocation5 + $0x18] sm:$0xff] %vm983_vm4, %v2407_v54  ;;  %s2776_s27 = smov (!%p1836_p5), 0  }
 0x299   : > { %v897_v18 = vsub.f32 1.0, %v896_v17  ;;  %993 = vst.msk [vmem:[#allocation6] sm:$0xff] %vm992_vm5, %v2407_v54 }
 0x29a   : > { %994 = vst.msk [vmem:[#allocation6 + $0x8] sm:$0xff] %vm992_vm5, %v2407_v54 }
 0x29b   : > { %v898_v19 = vmul.f32 %v2113_v16, %v897_v18  ;;  %995 = vst.msk [vmem:[#allocation6 + $0x10] sm:$0xff] %vm992_vm5, %v2407_v54 }
 0x29c   : > { %996 = vst.msk [vmem:[#allocation6 + $0x18] sm:$0xff] %vm992_vm5, %v2407_v54 }
 0x29d   : > { %v899_v21 = vadd.f32 %v2113_v16, %v898_v19 }
 0x29f   : > { %v2725_v22 = vsel %vm900_vm0, %v2113_v16, %v899_v21 }
 0x306   : > { %v894_v20 = vpop.xlane.xlu0 %893 }
 0x307   : > { %v902_v23 = vmul.f32 %v2725_v22, %v894_v20 }
 0x309   : > { %v903_v24 = vsub.f32 %v2715_v10, %v902_v23 }
 0x30b   : > { %v904_v25 = vmul.f32 %v903_v24, %v903_v24 }
 0x30d   : > { %v905_v26 = vsel %vm891_vm15, %v904_v25, 0.0 }
 0x30e   : > { %906 = vadd.xlane.f32.xlu0 %v905_v26 }
 0x381   : > { %v907_v29 = vpop.xlane.xlu0 %906 }
 0x382   : > { %v908_v31 = vmul.f32 %v907_v29, %v2725_v22 }
 0x384   : > { %v909_v30 = vadd.f32 1e-05, %v908_v31 }
 0x386   : > { %2114 = vrsqrt.f32 %v909_v30  ;;  %vm916_vm2 = vweird.f32 %v909_v30 }
 0x38c   : > { %v2115_v32 = vpop.eup %2114 }
 0x38d   : > { %v911_v33 = vmul.f32 %v2115_v32, %v909_v30  ;;  %vm917_vm1 = vweird.f32 %v2115_v32 }
 0x38e   : > { %vm918_vm3 = vmor %vm916_vm2, %vm917_vm1 }
 0x38f   : > { %v912_v34 = vmul.f32 %v2115_v32, %v911_v33 }
 0x391   : > { %v913_v35 = vmul.f32 0.5, %v912_v34 }
 0x393   : > { %v914_v36 = vsub.f32 1.5, %v913_v35 }
 0x395   : > { %v915_v37 = vmul.f32 %v2115_v32, %v914_v36 }
 0x397   : > { %v919_v39 = vsel %vm918_vm3, %v2115_v32, %v915_v37 }
 0x398   : > { %v920_v40 = vmul.f32 %v919_v39, %v903_v24 }
 0x39a   : > { %v925_v42 = vmul.f32 %v2109_v38, %v920_v40 }
 0x39c   : > { %v930_v43 = vadd.f32 %v2110_v41, %v925_v42 }
 0x39e   : > { %v931_v44 = vpack.c.bf16 %v930_v43, %v930_v43 }
 0x3a0   : > { %1833 = vmatmul.msk.bf16.vlgmr.msra.gmra.mxu0 %vm891_vm15, %v931_v44 }
 0x41d   : > { %v964_v46 = vpop.f32.mrf.mxu0 }
 0x41e   : > { %v965_v47 = vadd.f32 %v2111_v45, %v964_v46 }
 0x420   : > { %v2744_v48 = vmul.f32 0.35355338, %v965_v47 }
 0x422   : > { %v979_v49 = vpack.c.bf16 %v2744_v48, %v2744_v48  ;;  %976 = vrot.lane.b32.xlu2 %v2744_v48, %s2403_s23  ;;  %970 = vrot.lane.b32.xlu1 %v2744_v48, %s2404_s14 }
 0x425   : > { %v966_v50 = vpop.f32.mrf.mxu0 }
 0x42a   : > { %973 = vrot.lane.b32.xlu1 %v2744_v48, %s2405_s16 }
 0x47c   : > { %v2751_v51 = vpop.permute.xlu2 %976 }
 0x47d   : > { %v982_v52 = vpack.c.bf16 %v2751_v51, %v2751_v51 }
 0x494   : > { %v2767_v55 = vpop.permute.xlu1 %970 }
 0x495   : > { %v980_v56 = vpack.c.bf16 %v2767_v55, %v2767_v55 }
 0x499   : > { %1726 = sbr.rel (%p1836_p5) target bundleno = 1712 (0x6b0), region = 152 }
 0x49c   : > { %v2771_v57 = vpop.permute.xlu1 %973 }
 0x49d   : > { %v981_v58 = vpack.c.bf16 %v2771_v57, %v2771_v57 }
 0x49e LB: >> { %s1837_s30 = sshll.u32 %s2386_s27, 4  ;;  %v2408_v5 = vmov -1e+30   ;;  %vm1145_vm7 = vcmask 130048   ;;  %v2409_v27 = vmov 0   ;;  %v1141_v28 = vld [vmem:[#allocation4] sm:$0xff]  ;;  %s2386_s27 = sphi %s2776_s27, %s1015_s27  }
 0x49f   : >> { %s2782_s12 = sshra.s32 %s1837_s30, 3  ;;  %v1041_v3 = vstv %s1837_s30  ;;  %2117 = vset.pattern.permute.xlu0 %v2409_v27  ;;  %2116 = vset.pattern.permute.xlu2 %v2409_v27  ;;  %v1143_v32 = vld [vmem:[#allocation4 + $0x10] sm:$0xff]  ;;  %v1142_v33 = vld [vmem:[#allocation4 + $0x8] sm:$0xff]  ;;  %v1144_v42 = vld [vmem:[#allocation4 + $0x18] sm:$0xff]  ;;  %s1015_s27 = sadd.s32 1, %s2386_s27  }
 0x4a0   : >> { %s1838_s29 = sshll.u32 %s2782_s12, 2  ;;  %v1042_v4 = vadd.s32 %v1041_v3, %v2717_v12  ;;  %2118 = vset.pattern.permute.xlu1 %v2409_v27  ;;  %p1014_p6 = scmp.ge.s32.totalorder %s1015_s27, %s3042_s15 }
 0x4a1   : >> { %s1022_s26 = scalar_lea.vmem [#allocation2], %s1838_s29  ;;  %s1032_s18 = scalar_lea.vmem [#allocation3], %s1838_s29 }
 0x4a2   : >> { %v1937_v59 = vld [vmem:[%s1022_s26] sm:$0xff]  ;;  %v1938_v60 = vld [vmem:[%s1022_s26 + $0x10] sm:$0xff]  ;;  %vm1043_vm6 = vcmp.le.s32.totalorder %v1042_v4, %v2721_v14 }
 0x4a3   : >> { %v1939_v61 = vld [vmem:[%s1022_s26 + $0x20] sm:$0xff]  ;;  %v1940_v62 = vld [vmem:[%s1022_s26 + $0x30] sm:$0xff]  ;;  %v1054_v63 = vsel %vm992_vm5, %v1937_v59, 0  ;;  %v1078_v0 = vsel %vm992_vm5, %v1938_v60, 0  ;;  %v1044_v6 = vsel %vm1043_vm6, 0.0, %v2408_v5 }
 0x4a4   : >> { %v1102_v1 = vsel %vm992_vm5, %v1939_v61, 0  ;;  %1063 = vmatpush.bf16.xpose.msra.mxu0 %v1054_v63  ;;  %1087 = vmatpush.bf16.xpose.msra.mxu1 %v1078_v0  ;;  %v1126_v2 = vsel %vm992_vm5, %v1940_v62, 0  ;;  %v1943_v60 = vld [vmem:[%s1032_s18 + $0x20] sm:$0xff]  ;;  %v1944_v61 = vld [vmem:[%s1032_s18 + $0x30] sm:$0xff] }
 0x4a5   : >> { %1111 = vmatpush.bf16.xpose.msra.mxu2 %v1102_v1  ;;  %1135 = vmatpush.bf16.xpose.msra.mxu3 %v1126_v2  ;;  %v1941_v62 = vld [vmem:[%s1032_s18] sm:$0xff]  ;;  %v1942_v63 = vld [vmem:[%s1032_s18 + $0x10] sm:$0xff] }
 0x4ab   : >> { %1844 = vmatmul.msk.bf16.vlgmr.msra.gmra.mxu0 %vm992_vm5, %v979_v49  ;;  %1849 = vmatmul.msk.bf16.vlgmr.msra.gmra.mxu1 %vm992_vm5, %v980_v56 }
 0x4ac   : >> { %1854 = vmatmul.msk.bf16.vlgmr.msra.gmra.mxu2 %vm992_vm5, %v981_v58  ;;  %1859 = vmatmul.msk.bf16.vlgmr.msra.gmra.mxu3 %vm992_vm5, %v982_v52 }
 0x4ad   : >> { %1326 = vmatpush.bf16.msrb.mxu2 %v1943_v60  ;;  %1348 = vmatpush.bf16.msrb.mxu3 %v1944_v61  ;;  %v1207_v60 = vld [vmem:[#allocation5 + $0x8] sm:$0xff] }
 0x4ae   : >> { %1282 = vmatpush.bf16.msrb.mxu0 %v1941_v62  ;;  %1304 = vmatpush.bf16.msrb.mxu1 %v1942_v63 }
 0x528   : >> { %v1065_v7 = vpop.f32.mrf.mxu0  ;;  %v1089_v8 = vpop.f32.mrf.mxu1 }
 0x529   : >> { %v2809_v9 = vadd.f32 %v1065_v7, %v1044_v6  ;;  %v2813_v13 = vadd.f32 %v1089_v8, %v1044_v6 }
 0x52b   : >> { %v1146_v11 = vsel %vm1145_vm7, %v2809_v9, -inf  ;;  %v1149_v21 = vsel %vm1145_vm7, %v2813_v13, -inf }
 0x52c   : >> { %1147 = vmax.xlane.f32.xlu1 %v1146_v11 }
 0x52f   : >> { %v1113_v15 = vpop.f32.mrf.mxu2  ;;  %v1137_v16 = vpop.f32.mrf.mxu3 }
 0x530   : >> { %v2815_v17 = vadd.f32 %v1113_v15, %v1044_v6  ;;  %v1067_v18 = vpop.f32.mrf.mxu0  ;;  %v1091_v19 = vpop.f32.mrf.mxu1  ;;  %v2821_v23 = vadd.f32 %v1137_v16, %v1044_v6 }
 0x532   : >> { %v1152_v20 = vsel %vm1145_vm7, %v2815_v17, -inf  ;;  %v1155_v26 = vsel %vm1145_vm7, %v2821_v23, -inf }
 0x533   : >> { %1153 = vmax.xlane.f32.xlu0 %v1152_v20 }
 0x534   : >> { %1150 = vmax.xlane.f32.xlu1 %v1149_v21 }
 0x537   : >> { %v1115_v24 = vpop.f32.mrf.mxu2  ;;  %v1139_v25 = vpop.f32.mrf.mxu3 }
 0x53b   : >> { %1156 = vmax.xlane.f32.xlu0 %v1155_v26 }
 0x59f   : >> { %v1148_v29 = vpop.xlane.xlu1 %1147 }
 0x5a0   : >> { %v1158_v31 = vmax.f32 %v1141_v28, %v1148_v29 }
 0x5a2   : >> { %1362 = vst.msk [vmem:[#allocation4] sm:$0xff] %vm983_vm4, %v1158_v31  ;;  %1176 = vperm.xlu0 %2117, %v1158_v31   ;;  %v1162_v30 = vsub.f32 %v1141_v28, %v1158_v31 }
 0x5a4   : >> { %v1166_v35 = vmul.f32 1.442695, %v1162_v30 }
 0x5a6   : >> { %v1154_v34 = vpop.xlane.xlu0 %1153  ;;  %2119 = vpow2.f32 %v1166_v35 }
 0x5a7   : >> { %v1160_v36 = vmax.f32 %v1143_v32, %v1154_v34  ;;  %v1151_v37 = vpop.xlane.xlu1 %1150 }
 0x5a8   : >> { %v1159_v38 = vmax.f32 %v1142_v33, %v1151_v37 }
 0x5a9   : >> { %v1164_v39 = vsub.f32 %v1143_v32, %v1160_v36  ;;  %1364 = vst.msk [vmem:[#allocation4 + $0x10] sm:$0xff] %vm983_vm4, %v1160_v36  ;;  %1186 = vperm.xlu2 %2116, %v1160_v36   ;;  %v1209_v36 = vld [vmem:[#allocation5 + $0x18] sm:$0xff] }
 0x5aa   : >> { %1363 = vst.msk [vmem:[#allocation4 + $0x8] sm:$0xff] %vm983_vm4, %v1159_v38  ;;  %1181 = vperm.xlu1 %2118, %v1159_v38   ;;  %v1163_v41 = vsub.f32 %v1142_v33, %v1159_v38 }
 0x5ab   : >> { %v1170_v40 = vmul.f32 1.442695, %v1164_v39 }
 0x5ac   : >> { %v1168_v44 = vmul.f32 1.442695, %v1163_v41  ;;  %v2828_v46 = vpop.eup %2119  ;;  %v1206_v41 = vld [vmem:[#allocation5] sm:$0xff] }
 0x5ad   : >> { %2121 = vpow2.f32 %v1170_v40  ;;  %v1236_v40 = vld [vmem:[#allocation6 + $0x10] sm:$0xff] }
 0x5ae   : >> { %v1157_v43 = vpop.xlane.xlu0 %1156  ;;  %2123 = vpow2.f32 %v1168_v44 }
 0x5af   : >> { %v1161_v45 = vmax.f32 %v1144_v42, %v1157_v43  ;;  %v1210_v43 = vmul.f32 %v2828_v46, %v1206_v41 }
 0x5b1   : >> { %v1165_v47 = vsub.f32 %v1144_v42, %v1161_v45  ;;  %1365 = vst.msk [vmem:[#allocation4 + $0x18] sm:$0xff] %vm983_vm4, %v1161_v45  ;;  %1191 = vperm.xlu2 %2116, %v1161_v45  }
 0x5b2   : >> { %1240 = vperm.xlu1 %2118, %v2828_v46  }
 0x5b3   : >> { %v2122_v50 = vpop.eup %2121  ;;  %v1172_v53 = vmul.f32 1.442695, %v1165_v47 }
 0x5b4   : >> { %1250 = vperm.xlu0 %2117, %v2122_v50   ;;  %v2832_v54 = vpop.eup %2123 }
 0x5b5   : >> { %2125 = vpow2.f32 %v1172_v53  ;;  %v1237_v53 = vld [vmem:[#allocation6 + $0x18] sm:$0xff] }
 0x5ba   : >> { %1245 = vperm.xlu1 %2118, %v2832_v54  }
 0x5bb   : >> { %v2126_v59 = vpop.eup %2125 }
 0x5bc   : >> { %v1213_v37 = vmul.f32 %v2126_v59, %v1209_v36 }
 0x5c2   : >> { %1255 = vperm.xlu1 %2118, %v2126_v59   ;;  %v1234_v59 = vld [vmem:[#allocation6] sm:$0xff] }
 0x603   : >> { %v1187_v0 = vpop.permute.xlu2 %1186 }
 0x604   : >> { %v1196_v1 = vsub.f32 %v2815_v17, %v1187_v0  ;;  %v1211_v0 = vmul.f32 %v2832_v54, %v1207_v60 }
 0x606   : >> { %v1202_v2 = vmul.f32 1.442695, %v1196_v1 }
 0x608   : >> { %2127 = vpow2.f32 %v1202_v2 }
 0x60b   : >> { %v1192_v3 = vpop.permute.xlu2 %1191 }
 0x60c   : >> { %v1197_v4 = vsub.f32 %v2821_v23, %v1192_v3 }
 0x60e   : >> { %v2128_v5 = vpop.eup %2127  ;;  %v1204_v6 = vmul.f32 1.442695, %v1197_v4 }
 0x60f   : >> { %v1220_v7 = vsel %vm1145_vm7, %v2128_v5, 0.0  ;;  %v1264_v8 = vpack.c.bf16 %v2128_v5, %v2128_v5 }
 0x610   : >> { %2129 = vpow2.f32 %v1204_v6  ;;  %1221 = vadd.xlane.f32.xlu0 %v1220_v7  ;;  %v1235_v6 = vld [vmem:[#allocation6 + $0x8] sm:$0xff] }
 0x611   : >> { %1874 = vmatmul.msk.bf16.vlgmr.msrb.gmra.mxu2 %vm1145_vm7, %v1264_v8 }
 0x614   : >> { %v1177_v11 = vpop.permute.xlu0 %1176 }
 0x615   : >> { %v1194_v15 = vsub.f32 %v2809_v9, %v1177_v11 }
 0x616   : >> { %v2130_v16 = vpop.eup %2129 }
 0x617   : >> { %v1198_v18 = vmul.f32 1.442695, %v1194_v15  ;;  %v1223_v17 = vsel %vm1145_vm7, %v2130_v16, 0.0  ;;  %v1265_v19 = vpack.c.bf16 %v2130_v16, %v2130_v16 }
 0x618   : >> { %1224 = vadd.xlane.f32.xlu1 %v1223_v17 }
 0x619   : >> { %2131 = vpow2.f32 %v1198_v18  ;;  %1879 = vmatmul.msk.bf16.vlgmr.msrb.gmra.mxu3 %vm1145_vm7, %v1265_v19 }
 0x61c   : >> { %v1182_v21 = vpop.permute.xlu1 %1181 }
 0x61d   : >> { %v1195_v20 = vsub.f32 %v2813_v13, %v1182_v21  ;;  %v1208_v13 = vld [vmem:[#allocation5 + $0x10] sm:$0xff] }
 0x61e   : >> { %v1212_v32 = vmul.f32 %v2122_v50, %v1208_v13 }
 0x61f   : >> { %v2132_v23 = vpop.eup %2131  ;;  %v1200_v24 = vmul.f32 1.442695, %v1195_v20 }
 0x620   : >> { %v1214_v25 = vsel %vm1145_vm7, %v2132_v23, 0.0  ;;  %v1262_v26 = vpack.c.bf16 %v2132_v23, %v2132_v23 }
 0x621   : >> { %2133 = vpow2.f32 %v1200_v24  ;;  %1215 = vadd.xlane.f32.xlu2 %v1214_v25 }
 0x622   : >> { %1864 = vmatmul.msk.bf16.vlgmr.msrb.gmra.mxu0 %vm1145_vm7, %v1262_v26 }
 0x624   : >> { %v1241_v29 = vpop.permute.xlu1 %1240 }
 0x625   : >> { %v1258_v3 = vmul.f32 %v1241_v29, %v1234_v59 }
 0x626   : >> { %v1251_v30 = vpop.permute.xlu0 %1250 }
 0x627   : >> { %v2134_v9 = vpop.eup %2133  ;;  %v1260_v42 = vmul.f32 %v1251_v30, %v1236_v40 }
 0x628   : >> { %v1217_v27 = vsel %vm1145_vm7, %v2134_v9, 0.0  ;;  %v1263_v28 = vpack.c.bf16 %v2134_v9, %v2134_v9 }
 0x629   : >> { %1218 = vadd.xlane.f32.xlu2 %v1217_v27 }
 0x62a   : >> { %1869 = vmatmul.msk.bf16.vlgmr.msrb.gmra.mxu1 %vm1145_vm7, %v1263_v28 }
 0x62c   : >> { %v1246_v31 = vpop.permute.xlu1 %1245 }
 0x62d   : >> { %v1259_v8 = vmul.f32 %v1246_v31, %v1235_v6 }
 0x634   : >> { %v1256_v33 = vpop.permute.xlu1 %1255 }
 0x635   : >> { %v1261_v61 = vmul.f32 %v1256_v33, %v1237_v53 }
 0x683   : >> { %v1222_v34 = vpop.xlane.xlu0 %1221 }
 0x684   : >> { %v1228_v35 = vadd.f32 %v1222_v34, %v1212_v32 }
 0x686   : >> { %1232 = vst.msk [vmem:[#allocation5 + $0x10] sm:$0xff] %vm983_vm4, %v1228_v35 }
 0x68b   : >> { %v1225_v38 = vpop.xlane.xlu1 %1224 }
 0x68c   : >> { %v1229_v39 = vadd.f32 %v1225_v38, %v1213_v37 }
 0x68e   : >> { %1233 = vst.msk [vmem:[#allocation5 + $0x18] sm:$0xff] %vm983_vm4, %v1229_v39 }
 0x694   : >> { %v1328_v44 = vpop.f32.mrf.mxu2  ;;  %v1216_v45 = vpop.xlane.xlu2 %1215 }
 0x695   : >> { %v1356_v47 = vadd.f32 %v1328_v44, %v1260_v42  ;;  %v1226_v50 = vadd.f32 %v1216_v45, %v1210_v43 }
 0x697   : >> { %1360 = vst.msk [vmem:[#allocation6 + $0x10] sm:$0xff] %vm992_vm5, %v1356_v47 }
 0x698   : >> { %1230 = vst.msk [vmem:[#allocation5] sm:$0xff] %vm983_vm4, %v1226_v50 }
 0x69c   : >> { %v1330_v62 = vpop.f32.mrf.mxu2  ;;  %v1350_v63 = vpop.f32.mrf.mxu3 }
 0x69d   : >> { %v1357_v1 = vadd.f32 %v1350_v63, %v1261_v61  ;;  %v1219_v2 = vpop.xlane.xlu2 %1218 }
 0x69e   : >> { %v1227_v46 = vadd.f32 %v1219_v2, %v1211_v0 }
 0x69f   : >> { %1361 = vst.msk [vmem:[#allocation6 + $0x18] sm:$0xff] %vm992_vm5, %v1357_v1  ;;  %v1284_v4 = vpop.f32.mrf.mxu0 }
 0x6a0   : >> { %1231 = vst.msk [vmem:[#allocation5 + $0x8] sm:$0xff] %vm983_vm4, %v1227_v46  ;;  %v1354_v5 = vadd.f32 %v1284_v4, %v1258_v3 }
 0x6a2   : >> { %1358 = vst.msk [vmem:[#allocation6] sm:$0xff] %vm992_vm5, %v1354_v5 }
 0x6a4   : >> { %v1352_v7 = vpop.f32.mrf.mxu3 }
 0x6a7   : >> { %v1286_v11 = vpop.f32.mrf.mxu0  ;;  %v1306_v15 = vpop.f32.mrf.mxu1 }
 0x6a8   : >> { %v1355_v16 = vadd.f32 %v1306_v15, %v1259_v8 }
 0x6aa   : >> { %1359 = vst.msk [vmem:[#allocation6 + $0x8] sm:$0xff] %vm992_vm5, %v1355_v16 }
 0x6ab   : > { %1017 = sbr.rel (!%p1014_p6) target bundleno = 1182 (0x49e), region = 158 }
 0x6af   : >> { %v1308_v54 = vpop.f32.mrf.mxu1 }
 0x6b0 PF: > { %v1369_v18 = vld [vmem:[#allocation5 + $0x18] sm:$0xff]  ;;  %v1366_v17 = vld [vmem:[#allocation5] sm:$0xff]  ;;  %v2410_v19 = vmov 0   ;;  %v1367_v21 = vld [vmem:[#allocation5 + $0x8] sm:$0xff]  ;;  %vm1397_vm8 = vcmask 1043456   ;;  %s3017_s5 = sld [smem:[#allocation31_spill]] }
 0x6b1   : > { %2136 = vset.pattern.permute.xlu1 %v2410_v19  ;;  %2135 = vset.pattern.permute.xlu0 %v2410_v19  ;;  %2142 = vrcp.f32 %v1369_v18  ;;  %v1368_v20 = vld [vmem:[#allocation5 + $0x10] sm:$0xff]  ;;  %v1474_v48 = vld [vmem:[#allocation12 + $0xc] sm:$0xf]  ;;  %v1443_v49 = vld [vmem:[#allocation12 + $0x8] sm:$0xf]  ;;  %s3018_s25 = sld [smem:[#allocation32_spill]] }
 0x6b2   : > { %2144 = vrcp.f32 %v1366_v17  ;;  %v1382_v12 = vld [vmem:[#allocation12] sm:$0xf]  ;;  %v1479_v51 = vsel %vm1397_vm8, %v1474_v48, 0  ;;  %v1448_v52 = vsel %vm1397_vm8, %v1443_v49, 0  ;;  %v1393_v55 = vld [vmem:[#allocation12 + $0x4] sm:$0xf] }
 0x6b3   : > { %2146 = vrcp.f32 %v1367_v21  ;;  %v1418_v14 = vsel %vm1397_vm8, %v1382_v12, 0  ;;  %1488 = vmatpush.bf16.msra.mxu3 %v1479_v51  ;;  %v1399_v56 = vsel %vm1397_vm8, %v1393_v55, 0  ;;  %v1465_v57 = vld [vmem:[#allocation6 + $0x18] sm:$0xff]  ;;  %v1374_v58 = vld [vmem:[#allocation6] sm:$0xff]  ;;  %v1384_v13 = vld [vmem:[#allocation6 + $0x8] sm:$0xff]  ;;  %s3019_s12 = sld [smem:[#allocation33_spill]] }
 0x6b4   : > { %2148 = vrcp.f32 %v1368_v20  ;;  %1427 = vmatpush.bf16.msra.mxu2 %v1418_v14  ;;  %1408 = vmatpush.bf16.msra.mxu0 %v1399_v56  ;;  %v1434_v35 = vld [vmem:[#allocation6 + $0x10] sm:$0xff]  ;;  %v2137_v60 = vld [vmem:[%s2975_s8] ss:$0 sm:$0xff]  ;;  %v1945_v5 = vld [vmem:[#allocation13] sm:$0xff]  ;;  %s1926_s29 = sshll.u32 %s2370_s22, 2  ;;  %s3020_s20 = sld [smem:[#allocation34_spill]] }
 0x6b5   : > { %v1946_v4 = vld [vmem:[#allocation13 + $0x8] sm:$0xff]  ;;  %v1951_v16 = vld [vmem:[%s2980_s13 + $0x20] sm:$0xff]  ;;  %s1666_s26 = sadd.s32 %s2366_s21, %s1926_s29  ;;  %s3022_s23 = sld [smem:[#allocation35_spill]] }
 0x6b6   : > { %v1953_v8 = vld [vmem:[%s2980_s13 + $0x30] sm:$0xff]  ;;  %v1952_v15 = vld [vmem:[%s2980_s13 + $0x28] sm:$0xff]  ;;  %s1927_s18 = sshll.u32 %s1666_s26, 3  ;;  %s1670_s27 = sshll.u32 %s566_s17, 4  ;;  %s1671_s27 = int_to_ptr.vmem [resolvable:$true] %s1670_s27 }
 0x6b7   : > { %v2143_v23 = vpop.eup %2142  ;;  %v1949_v21 = vld [vmem:[%s2980_s13 + $0x10] sm:$0xff]  ;;  %v2139_v12 = vld [vmem:[%s3018_s25] ss:$0 sm:$0xff]  ;;  %v1948_v51 = vld [vmem:[%s2980_s13 + $0x8] sm:$0xff]  ;;  %s1656_s21 = scalar_lea.sflag [#allocation9], %s564_s9 }
 0x6b8   : > { %v2145_v24 = vpop.eup %2144  ;;  %1468 = vperm.xlu1 %2136, %v2143_v23   ;;  %1457 = vmatpush.bf16.msrb.mxu2 %v1448_v52  ;;  %v1947_v52 = vld [vmem:[%s2980_s13] sm:$0xff] }
 0x6b9   : > { %1377 = vperm.xlu0 %2135, %v2145_v24   ;;  %v2147_v25 = vpop.eup %2146  ;;  %1563 = vmatpush.bf16.msrb.mxu0 %v1946_v4  ;;  %v2138_v24 = vld [vmem:[%s3017_s5] ss:$0 sm:$0xff] }
 0x6ba   : > { %v2149_v26 = vpop.eup %2148  ;;  %v2140_v55 = vld [vmem:[%s3019_s12] ss:$0 sm:$0xff] }
 0x6bb   : > { %s3023_s14 = smov %s3022_s23  ;;  %s1668_s16 = scalar_lea.hbm %s3022_s23, %s1927_s18 }
 0x6bc   : > { %s1672_s30 = sshll.u32 %s1668_s16, 4  ;;  %s2292_s18 = scalar_lea.hbm %s3023_s14, 64  ;;  %s1673_s30 = int_to_ptr.hbm [resolvable:$true] %s1672_s30 }
 0x6bd   : > { %1564 = vmatpush.bf16.msrb.mxu0 %v1945_v5  ;;  %s2286_s22 = sshra.s32 %s1673_s30, 4  ;;  %s2287_s22 = int_to_ptr.hbm [resolvable:$true] %s2286_s22 }
 0x6be   : > { %s2288_s12 = scalar_lea.hbm %s2287_s22, 8  ;;  %p2293_p11 = scmp.lt.s32.totalorder %s2287_s22, %s3023_s14 }
 0x6bf   : > { %p2289_p7 = scmp.ne.s32.totalorder %s2287_s22, %s2288_s12  ;;  %p2294_p12 = scmp.lt.s32.totalorder %s2292_s18, %s2288_s12 }
 0x6c0   : > { %1387 = vperm.xlu1 %2136, %v2147_v25  }
 0x6c1   : > { %1437 = vperm.xlu0 %2135, %v2149_v26   ;;  %p2290_p9 = pnand %p2289_p7, %p2543_p3  ;;  %p2295_p13 = por %p2294_p12, %p2293_p11 }
 0x6c3   : > { %p2291_p10 = pneg %p2290_p9 }
 0x6c5   : > { %p2296_p0 = pnand %p2295_p13, %p2291_p10 }
 0x72a   : > { %v1469_v9 = vpop.permute.xlu1 %1468 }
 0x72b   : > { %v1471_v27 = vmul.f32 %v1469_v9, %v1465_v57  ;;  %v1378_v28 = vpop.permute.xlu0 %1377 }
 0x72c   : > { %v1380_v29 = vmul.f32 %v1378_v28, %v1374_v58  ;;  %v2141_v28 = vld [vmem:[%s3020_s20] ss:$0 sm:$0xff] }
 0x72d   : > { %v1472_v31 = vpack.c.bf16 %v1471_v27, %v1471_v27 }
 0x72e   : > { %v1381_v30 = vpack.c.bf16 %v1380_v29, %v1380_v29 }
 0x72f   : > { %1883 = vmatmul.msk.bf16.vlgmr.msra.gmra.mxu3 %vm992_vm5, %v1472_v31 }
 0x730   : > { %1881 = vmatmul.msk.bf16.vlgmr.msra.gmra.mxu2 %vm992_vm5, %v1381_v30 }
 0x732   : > { %v1388_v32 = vpop.permute.xlu1 %1387 }
 0x733   : > { %v1390_v33 = vmul.f32 %v1388_v32, %v1384_v13  ;;  %v1438_v36 = vpop.permute.xlu0 %1437 }
 0x734   : > { %v1440_v37 = vmul.f32 %v1438_v36, %v1434_v35 }
 0x735   : > { %v1391_v34 = vpack.c.bf16 %v1390_v33, %v1390_v33 }
 0x736   : > { %v1441_v38 = vpack.c.bf16 %v1440_v37, %v1440_v37 }
 0x737   : > { %1880 = vmatmul.msk.bf16.vlgmr.msra.gmra.mxu0 %vm992_vm5, %v1391_v34 }
 0x740   : > { %1882 = vmatmul.msk.bf16.vlgmr.msrb.gmra.mxu2 %vm992_vm5, %v1441_v38 }
 0x7b2   : > { %v1490_v39 = vpop.f32.mrf.mxu3 }
 0x7b3   : > { %v1429_v40 = vpop.f32.mrf.mxu2 }
 0x7b4   : > { %v1410_v41 = vpop.f32.mrf.mxu0 }
 0x7b5   : > { %v1430_v45 = vadd.f32 %v1429_v40, %v1410_v41 }
 0x7ba   : > { %v1492_v42 = vpop.f32.mrf.mxu3 }
 0x7bb   : > { %v1431_v43 = vpop.f32.mrf.mxu2 }
 0x7bc   : > { %v1412_v44 = vpop.f32.mrf.mxu0 }
 0x7c3   : > { %v1459_v47 = vpop.f32.mrf.mxu2 }
 0x7c4   : > { %v1463_v50 = vadd.f32 %v1459_v47, %v1430_v45 }
 0x7c6   : > { %v1494_v53 = vadd.f32 %v1490_v39, %v1463_v50 }
 0x7c8   : > { %v1495_v59 = vadd.f32 %v1494_v53, %v2715_v10  ;;  %v1954_v10 = vld [vmem:[%s2980_s13 + $0x38] sm:$0xff] }
 0x7c9   : > { %1640 = vmatpush.bf16.msra.mxu1 %v1954_v10 }
 0x7ca   : > { %v2871_v61 = vadd.f32 %v2137_v60, %v1495_v59 }
 0x7cb   : > { %v1461_v62 = vpop.f32.mrf.mxu2 }
 0x7cc   : > { %v1501_v63 = vsel %vm891_vm15, %v2871_v61, 0.0 }
 0x7cd   : > { %1502 = vadd.xlane.f32.xlu2 %v1501_v63  ;;  %1641 = vmatpush.bf16.msra.mxu1 %v1953_v8 }
 0x7d1   : > { %1642 = vmatpush.bf16.msra.mxu1 %v1952_v15 }
 0x7d5   : > { %1643 = vmatpush.bf16.msra.mxu1 %v1951_v16 }
 0x840   : > { %v1503_v0 = vpop.xlane.xlu2 %1502 }
 0x841   : > { %v1504_v1 = vmul.f32 %v1503_v0, %v2725_v22 }
 0x843   : > { %v1505_v2 = vsub.f32 %v2871_v61, %v1504_v1 }
 0x845   : > { %v1506_v3 = vmul.f32 %v1505_v2, %v1505_v2 }
 0x847   : > { %v1507_v46 = vsel %vm891_vm15, %v1506_v3, 0.0 }
 0x848   : > { %1508 = vadd.xlane.f32.xlu2 %v1507_v46 }
 0x8bb   : > { %v1509_v6 = vpop.xlane.xlu2 %1508 }
 0x8bc   : > { %v1510_v7 = vmul.f32 %v1509_v6, %v2725_v22  ;;  %v1950_v22 = vld [vmem:[%s2980_s13 + $0x18] sm:$0xff] }
 0x8bd   : > { %1644 = vmatpush.bf16.msra.mxu1 %v1950_v22 }
 0x8be   : > { %v1511_v11 = vadd.f32 1e-05, %v1510_v7 }
 0x8c0   : > { %2150 = vrsqrt.f32 %v1511_v11  ;;  %vm1518_vm10 = vweird.f32 %v1511_v11 }
 0x8c1   : > { %1645 = vmatpush.bf16.msra.mxu1 %v1949_v21 }
 0x8c5   : > { %1646 = vmatpush.bf16.msra.mxu1 %v1948_v51 }
 0x8c6   : > { %v2151_v54 = vpop.eup %2150 }
 0x8c7   : > { %v1513_v18 = vmul.f32 %v2151_v54, %v1511_v11  ;;  %vm1519_vm9 = vweird.f32 %v2151_v54 }
 0x8c8   : > { %vm1520_vm11 = vmor %vm1518_vm10, %vm1519_vm9 }
 0x8c9   : > { %v1514_v17 = vmul.f32 %v2151_v54, %v1513_v18  ;;  %1647 = vmatpush.bf16.msra.mxu1 %v1947_v52 }
 0x8cb   : > { %v1515_v19 = vmul.f32 0.5, %v1514_v17 }
 0x8cd   : > { %v1516_v20 = vsub.f32 1.5, %v1515_v19 }
 0x8cf   : > { %v1517_v23 = vmul.f32 %v2151_v54, %v1516_v20 }
 0x8d1   : > { %v1521_v25 = vsel %vm1520_vm11, %v2151_v54, %v1517_v23 }
 0x8d2   : > { %v1522_v26 = vmul.f32 %v1521_v25, %v1505_v2 }
 0x8d4   : > { %v1527_v14 = vmul.f32 %v2138_v24, %v1522_v26 }
 0x8d6   : > { %v1532_v48 = vadd.f32 %v2139_v12, %v1527_v14 }
 0x8d8   : > { %v1533_v49 = vpack.c.bf16 %v1532_v48, %v1532_v48 }
 0x8da   : > { %1892 = vmatmul.msk.bf16.vlgmr.msrb.gmra.mxu0 %vm891_vm15, %v1533_v49 }
 0x957   : > { %v1566_v56 = vpop.f32.mrf.mxu0 }
 0x958   : > { %v1567_v57 = vadd.f32 %v2140_v55, %v1566_v56 }
 0x95a   : > { %v1570_v58 = vmax.f32 %v1567_v57, 0.0 }
 0x95c   : > { %v1571_v9 = vpack.c.bf16 %v1570_v58, %v1570_v58 }
 0x95e   : > { %1648 = vmatmul.bf16.vlgmr.msra.gmra.mxu1 %v1571_v9 }
 0x95f   : > { %v1568_v27 = vpop.f32.mrf.mxu0 }
 0x9db   : > { %v1649_v29 = vpop.f32.mrf.mxu1 }
 0x9dc   : > { %v1650_v31 = vadd.f32 %v2141_v28, %v1649_v29 }
 0x9de   : > { %v1653_v30 = vadd.f32 %v1650_v31, %v2871_v61 }
 0x9e0   : > { %1654 = vst.msk [vmem:[%s566_s17] sm:$0xff] %vm891_vm15, %v1653_v30 }
 0x9e1   : > { %2299 = shalt.err (!%p2296_p0)
}
 0x9e2   : > { %1971 = dma.vmem_to_hbm [thread:$0]  (%p2543_p3), %s1671_s27, 128, %s1673_s30, %s1656_s21  }
 0x9e3   : > { %v1651_v13 = vpop.f32.mrf.mxu1 }
 0x9e4 PF: > { %s3024_s9 = sld [smem:[#allocation24_spill]] }
 0x9e5   : > { %s3025_s10 = sld [smem:[#allocation20_spill]] }
 0x9ea   : > { %p1998_p1 = scmp.ge.s32.totalorder %s3024_s9, 2 }
 0x9eb   : > { %s1684_s20 = sand.u32 1, %s3025_s10  }
 0x9ec   : > { %p1987_p2 = pnand %p1998_p1, %p2552_p8  ;;  %s1685_s25 = scalar_lea.sflag [#allocation9], %s1684_s20 }
 0x9ee   : > { %p1988_p4 = pneg %p1987_p2 }
 0x9f0   : > { %2349 = dma.done.wait (%p1988_p4), %s1685_s25, 128  }
 0x9f1   : > { %2351 = vsyncadd (%p1988_p4), %s1685_s25, 4294967168  ;;  %s31_s25 = sadd.s32 1, %s3024_s9   ;;  %s3027_s28 = sld [smem:[#allocation21_spill]] }
 0x9f2   : > { %p28_p5 = scmp.ge.s32.totalorder %s31_s25, 10   ;;  %s3028_s20 = sld [smem:[#allocation29_spill]] }
 0x9f3   : > { %s3029_s21 = sld [smem:[#allocation22_spill]]  ;;  %s3033_s18 = smov %s2358_s19 }
 0x9f4   : > { %s3030_s22 = sld [smem:[#allocation23_spill]]  ;;  %30 = sbr.rel (!%p28_p5) target bundleno = 15 (0xf), region = 169 }
 0x9f5   : > { %s3031_s23 = sld [smem:[#allocation25_spill]] }
 0x9f6   : > { %s3032_s24 = sld [smem:[#allocation27_spill]] }
 0x9f7   : > { %s3034_s19 = smov %s3027_s28 }
 0x9f9   :  { %1691 = vsyncpa [#allocation8], 1 }
 0x9fa   :  { %1693 = vsyncpa [#allocation8 + $0x1], 1 }
 0x9fb   :  { %1694 = vsyncpa [#allocation11], 1 }
 0x9fc   :  { %1695 = vsyncpa [#allocation14], 1 }
 0x9fd   :  { %1696 = vsyncpa [#allocation9], 1 }
 0x9fe   :  { %1698 = vsyncpa [#allocation9 + $0x1], 1 }

</bundles_post_ra>
